<compile_context>
chip_gen: v7x
topology: tpu7x:2x2x1
jax: 0.10.0
libtpu: 0.0.40
codegen_flags: <defaults>
</compile_context>

<pallas_src>
import functools

import jax
import jax.numpy as jnp
from jax.experimental import pallas as pl
from jax.experimental.pallas import tpu as pltpu


# -----------------------------------------------------------------------------
# Fused multi-head attention layer kernel (one program per batch element)
# -----------------------------------------------------------------------------
def _attn_layer_kernel(nh, H, Fe, merge, h_ref, e_ref, wext_ref, wc_ref, mask_ref, o_ref):
    # h_ref:    (1, N, D)          node states for one batch element
    # e_ref:    (1, Fe, N, N)      edge features, lane-dense over j (Fe out of the lane dim)
    # wext_ref: (D, nh*H + 2*nh)   [Wfc_0|...|Wfc_{nh-1} | Wfc_h@a_h cols | Wfc_h@b_h cols]
    # wc_ref:   (nh, Fe)  SMEM     edge coefficients of attn_fc per head (scalar reads)
    # mask_ref: (1, N, 1)          node mask
    # o_ref:    (1, N, nh*H) for 'cat'  /  (1, N, H) for 'mean'
    h = h_ref[0]                                                           # (N, D)
    full = jnp.dot(h, wext_ref[...], preferred_element_type=jnp.float32)   # (N, nh*H + 2nh)
    zcols = nh * H
    z_all = full[:, :zcols]                                                # (N, nh*H)
    s_ab = full[:, zcols:]                                                 # (N, 2nh): [a.z | b.z]
    e = e_ref[0]                                                           # (Fe, N, N)
    mask = mask_ref[0]                                                     # (N, 1)

    outs = []
    for hd in range(nh):
        # c_h . e_ij  -- unrolled scalar*matrix accumulation, scalars from SMEM (VPU work)
        s_e = wc_ref[hd, 0] * e[0]
        for f in range(1, Fe):
            s_e = s_e + wc_ref[hd, f] * e[f]                               # (N, N)

        s_j_col = s_ab[:, hd:hd + 1]                                       # (N, 1): a_h.z_h[j]
        s_i_col = s_ab[:, nh + hd:nh + hd + 1]                             # (N, 1): b_h.z_h[i]
        scores = s_i_col + jnp.transpose(s_j_col) + s_e                    # (N, N): score[i, j]
        scores = jnp.where(scores >= 0, scores, 0.01 * scores)             # leaky_relu (slope .01)

        # softmax over ALL N*N pairs (PyTorch F.softmax on the flattened dim=1).
        # Only row sums of alpha are needed: out_i = z_i * sum_j alpha[i, j].
        m = jnp.max(jnp.max(scores, axis=1, keepdims=True), axis=0, keepdims=True)  # (1, 1)
        p = jnp.exp(scores - m)                                            # (N, N)
        row_p = jnp.sum(p, axis=1, keepdims=True)                          # (N, 1)
        denom = jnp.sum(row_p, axis=0, keepdims=True)                      # (1, 1)
        row_sum = row_p * pl.reciprocal(denom, approx=True)                # (N, 1)

        z_h = z_all[:, hd * H:(hd + 1) * H]                                # (N, H)
        outs.append(z_h * row_sum)                                         # (N, H)

    if merge == "cat":
        out = jax.nn.sigmoid(jnp.concatenate(outs, axis=-1))               # (N, nh*H) lane-dense
    else:  # 'mean': mean over heads BEFORE sigmoid (matches MPNNMultiHAttn)
        acc = outs[0]
        for o in outs[1:]:
            acc = acc + o
        out = jax.nn.sigmoid(acc * (1.0 / nh))                             # (N, H)
    o_ref[0] = (out * mask).astype(o_ref.dtype)


def attn_layer_pallas(h, e_t, wext, wc, mask, *, nh, H, merge):
    """One MPNNMultiHAttn layer (all heads fused).  Returns (B, N, nh*H) or (B, N, H)."""
    B, N, D = h.shape
    Fe = e_t.shape[1]
    C = wext.shape[1]
    out_f = nh * H if merge == "cat" else H
    # TODO(synk): for large N the (Fe, N, N) edge block must be tiled over a j grid axis
    # (two-pass / running softmax) to stay inside v7x's 64 MiB VMEM; at toy N it fits easily.
    return pl.pallas_call(
        functools.partial(_attn_layer_kernel, nh, H, Fe, merge),
        out_shape=jax.ShapeDtypeStruct((B, N, out_f), jnp.float32),
        grid=(B,),
        in_specs=[
            pl.BlockSpec((1, N, D), lambda b: (b, 0, 0)),
            pl.BlockSpec((1, Fe, N, N), lambda b: (b, 0, 0, 0)),
            pl.BlockSpec((D, C), lambda b: (0, 0)),
            pl.BlockSpec(memory_space=pltpu.MemorySpace.SMEM),   # (nh, Fe) edge coefficients
            pl.BlockSpec((1, N, 1), lambda b: (b, 0, 0)),
        ],
        out_specs=pl.BlockSpec((1, N, out_f), lambda b: (b, 0, 0)),
        compiler_params=pltpu.CompilerParams(
            dimension_semantics=("parallel",)),
    )(h, e_t, wext, wc, mask)


# -----------------------------------------------------------------------------
# Fused readout kernel: two MLPs + sigmoid gating + mask + node sum in one call
# -----------------------------------------------------------------------------
def _readout_kernel(n_i, n_j, B, N, *refs):
    h0_ref, ht_ref, mask_ref = refs[0], refs[1], refs[2]
    wi = refs[3:3 + 2 * n_i]
    wj = refs[3 + 2 * n_i:3 + 2 * (n_i + n_j)]
    o_ref = refs[3 + 2 * (n_i + n_j)]

    h0 = h0_ref[...]                                   # (B*N, H)
    ht = ht_ref[...]                                   # (B*N, H)
    mask = mask_ref[...]                               # (B*N, 1)

    x_i = jnp.concatenate([h0, ht], axis=-1)           # (B*N, 2H)
    for l in range(n_i):
        x_i = jnp.dot(x_i, wi[2 * l][...], preferred_element_type=jnp.float32) + wi[2 * l + 1][...]
        if l < n_i - 1:
            x_i = jnp.maximum(x_i, 0.0)
    x_j = ht
    for l in range(n_j):
        x_j = jnp.dot(x_j, wj[2 * l][...], preferred_element_type=jnp.float32) + wj[2 * l + 1][...]
        if l < n_j - 1:
            x_j = jnp.maximum(x_j, 0.0)

    node = jax.nn.sigmoid(x_i) * x_j * mask            # (B*N, target)
    rows = [jnp.sum(node[b * N:(b + 1) * N, :], axis=0, keepdims=True) for b in range(B)]
    o_ref[...] = jnp.concatenate(rows, axis=0).astype(o_ref.dtype)   # (B, target)


def readout_pallas(h0, hT, mask, r_i_layers, r_j_layers):
    B, N, Hd = h0.shape
    T = r_i_layers[-1][0].shape[1]
    args = [h0.reshape(B * N, Hd), hT.reshape(B * N, Hd), mask.reshape(B * N, 1)]
    for W, b in r_i_layers:
        args += [W, b]
    for W, b in r_j_layers:
        args += [W, b]
    return pl.pallas_call(
        functools.partial(_readout_kernel, len(r_i_layers), len(r_j_layers), B, N),
        out_shape=jax.ShapeDtypeStruct((B, T), jnp.float32),
    )(*args)


# -----------------------------------------------------------------------------
# Parameter init (deterministic; mirrors module shapes, pre-fused for the kernel)
# -----------------------------------------------------------------------------
def _xavier_normal(key, fan_out, fan_in, gain):
    std = gain * (2.0 / (fan_in + fan_out)) ** 0.5
    return std * jax.random.normal(key, (fan_out, fan_in), dtype=jnp.float32)


def init_attn_layer(key, d_in, H, Fe, nh):
    """Per-head fc + attn_fc weights, pre-fused:
       Wext = [Wfc_0|...|Wfc_{nh-1} | Wfc_h@a_h cols | Wfc_h@b_h cols]   (d_in, nh*H + 2nh)
       wc   = per-head edge coefficients                                 (nh, Fe)
    """
    gain = 2.0 ** 0.5  # nn.init.calculate_gain('relu')
    ks = jax.random.split(key, 2 * nh)
    wfc_cols, wa_cols, wb_cols, wc_rows = [], [], [], []
    for i in range(nh):
        Wfc = _xavier_normal(ks[2 * i], H, d_in, gain).T                  # (d_in, H), used as x @ Wfc
        attn = _xavier_normal(ks[2 * i + 1], 1, 2 * H + Fe, gain)[0]      # (2H+Fe,)
        a, b, c = attn[:H], attn[H:2 * H], attn[2 * H:]
        wfc_cols.append(Wfc)
        wa_cols.append(Wfc @ a)     # column s.t. x @ col == a . (x @ Wfc)  -> s_j
        wb_cols.append(Wfc @ b)     # column s.t. x @ col == b . (x @ Wfc)  -> s_i
        wc_rows.append(c)
    wext = jnp.concatenate(
        [jnp.concatenate(wfc_cols, axis=1),
         jnp.stack(wa_cols, axis=1),
         jnp.stack(wb_cols, axis=1)], axis=1)                             # (d_in, nh*H + 2nh)
    wc = jnp.stack(wc_rows, axis=0)                                       # (nh, Fe)
    return dict(Wext=wext, wc=wc)


def init_nnet(key, dims):
    layers = []
    for i in range(len(dims) - 1):
        key, k1, k2 = jax.random.split(key, 3)
        W = 0.1 * jax.random.normal(k1, (dims[i], dims[i + 1]), jnp.float32)
        b = 0.1 * jax.random.normal(k2, (1, dims[i + 1]), jnp.float32)
        layers.append((W, b))
    return layers


# -----------------------------------------------------------------------------
# MPNNAttn forward (method=3, num_heads>1 path, type='regression')
# -----------------------------------------------------------------------------
def mpnn_attn_forward(g, h_in, e, params, merges, H, num_heads):
    del g  # 'g' is unused by MPNNAttn.forward, kept for signature fidelity
    B, N, Fn = h_in.shape
    pad = jnp.zeros((B, N, H - Fn), h_in.dtype)
    h0 = jnp.concatenate([h_in, pad], axis=2)                               # (B, N, H)
    mask = (jnp.sum(h_in, axis=2, keepdims=True) > 0).astype(jnp.float32)   # (B, N, 1)
    e_t = jnp.transpose(e, (0, 3, 1, 2))                                    # (B, Fe, N, N): Fe off lanes

    hs = [h0]
    for t, merge in enumerate(merges):
        p = params["layers"][t]
        h_t = attn_layer_pallas(hs[t], e_t, p["Wext"], p["wc"], mask,
                                nh=num_heads, H=H, merge=merge)
        hs.append(h_t)

    # TODO(synk): ReadoutFunction('mpnn') source was not provided; implementing the standard
    # nmp_qc 'mpnn' readout: sum_i mask_i * ( sigmoid(NNet_i([h0_i, hT_i])) * NNet_j(hT_i) ),
    # with NNet = MLP(hlayers=(128, 256, 128), ReLU on hidden layers), fused in one kernel.
    return readout_pallas(hs[0], hs[-1], mask, params["r_i"], params["r_j"])
    # type='regression' -> no LogSoftmax


# -----------------------------------------------------------------------------
if __name__ == "__main__":
    # Small shapes consistent with the module:
    B, N = 2, 8           # batch, nodes
    Fn, Fe = 6, 4         # in_n = [node_feat, edge_feat]
    H = 32                # hidden_state_size
    l_target = 3
    num_heads = 4
    n_layers = 2
    method = 3            # only method=3 path implemented (default)

    key = jax.random.PRNGKey(0)
    k_h, k_e, k_l0, k_l1, k_ri, k_rj = jax.random.split(key, 6)

    # Inputs (graph adjacency g is unused by the forward pass)
    g = (jax.random.uniform(k_h, (B, N, N)) > 0.5).astype(jnp.float32)
    h_in = jax.random.uniform(k_h, (B, N, Fn), dtype=jnp.float32)
    e = jax.random.normal(k_e, (B, N, N, Fe), dtype=jnp.float32)

    # Layer structure for num_heads > 1: ['cat', ..., 'cat', 'mean']
    merges = ["cat"] * (n_layers - 1) + ["mean"]
    layer_in_dims = [H] + [H * num_heads] * (n_layers - 1)
    layer_keys = [k_l0, k_l1]
    params = {
        "layers": [
            init_attn_layer(layer_keys[t], layer_in_dims[t], H, Fe, num_heads)
            for t in range(n_layers)
        ],
        "r_i": init_nnet(k_ri, [2 * H, 128, 256, 128, l_target]),
        "r_j": init_nnet(k_rj, [H, 128, 256, 128, l_target]),
    }

    fwd = jax.jit(functools.partial(mpnn_attn_forward, merges=merges, H=H, num_heads=num_heads))
    res = fwd(g, h_in, e, params)
    jax.block_until_ready(res)
    assert res.shape == (B, l_target), res.shape
    print("KERNEL_OK")
</pallas_src>

<mosaic_0001>
module attributes {stable_mosaic.version = 11 : i64} {
  func.func @_attn_layer_kernel(%arg0: i32, %arg1: memref<1x8x32xf32, #tpu.memory_space<vmem>>, %arg2: memref<1x4x8x8xf32, #tpu.memory_space<vmem>>, %arg3: memref<32x136xf32, #tpu.memory_space<vmem>>, %arg4: memref<4x4xf32, #tpu.memory_space<smem>>, %arg5: memref<1x8x1xf32, #tpu.memory_space<vmem>>, %arg6: memref<1x8x128xf32, #tpu.memory_space<vmem>>) attributes {dimension_semantics = [#tpu.dimension_semantics<parallel>], iteration_bounds = array<i64: 2>, scalar_prefetch = 0 : i64, scratch_operands = 0 : i64, tpu.core_type = #tpu.core_type<tc>, window_params = [{transform_indices = @transform_0, window_bounds = array<i64: 1, 8, 32>}, {transform_indices = @transform_1, window_bounds = array<i64: 1, 4, 8, 8>}, {pipeline_mode = #tpu.pipeline_mode<synchronous>, transform_indices = @transform_2, window_bounds = array<i64: 32, 136>}, {transform_indices = @transform_3, window_bounds = array<i64: 4, 4>}, {transform_indices = @transform_4, window_bounds = array<i64: 1, 8, 1>}, {transform_indices = @transform_5, window_bounds = array<i64: 1, 8, 128>}]} {
    %c0 = arith.constant 0 : index
    %c0_0 = arith.constant 0 : index
    %c0_1 = arith.constant 0 : index
    %0 = vector.load %arg1[%c0, %c0_0, %c0_1] : memref<1x8x32xf32, #tpu.memory_space<vmem>>, vector<1x8x32xf32>
    %1 = vector.shape_cast %0 : vector<1x8x32xf32> to vector<8x32xf32>
    %c0_2 = arith.constant 0 : index
    %c0_3 = arith.constant 0 : index
    %2 = vector.load %arg3[%c0_2, %c0_3] : memref<32x136xf32, #tpu.memory_space<vmem>>, vector<32x136xf32>
    %cst = arith.constant dense<0.000000e+00> : vector<8x136xf32>
    %3 = tpu.matmul %1, %2, %cst {dimension_numbers = #tpu.dot_dimension_numbers<[1], [0], [0], [1], [0, 0, 1, 1], [], []>} : vector<8x32xf32>, vector<32x136xf32>, vector<8x136xf32> -> vector<8x136xf32>
    %4 = vector.extract_strided_slice %3 {offsets = [0, 0], sizes = [8, 128], strides = [1, 1]} : vector<8x136xf32> to vector<8x128xf32>
    %5 = vector.extract_strided_slice %3 {offsets = [0, 128], sizes = [8, 8], strides = [1, 1]} : vector<8x136xf32> to vector<8x8xf32>
    %c0_4 = arith.constant 0 : index
    %c0_5 = arith.constant 0 : index
    %c0_6 = arith.constant 0 : index
    %c0_7 = arith.constant 0 : index
    %6 = vector.load %arg2[%c0_4, %c0_5, %c0_6, %c0_7] : memref<1x4x8x8xf32, #tpu.memory_space<vmem>>, vector<1x4x8x8xf32>
    %7 = vector.shape_cast %6 : vector<1x4x8x8xf32> to vector<4x8x8xf32>
    %c0_8 = arith.constant 0 : index
    %c0_9 = arith.constant 0 : index
    %c0_10 = arith.constant 0 : index
    %8 = vector.load %arg5[%c0_8, %c0_9, %c0_10] : memref<1x8x1xf32, #tpu.memory_space<vmem>>, vector<1x8x1xf32>
    %9 = vector.shape_cast %8 : vector<1x8x1xf32> to vector<8x1xf32>
    %c0_11 = arith.constant 0 : index
    %c0_12 = arith.constant 0 : index
    %10 = memref.load %arg4[%c0_11, %c0_12] : memref<4x4xf32, #tpu.memory_space<smem>>
    %11 = vector.extract_strided_slice %7 {offsets = [0, 0, 0], sizes = [1, 8, 8], strides = [1, 1, 1]} : vector<4x8x8xf32> to vector<1x8x8xf32>
    %12 = vector.shape_cast %11 : vector<1x8x8xf32> to vector<8x8xf32>
    %13 = vector.broadcast %10 : f32 to vector<8x8xf32>
    %14 = arith.mulf %13, %12 : vector<8x8xf32>
    %c0_13 = arith.constant 0 : index
    %c1 = arith.constant 1 : index
    %15 = memref.load %arg4[%c0_13, %c1] : memref<4x4xf32, #tpu.memory_space<smem>>
    %16 = vector.extract_strided_slice %7 {offsets = [1, 0, 0], sizes = [1, 8, 8], strides = [1, 1, 1]} : vector<4x8x8xf32> to vector<1x8x8xf32>
    %17 = vector.shape_cast %16 : vector<1x8x8xf32> to vector<8x8xf32>
    %18 = vector.broadcast %15 : f32 to vector<8x8xf32>
    %19 = arith.mulf %18, %17 : vector<8x8xf32>
    %20 = arith.addf %14, %19 : vector<8x8xf32>
    %c0_14 = arith.constant 0 : index
    %c2 = arith.constant 2 : index
    %21 = memref.load %arg4[%c0_14, %c2] : memref<4x4xf32, #tpu.memory_space<smem>>
    %22 = vector.extract_strided_slice %7 {offsets = [2, 0, 0], sizes = [1, 8, 8], strides = [1, 1, 1]} : vector<4x8x8xf32> to vector<1x8x8xf32>
    %23 = vector.shape_cast %22 : vector<1x8x8xf32> to vector<8x8xf32>
    %24 = vector.broadcast %21 : f32 to vector<8x8xf32>
    %25 = arith.mulf %24, %23 : vector<8x8xf32>
    %26 = arith.addf %20, %25 : vector<8x8xf32>
    %c0_15 = arith.constant 0 : index
    %c3 = arith.constant 3 : index
    %27 = memref.load %arg4[%c0_15, %c3] : memref<4x4xf32, #tpu.memory_space<smem>>
    %28 = vector.extract_strided_slice %7 {offsets = [3, 0, 0], sizes = [1, 8, 8], strides = [1, 1, 1]} : vector<4x8x8xf32> to vector<1x8x8xf32>
    %29 = vector.shape_cast %28 : vector<1x8x8xf32> to vector<8x8xf32>
    %30 = vector.broadcast %27 : f32 to vector<8x8xf32>
    %31 = arith.mulf %30, %29 : vector<8x8xf32>
    %32 = arith.addf %26, %31 : vector<8x8xf32>
    %33 = vector.extract_strided_slice %5 {offsets = [0, 0], sizes = [8, 1], strides = [1, 1]} : vector<8x8xf32> to vector<8x1xf32>
    %34 = vector.extract_strided_slice %5 {offsets = [0, 4], sizes = [8, 1], strides = [1, 1]} : vector<8x8xf32> to vector<8x1xf32>
    %35 = tpu.transpose %33, [1, 0] : vector<8x1xf32> -> vector<1x8xf32>
    %36 = vector.broadcast %34 : vector<8x1xf32> to vector<8x8xf32>
    %37 = vector.broadcast %35 : vector<1x8xf32> to vector<8x8xf32>
    %38 = arith.addf %36, %37 : vector<8x8xf32>
    %39 = arith.addf %38, %32 : vector<8x8xf32>
    %cst_16 = arith.constant 0.000000e+00 : f32
    %40 = vector.broadcast %cst_16 : f32 to vector<8x8xf32>
    %41 = arith.cmpf oge, %39, %40 : vector<8x8xf32>
    %cst_17 = arith.constant 0.00999999977 : f32
    %42 = vector.broadcast %cst_17 : f32 to vector<8x8xf32>
    %43 = arith.mulf %42, %39 : vector<8x8xf32>
    %44 = arith.select %41, %39, %43 : vector<8x8xi1>, vector<8x8xf32>
    %cst_18 = arith.constant dense<0xFF800000> : vector<8xf32>
    %45 = vector.multi_reduction <maximumf>, %44, %cst_18 [1] : vector<8x8xf32> to vector<8xf32>
    %46 = vector.shape_cast %45 : vector<8xf32> to vector<8x1xf32>
    %cst_19 = arith.constant dense<0xFF800000> : vector<1xf32>
    %47 = vector.multi_reduction <maximumf>, %46, %cst_19 [0] : vector<8x1xf32> to vector<1xf32>
    %48 = vector.shape_cast %47 : vector<1xf32> to vector<1x1xf32>
    %49 = vector.broadcast %48 : vector<1x1xf32> to vector<8x8xf32>
    %50 = arith.subf %44, %49 : vector<8x8xf32>
    %51 = math.exp %50 : vector<8x8xf32>
    %cst_20 = arith.constant dense<0.000000e+00> : vector<8xf32>
    %52 = vector.multi_reduction <add>, %51, %cst_20 [1] : vector<8x8xf32> to vector<8xf32>
    %53 = vector.shape_cast %52 : vector<8xf32> to vector<8x1xf32>
    %cst_21 = arith.constant dense<0.000000e+00> : vector<1xf32>
    %54 = vector.multi_reduction <add>, %53, %cst_21 [0] : vector<8x1xf32> to vector<1xf32>
    %55 = vector.shape_cast %54 : vector<1xf32> to vector<1x1xf32>
    %56 = tpu.reciprocal %55 {approx = true} : vector<1x1xf32> -> vector<1x1xf32>
    %57 = vector.broadcast %56 : vector<1x1xf32> to vector<8x1xf32>
    %58 = arith.mulf %53, %57 : vector<8x1xf32>
    %59 = vector.extract_strided_slice %4 {offsets = [0, 0], sizes = [8, 32], strides = [1, 1]} : vector<8x128xf32> to vector<8x32xf32>
    %60 = vector.broadcast %58 : vector<8x1xf32> to vector<8x32xf32>
    %61 = arith.mulf %59, %60 : vector<8x32xf32>
    %c1_22 = arith.constant 1 : index
    %c0_23 = arith.constant 0 : index
    %62 = memref.load %arg4[%c1_22, %c0_23] : memref<4x4xf32, #tpu.memory_space<smem>>
    %63 = vector.extract_strided_slice %7 {offsets = [0, 0, 0], sizes = [1, 8, 8], strides = [1, 1, 1]} : vector<4x8x8xf32> to vector<1x8x8xf32>
    %64 = vector.shape_cast %63 : vector<1x8x8xf32> to vector<8x8xf32>
    %65 = vector.broadcast %62 : f32 to vector<8x8xf32>
    %66 = arith.mulf %65, %64 : vector<8x8xf32>
    %c1_24 = arith.constant 1 : index
    %c1_25 = arith.constant 1 : index
    %67 = memref.load %arg4[%c1_24, %c1_25] : memref<4x4xf32, #tpu.memory_space<smem>>
    %68 = vector.extract_strided_slice %7 {offsets = [1, 0, 0], sizes = [1, 8, 8], strides = [1, 1, 1]} : vector<4x8x8xf32> to vector<1x8x8xf32>
    %69 = vector.shape_cast %68 : vector<1x8x8xf32> to vector<8x8xf32>
    %70 = vector.broadcast %67 : f32 to vector<8x8xf32>
    %71 = arith.mulf %70, %69 : vector<8x8xf32>
    %72 = arith.addf %66, %71 : vector<8x8xf32>
    %c1_26 = arith.constant 1 : index
    %c2_27 = arith.constant 2 : index
    %73 = memref.load %arg4[%c1_26, %c2_27] : memref<4x4xf32, #tpu.memory_space<smem>>
    %74 = vector.extract_strided_slice %7 {offsets = [2, 0, 0], sizes = [1, 8, 8], strides = [1, 1, 1]} : vector<4x8x8xf32> to vector<1x8x8xf32>
    %75 = vector.shape_cast %74 : vector<1x8x8xf32> to vector<8x8xf32>
    %76 = vector.broadcast %73 : f32 to vector<8x8xf32>
    %77 = arith.mulf %76, %75 : vector<8x8xf32>
    %78 = arith.addf %72, %77 : vector<8x8xf32>
    %c1_28 = arith.constant 1 : index
    %c3_29 = arith.constant 3 : index
    %79 = memref.load %arg4[%c1_28, %c3_29] : memref<4x4xf32, #tpu.memory_space<smem>>
    %80 = vector.extract_strided_slice %7 {offsets = [3, 0, 0], sizes = [1, 8, 8], strides = [1, 1, 1]} : vector<4x8x8xf32> to vector<1x8x8xf32>
    %81 = vector.shape_cast %80 : vector<1x8x8xf32> to vector<8x8xf32>
    %82 = vector.broadcast %79 : f32 to vector<8x8xf32>
    %83 = arith.mulf %82, %81 : vector<8x8xf32>
    %84 = arith.addf %78, %83 : vector<8x8xf32>
    %85 = vector.extract_strided_slice %5 {offsets = [0, 1], sizes = [8, 1], strides = [1, 1]} : vector<8x8xf32> to vector<8x1xf32>
    %86 = vector.extract_strided_slice %5 {offsets = [0, 5], sizes = [8, 1], strides = [1, 1]} : vector<8x8xf32> to vector<8x1xf32>
    %87 = tpu.transpose %85, [1, 0] : vector<8x1xf32> -> vector<1x8xf32>
    %88 = vector.broadcast %86 : vector<8x1xf32> to vector<8x8xf32>
    %89 = vector.broadcast %87 : vector<1x8xf32> to vector<8x8xf32>
    %90 = arith.addf %88, %89 : vector<8x8xf32>
    %91 = arith.addf %90, %84 : vector<8x8xf32>
    %cst_30 = arith.constant 0.000000e+00 : f32
    %92 = vector.broadcast %cst_30 : f32 to vector<8x8xf32>
    %93 = arith.cmpf oge, %91, %92 : vector<8x8xf32>
    %cst_31 = arith.constant 0.00999999977 : f32
    %94 = vector.broadcast %cst_31 : f32 to vector<8x8xf32>
    %95 = arith.mulf %94, %91 : vector<8x8xf32>
    %96 = arith.select %93, %91, %95 : vector<8x8xi1>, vector<8x8xf32>
    %cst_32 = arith.constant dense<0xFF800000> : vector<8xf32>
    %97 = vector.multi_reduction <maximumf>, %96, %cst_32 [1] : vector<8x8xf32> to vector<8xf32>
    %98 = vector.shape_cast %97 : vector<8xf32> to vector<8x1xf32>
    %cst_33 = arith.constant dense<0xFF800000> : vector<1xf32>
    %99 = vector.multi_reduction <maximumf>, %98, %cst_33 [0] : vector<8x1xf32> to vector<1xf32>
    %100 = vector.shape_cast %99 : vector<1xf32> to vector<1x1xf32>
    %101 = vector.broadcast %100 : vector<1x1xf32> to vector<8x8xf32>
    %102 = arith.subf %96, %101 : vector<8x8xf32>
    %103 = math.exp %102 : vector<8x8xf32>
    %cst_34 = arith.constant dense<0.000000e+00> : vector<8xf32>
    %104 = vector.multi_reduction <add>, %103, %cst_34 [1] : vector<8x8xf32> to vector<8xf32>
    %105 = vector.shape_cast %104 : vector<8xf32> to vector<8x1xf32>
    %cst_35 = arith.constant dense<0.000000e+00> : vector<1xf32>
    %106 = vector.multi_reduction <add>, %105, %cst_35 [0] : vector<8x1xf32> to vector<1xf32>
    %107 = vector.shape_cast %106 : vector<1xf32> to vector<1x1xf32>
    %108 = tpu.reciprocal %107 {approx = true} : vector<1x1xf32> -> vector<1x1xf32>
    %109 = vector.broadcast %108 : vector<1x1xf32> to vector<8x1xf32>
    %110 = arith.mulf %105, %109 : vector<8x1xf32>
    %111 = vector.extract_strided_slice %4 {offsets = [0, 32], sizes = [8, 32], strides = [1, 1]} : vector<8x128xf32> to vector<8x32xf32>
    %112 = vector.broadcast %110 : vector<8x1xf32> to vector<8x32xf32>
    %113 = arith.mulf %111, %112 : vector<8x32xf32>
    %c2_36 = arith.constant 2 : index
    %c0_37 = arith.constant 0 : index
    %114 = memref.load %arg4[%c2_36, %c0_37] : memref<4x4xf32, #tpu.memory_space<smem>>
    %115 = vector.extract_strided_slice %7 {offsets = [0, 0, 0], sizes = [1, 8, 8], strides = [1, 1, 1]} : vector<4x8x8xf32> to vector<1x8x8xf32>
    %116 = vector.shape_cast %115 : vector<1x8x8xf32> to vector<8x8xf32>
    %117 = vector.broadcast %114 : f32 to vector<8x8xf32>
    %118 = arith.mulf %117, %116 : vector<8x8xf32>
    %c2_38 = arith.constant 2 : index
    %c1_39 = arith.constant 1 : index
    %119 = memref.load %arg4[%c2_38, %c1_39] : memref<4x4xf32, #tpu.memory_space<smem>>
    %120 = vector.extract_strided_slice %7 {offsets = [1, 0, 0], sizes = [1, 8, 8], strides = [1, 1, 1]} : vector<4x8x8xf32> to vector<1x8x8xf32>
    %121 = vector.shape_cast %120 : vector<1x8x8xf32> to vector<8x8xf32>
    %122 = vector.broadcast %119 : f32 to vector<8x8xf32>
    %123 = arith.mulf %122, %121 : vector<8x8xf32>
    %124 = arith.addf %118, %123 : vector<8x8xf32>
    %c2_40 = arith.constant 2 : index
    %c2_41 = arith.constant 2 : index
    %125 = memref.load %arg4[%c2_40, %c2_41] : memref<4x4xf32, #tpu.memory_space<smem>>
    %126 = vector.extract_strided_slice %7 {offsets = [2, 0, 0], sizes = [1, 8, 8], strides = [1, 1, 1]} : vector<4x8x8xf32> to vector<1x8x8xf32>
    %127 = vector.shape_cast %126 : vector<1x8x8xf32> to vector<8x8xf32>
    %128 = vector.broadcast %125 : f32 to vector<8x8xf32>
    %129 = arith.mulf %128, %127 : vector<8x8xf32>
    %130 = arith.addf %124, %129 : vector<8x8xf32>
    %c2_42 = arith.constant 2 : index
    %c3_43 = arith.constant 3 : index
    %131 = memref.load %arg4[%c2_42, %c3_43] : memref<4x4xf32, #tpu.memory_space<smem>>
    %132 = vector.extract_strided_slice %7 {offsets = [3, 0, 0], sizes = [1, 8, 8], strides = [1, 1, 1]} : vector<4x8x8xf32> to vector<1x8x8xf32>
    %133 = vector.shape_cast %132 : vector<1x8x8xf32> to vector<8x8xf32>
    %134 = vector.broadcast %131 : f32 to vector<8x8xf32>
    %135 = arith.mulf %134, %133 : vector<8x8xf32>
    %136 = arith.addf %130, %135 : vector<8x8xf32>
    %137 = vector.extract_strided_slice %5 {offsets = [0, 2], sizes = [8, 1], strides = [1, 1]} : vector<8x8xf32> to vector<8x1xf32>
    %138 = vector.extract_strided_slice %5 {offsets = [0, 6], sizes = [8, 1], strides = [1, 1]} : vector<8x8xf32> to vector<8x1xf32>
    %139 = tpu.transpose %137, [1, 0] : vector<8x1xf32> -> vector<1x8xf32>
    %140 = vector.broadcast %138 : vector<8x1xf32> to vector<8x8xf32>
    %141 = vector.broadcast %139 : vector<1x8xf32> to vector<8x8xf32>
    %142 = arith.addf %140, %141 : vector<8x8xf32>
    %143 = arith.addf %142, %136 : vector<8x8xf32>
    %cst_44 = arith.constant 0.000000e+00 : f32
    %144 = vector.broadcast %cst_44 : f32 to vector<8x8xf32>
    %145 = arith.cmpf oge, %143, %144 : vector<8x8xf32>
    %cst_45 = arith.constant 0.00999999977 : f32
    %146 = vector.broadcast %cst_45 : f32 to vector<8x8xf32>
    %147 = arith.mulf %146, %143 : vector<8x8xf32>
    %148 = arith.select %145, %143, %147 : vector<8x8xi1>, vector<8x8xf32>
    %cst_46 = arith.constant dense<0xFF800000> : vector<8xf32>
    %149 = vector.multi_reduction <maximumf>, %148, %cst_46 [1] : vector<8x8xf32> to vector<8xf32>
    %150 = vector.shape_cast %149 : vector<8xf32> to vector<8x1xf32>
    %cst_47 = arith.constant dense<0xFF800000> : vector<1xf32>
    %151 = vector.multi_reduction <maximumf>, %150, %cst_47 [0] : vector<8x1xf32> to vector<1xf32>
    %152 = vector.shape_cast %151 : vector<1xf32> to vector<1x1xf32>
    %153 = vector.broadcast %152 : vector<1x1xf32> to vector<8x8xf32>
    %154 = arith.subf %148, %153 : vector<8x8xf32>
    %155 = math.exp %154 : vector<8x8xf32>
    %cst_48 = arith.constant dense<0.000000e+00> : vector<8xf32>
    %156 = vector.multi_reduction <add>, %155, %cst_48 [1] : vector<8x8xf32> to vector<8xf32>
    %157 = vector.shape_cast %156 : vector<8xf32> to vector<8x1xf32>
    %cst_49 = arith.constant dense<0.000000e+00> : vector<1xf32>
    %158 = vector.multi_reduction <add>, %157, %cst_49 [0] : vector<8x1xf32> to vector<1xf32>
    %159 = vector.shape_cast %158 : vector<1xf32> to vector<1x1xf32>
    %160 = tpu.reciprocal %159 {approx = true} : vector<1x1xf32> -> vector<1x1xf32>
    %161 = vector.broadcast %160 : vector<1x1xf32> to vector<8x1xf32>
    %162 = arith.mulf %157, %161 : vector<8x1xf32>
    %163 = vector.extract_strided_slice %4 {offsets = [0, 64], sizes = [8, 32], strides = [1, 1]} : vector<8x128xf32> to vector<8x32xf32>
    %164 = vector.broadcast %162 : vector<8x1xf32> to vector<8x32xf32>
    %165 = arith.mulf %163, %164 : vector<8x32xf32>
    %c3_50 = arith.constant 3 : index
    %c0_51 = arith.constant 0 : index
    %166 = memref.load %arg4[%c3_50, %c0_51] : memref<4x4xf32, #tpu.memory_space<smem>>
    %167 = vector.extract_strided_slice %7 {offsets = [0, 0, 0], sizes = [1, 8, 8], strides = [1, 1, 1]} : vector<4x8x8xf32> to vector<1x8x8xf32>
    %168 = vector.shape_cast %167 : vector<1x8x8xf32> to vector<8x8xf32>
    %169 = vector.broadcast %166 : f32 to vector<8x8xf32>
    %170 = arith.mulf %169, %168 : vector<8x8xf32>
    %c3_52 = arith.constant 3 : index
    %c1_53 = arith.constant 1 : index
    %171 = memref.load %arg4[%c3_52, %c1_53] : memref<4x4xf32, #tpu.memory_space<smem>>
    %172 = vector.extract_strided_slice %7 {offsets = [1, 0, 0], sizes = [1, 8, 8], strides = [1, 1, 1]} : vector<4x8x8xf32> to vector<1x8x8xf32>
    %173 = vector.shape_cast %172 : vector<1x8x8xf32> to vector<8x8xf32>
    %174 = vector.broadcast %171 : f32 to vector<8x8xf32>
    %175 = arith.mulf %174, %173 : vector<8x8xf32>
    %176 = arith.addf %170, %175 : vector<8x8xf32>
    %c3_54 = arith.constant 3 : index
    %c2_55 = arith.constant 2 : index
    %177 = memref.load %arg4[%c3_54, %c2_55] : memref<4x4xf32, #tpu.memory_space<smem>>
    %178 = vector.extract_strided_slice %7 {offsets = [2, 0, 0], sizes = [1, 8, 8], strides = [1, 1, 1]} : vector<4x8x8xf32> to vector<1x8x8xf32>
    %179 = vector.shape_cast %178 : vector<1x8x8xf32> to vector<8x8xf32>
    %180 = vector.broadcast %177 : f32 to vector<8x8xf32>
    %181 = arith.mulf %180, %179 : vector<8x8xf32>
    %182 = arith.addf %176, %181 : vector<8x8xf32>
    %c3_56 = arith.constant 3 : index
    %c3_57 = arith.constant 3 : index
    %183 = memref.load %arg4[%c3_56, %c3_57] : memref<4x4xf32, #tpu.memory_space<smem>>
    %184 = vector.extract_strided_slice %7 {offsets = [3, 0, 0], sizes = [1, 8, 8], strides = [1, 1, 1]} : vector<4x8x8xf32> to vector<1x8x8xf32>
    %185 = vector.shape_cast %184 : vector<1x8x8xf32> to vector<8x8xf32>
    %186 = vector.broadcast %183 : f32 to vector<8x8xf32>
    %187 = arith.mulf %186, %185 : vector<8x8xf32>
    %188 = arith.addf %182, %187 : vector<8x8xf32>
    %189 = vector.extract_strided_slice %5 {offsets = [0, 3], sizes = [8, 1], strides = [1, 1]} : vector<8x8xf32> to vector<8x1xf32>
    %190 = vector.extract_strided_slice %5 {offsets = [0, 7], sizes = [8, 1], strides = [1, 1]} : vector<8x8xf32> to vector<8x1xf32>
    %191 = tpu.transpose %189, [1, 0] : vector<8x1xf32> -> vector<1x8xf32>
    %192 = vector.broadcast %190 : vector<8x1xf32> to vector<8x8xf32>
    %193 = vector.broadcast %191 : vector<1x8xf32> to vector<8x8xf32>
    %194 = arith.addf %192, %193 : vector<8x8xf32>
    %195 = arith.addf %194, %188 : vector<8x8xf32>
    %cst_58 = arith.constant 0.000000e+00 : f32
    %196 = vector.broadcast %cst_58 : f32 to vector<8x8xf32>
    %197 = arith.cmpf oge, %195, %196 : vector<8x8xf32>
    %cst_59 = arith.constant 0.00999999977 : f32
    %198 = vector.broadcast %cst_59 : f32 to vector<8x8xf32>
    %199 = arith.mulf %198, %195 : vector<8x8xf32>
    %200 = arith.select %197, %195, %199 : vector<8x8xi1>, vector<8x8xf32>
    %cst_60 = arith.constant dense<0xFF800000> : vector<8xf32>
    %201 = vector.multi_reduction <maximumf>, %200, %cst_60 [1] : vector<8x8xf32> to vector<8xf32>
    %202 = vector.shape_cast %201 : vector<8xf32> to vector<8x1xf32>
    %cst_61 = arith.constant dense<0xFF800000> : vector<1xf32>
    %203 = vector.multi_reduction <maximumf>, %202, %cst_61 [0] : vector<8x1xf32> to vector<1xf32>
    %204 = vector.shape_cast %203 : vector<1xf32> to vector<1x1xf32>
    %205 = vector.broadcast %204 : vector<1x1xf32> to vector<8x8xf32>
    %206 = arith.subf %200, %205 : vector<8x8xf32>
    %207 = math.exp %206 : vector<8x8xf32>
    %cst_62 = arith.constant dense<0.000000e+00> : vector<8xf32>
    %208 = vector.multi_reduction <add>, %207, %cst_62 [1] : vector<8x8xf32> to vector<8xf32>
    %209 = vector.shape_cast %208 : vector<8xf32> to vector<8x1xf32>
    %cst_63 = arith.constant dense<0.000000e+00> : vector<1xf32>
    %210 = vector.multi_reduction <add>, %209, %cst_63 [0] : vector<8x1xf32> to vector<1xf32>
    %211 = vector.shape_cast %210 : vector<1xf32> to vector<1x1xf32>
    %212 = tpu.reciprocal %211 {approx = true} : vector<1x1xf32> -> vector<1x1xf32>
    %213 = vector.broadcast %212 : vector<1x1xf32> to vector<8x1xf32>
    %214 = arith.mulf %209, %213 : vector<8x1xf32>
    %215 = vector.extract_strided_slice %4 {offsets = [0, 96], sizes = [8, 32], strides = [1, 1]} : vector<8x128xf32> to vector<8x32xf32>
    %216 = vector.broadcast %214 : vector<8x1xf32> to vector<8x32xf32>
    %217 = arith.mulf %215, %216 : vector<8x32xf32>
    %218 = tpu.concatenate %61, %113, %165, %217 in 1 : vector<8x32xf32>, vector<8x32xf32>, vector<8x32xf32>, vector<8x32xf32> -> vector<8x128xf32>
    %219 = arith.negf %218 : vector<8x128xf32>
    %220 = math.exp %219 : vector<8x128xf32>
    %cst_64 = arith.constant 1.000000e+00 : f32
    %221 = vector.broadcast %cst_64 : f32 to vector<8x128xf32>
    %222 = arith.addf %221, %220 : vector<8x128xf32>
    %223 = arith.divf %221, %222 : vector<8x128xf32>
    %224 = vector.broadcast %9 : vector<8x1xf32> to vector<8x128xf32>
    %225 = arith.mulf %223, %224 : vector<8x128xf32>
    %c0_65 = arith.constant 0 : index
    %c0_66 = arith.constant 0 : index
    %c0_67 = arith.constant 0 : index
    %226 = vector.load %arg6[%c0_65, %c0_66, %c0_67] : memref<1x8x128xf32, #tpu.memory_space<vmem>>, vector<1x8x128xf32>
    %227 = vector.shape_cast %226 : vector<1x8x128xf32> to vector<8x128xf32>
    %228 = vector.shape_cast %225 : vector<8x128xf32> to vector<1x8x128xf32>
    tpu.vector_store %arg6[%c0_65, %c0_66, %c0_67], %228 {strides = array<i32>} : memref<1x8x128xf32, #tpu.memory_space<vmem>>, vector<1x8x128xf32>,
    return
  }
  func.func @transform_0(%arg0: i32) -> (i32, i32, i32) {
    %c0_i32 = arith.constant 0 : i32
    %c0_i32_0 = arith.constant 0 : i32
    %c0_i32_1 = arith.constant 0 : i32
    return %arg0, %c0_i32, %c0_i32_0 : i32, i32, i32
  }
  func.func @transform_1(%arg0: i32) -> (i32, i32, i32, i32) {
    %c0_i32 = arith.constant 0 : i32
    %c0_i32_0 = arith.constant 0 : i32
    %c0_i32_1 = arith.constant 0 : i32
    %c0_i32_2 = arith.constant 0 : i32
    return %arg0, %c0_i32, %c0_i32_0, %c0_i32_1 : i32, i32, i32, i32
  }
  func.func @transform_2(%arg0: i32) -> (i32, i32) {
    %c0_i32 = arith.constant 0 : i32
    %c0_i32_0 = arith.constant 0 : i32
    %c0_i32_1 = arith.constant 0 : i32
    return %c0_i32, %c0_i32_0 : i32, i32
  }
  func.func @transform_3(%arg0: i32) -> (i32, i32) {
    %c0_i32 = arith.constant 0 : i32
    %c0_i32_0 = arith.constant 0 : i32
    %c0_i32_1 = arith.constant 0 : i32
    return %c0_i32, %c0_i32_0 : i32, i32
  }
  func.func @transform_4(%arg0: i32) -> (i32, i32, i32) {
    %c0_i32 = arith.constant 0 : i32
    %c0_i32_0 = arith.constant 0 : i32
    %c0_i32_1 = arith.constant 0 : i32
    return %arg0, %c0_i32, %c0_i32_0 : i32, i32, i32
  }
  func.func @transform_5(%arg0: i32) -> (i32, i32, i32) {
    %c0_i32 = arith.constant 0 : i32
    %c0_i32_0 = arith.constant 0 : i32
    %c0_i32_1 = arith.constant 0 : i32
    return %arg0, %c0_i32, %c0_i32_0 : i32, i32, i32
  }
}

module attributes {stable_mosaic.version = 11 : i64} {
  func.func @_attn_layer_kernel(%arg0: i32, %arg1: memref<1x8x128xf32, #tpu.memory_space<vmem>>, %arg2: memref<1x4x8x8xf32, #tpu.memory_space<vmem>>, %arg3: memref<128x136xf32, #tpu.memory_space<vmem>>, %arg4: memref<4x4xf32, #tpu.memory_space<smem>>, %arg5: memref<1x8x1xf32, #tpu.memory_space<vmem>>, %arg6: memref<1x8x32xf32, #tpu.memory_space<vmem>>) attributes {dimension_semantics = [#tpu.dimension_semantics<parallel>], iteration_bounds = array<i64: 2>, scalar_prefetch = 0 : i64, scratch_operands = 0 : i64, tpu.core_type = #tpu.core_type<tc>, window_params = [{transform_indices = @transform_0, window_bounds = array<i64: 1, 8, 128>}, {transform_indices = @transform_1, window_bounds = array<i64: 1, 4, 8, 8>}, {pipeline_mode = #tpu.pipeline_mode<synchronous>, transform_indices = @transform_2, window_bounds = array<i64: 128, 136>}, {transform_indices = @transform_3, window_bounds = array<i64: 4, 4>}, {transform_indices = @transform_4, window_bounds = array<i64: 1, 8, 1>}, {transform_indices = @transform_5, window_bounds = array<i64: 1, 8, 32>}]} {
    %c0 = arith.constant 0 : index
    %c0_0 = arith.constant 0 : index
    %c0_1 = arith.constant 0 : index
    %0 = vector.load %arg1[%c0, %c0_0, %c0_1] : memref<1x8x128xf32, #tpu.memory_space<vmem>>, vector<1x8x128xf32>
    %1 = vector.shape_cast %0 : vector<1x8x128xf32> to vector<8x128xf32>
    %c0_2 = arith.constant 0 : index
    %c0_3 = arith.constant 0 : index
    %2 = vector.load %arg3[%c0_2, %c0_3] : memref<128x136xf32, #tpu.memory_space<vmem>>, vector<128x136xf32>
    %cst = arith.constant dense<0.000000e+00> : vector<8x136xf32>
    %3 = tpu.matmul %1, %2, %cst {dimension_numbers = #tpu.dot_dimension_numbers<[1], [0], [0], [1], [0, 0, 1, 1], [], []>} : vector<8x128xf32>, vector<128x136xf32>, vector<8x136xf32> -> vector<8x136xf32>
    %4 = vector.extract_strided_slice %3 {offsets = [0, 0], sizes = [8, 128], strides = [1, 1]} : vector<8x136xf32> to vector<8x128xf32>
    %5 = vector.extract_strided_slice %3 {offsets = [0, 128], sizes = [8, 8], strides = [1, 1]} : vector<8x136xf32> to vector<8x8xf32>
    %c0_4 = arith.constant 0 : index
    %c0_5 = arith.constant 0 : index
    %c0_6 = arith.constant 0 : index
    %c0_7 = arith.constant 0 : index
    %6 = vector.load %arg2[%c0_4, %c0_5, %c0_6, %c0_7] : memref<1x4x8x8xf32, #tpu.memory_space<vmem>>, vector<1x4x8x8xf32>
    %7 = vector.shape_cast %6 : vector<1x4x8x8xf32> to vector<4x8x8xf32>
    %c0_8 = arith.constant 0 : index
    %c0_9 = arith.constant 0 : index
    %c0_10 = arith.constant 0 : index
    %8 = vector.load %arg5[%c0_8, %c0_9, %c0_10] : memref<1x8x1xf32, #tpu.memory_space<vmem>>, vector<1x8x1xf32>
    %9 = vector.shape_cast %8 : vector<1x8x1xf32> to vector<8x1xf32>
    %c0_11 = arith.constant 0 : index
    %c0_12 = arith.constant 0 : index
    %10 = memref.load %arg4[%c0_11, %c0_12] : memref<4x4xf32, #tpu.memory_space<smem>>
    %11 = vector.extract_strided_slice %7 {offsets = [0, 0, 0], sizes = [1, 8, 8], strides = [1, 1, 1]} : vector<4x8x8xf32> to vector<1x8x8xf32>
    %12 = vector.shape_cast %11 : vector<1x8x8xf32> to vector<8x8xf32>
    %13 = vector.broadcast %10 : f32 to vector<8x8xf32>
    %14 = arith.mulf %13, %12 : vector<8x8xf32>
    %c0_13 = arith.constant 0 : index
    %c1 = arith.constant 1 : index
    %15 = memref.load %arg4[%c0_13, %c1] : memref<4x4xf32, #tpu.memory_space<smem>>
    %16 = vector.extract_strided_slice %7 {offsets = [1, 0, 0], sizes = [1, 8, 8], strides = [1, 1, 1]} : vector<4x8x8xf32> to vector<1x8x8xf32>
    %17 = vector.shape_cast %16 : vector<1x8x8xf32> to vector<8x8xf32>
    %18 = vector.broadcast %15 : f32 to vector<8x8xf32>
    %19 = arith.mulf %18, %17 : vector<8x8xf32>
    %20 = arith.addf %14, %19 : vector<8x8xf32>
    %c0_14 = arith.constant 0 : index
    %c2 = arith.constant 2 : index
    %21 = memref.load %arg4[%c0_14, %c2] : memref<4x4xf32, #tpu.memory_space<smem>>
    %22 = vector.extract_strided_slice %7 {offsets = [2, 0, 0], sizes = [1, 8, 8], strides = [1, 1, 1]} : vector<4x8x8xf32> to vector<1x8x8xf32>
    %23 = vector.shape_cast %22 : vector<1x8x8xf32> to vector<8x8xf32>
    %24 = vector.broadcast %21 : f32 to vector<8x8xf32>
    %25 = arith.mulf %24, %23 : vector<8x8xf32>
    %26 = arith.addf %20, %25 : vector<8x8xf32>
    %c0_15 = arith.constant 0 : index
    %c3 = arith.constant 3 : index
    %27 = memref.load %arg4[%c0_15, %c3] : memref<4x4xf32, #tpu.memory_space<smem>>
    %28 = vector.extract_strided_slice %7 {offsets = [3, 0, 0], sizes = [1, 8, 8], strides = [1, 1, 1]} : vector<4x8x8xf32> to vector<1x8x8xf32>
    %29 = vector.shape_cast %28 : vector<1x8x8xf32> to vector<8x8xf32>
    %30 = vector.broadcast %27 : f32 to vector<8x8xf32>
    %31 = arith.mulf %30, %29 : vector<8x8xf32>
    %32 = arith.addf %26, %31 : vector<8x8xf32>
    %33 = vector.extract_strided_slice %5 {offsets = [0, 0], sizes = [8, 1], strides = [1, 1]} : vector<8x8xf32> to vector<8x1xf32>
    %34 = vector.extract_strided_slice %5 {offsets = [0, 4], sizes = [8, 1], strides = [1, 1]} : vector<8x8xf32> to vector<8x1xf32>
    %35 = tpu.transpose %33, [1, 0] : vector<8x1xf32> -> vector<1x8xf32>
    %36 = vector.broadcast %34 : vector<8x1xf32> to vector<8x8xf32>
    %37 = vector.broadcast %35 : vector<1x8xf32> to vector<8x8xf32>
    %38 = arith.addf %36, %37 : vector<8x8xf32>
    %39 = arith.addf %38, %32 : vector<8x8xf32>
    %cst_16 = arith.constant 0.000000e+00 : f32
    %40 = vector.broadcast %cst_16 : f32 to vector<8x8xf32>
    %41 = arith.cmpf oge, %39, %40 : vector<8x8xf32>
    %cst_17 = arith.constant 0.00999999977 : f32
    %42 = vector.broadcast %cst_17 : f32 to vector<8x8xf32>
    %43 = arith.mulf %42, %39 : vector<8x8xf32>
    %44 = arith.select %41, %39, %43 : vector<8x8xi1>, vector<8x8xf32>
    %cst_18 = arith.constant dense<0xFF800000> : vector<8xf32>
    %45 = vector.multi_reduction <maximumf>, %44, %cst_18 [1] : vector<8x8xf32> to vector<8xf32>
    %46 = vector.shape_cast %45 : vector<8xf32> to vector<8x1xf32>
    %cst_19 = arith.constant dense<0xFF800000> : vector<1xf32>
    %47 = vector.multi_reduction <maximumf>, %46, %cst_19 [0] : vector<8x1xf32> to vector<1xf32>
    %48 = vector.shape_cast %47 : vector<1xf32> to vector<1x1xf32>
    %49 = vector.broadcast %48 : vector<1x1xf32> to vector<8x8xf32>
    %50 = arith.subf %44, %49 : vector<8x8xf32>
    %51 = math.exp %50 : vector<8x8xf32>
    %cst_20 = arith.constant dense<0.000000e+00> : vector<8xf32>
    %52 = vector.multi_reduction <add>, %51, %cst_20 [1] : vector<8x8xf32> to vector<8xf32>
    %53 = vector.shape_cast %52 : vector<8xf32> to vector<8x1xf32>
    %cst_21 = arith.constant dense<0.000000e+00> : vector<1xf32>
    %54 = vector.multi_reduction <add>, %53, %cst_21 [0] : vector<8x1xf32> to vector<1xf32>
    %55 = vector.shape_cast %54 : vector<1xf32> to vector<1x1xf32>
    %56 = tpu.reciprocal %55 {approx = true} : vector<1x1xf32> -> vector<1x1xf32>
    %57 = vector.broadcast %56 : vector<1x1xf32> to vector<8x1xf32>
    %58 = arith.mulf %53, %57 : vector<8x1xf32>
    %59 = vector.extract_strided_slice %4 {offsets = [0, 0], sizes = [8, 32], strides = [1, 1]} : vector<8x128xf32> to vector<8x32xf32>
    %60 = vector.broadcast %58 : vector<8x1xf32> to vector<8x32xf32>
    %61 = arith.mulf %59, %60 : vector<8x32xf32>
    %c1_22 = arith.constant 1 : index
    %c0_23 = arith.constant 0 : index
    %62 = memref.load %arg4[%c1_22, %c0_23] : memref<4x4xf32, #tpu.memory_space<smem>>
    %63 = vector.extract_strided_slice %7 {offsets = [0, 0, 0], sizes = [1, 8, 8], strides = [1, 1, 1]} : vector<4x8x8xf32> to vector<1x8x8xf32>
    %64 = vector.shape_cast %63 : vector<1x8x8xf32> to vector<8x8xf32>
    %65 = vector.broadcast %62 : f32 to vector<8x8xf32>
    %66 = arith.mulf %65, %64 : vector<8x8xf32>
    %c1_24 = arith.constant 1 : index
    %c1_25 = arith.constant 1 : index
    %67 = memref.load %arg4[%c1_24, %c1_25] : memref<4x4xf32, #tpu.memory_space<smem>>
    %68 = vector.extract_strided_slice %7 {offsets = [1, 0, 0], sizes = [1, 8, 8], strides = [1, 1, 1]} : vector<4x8x8xf32> to vector<1x8x8xf32>
    %69 = vector.shape_cast %68 : vector<1x8x8xf32> to vector<8x8xf32>
    %70 = vector.broadcast %67 : f32 to vector<8x8xf32>
    %71 = arith.mulf %70, %69 : vector<8x8xf32>
    %72 = arith.addf %66, %71 : vector<8x8xf32>
    %c1_26 = arith.constant 1 : index
    %c2_27 = arith.constant 2 : index
    %73 = memref.load %arg4[%c1_26, %c2_27] : memref<4x4xf32, #tpu.memory_space<smem>>
    %74 = vector.extract_strided_slice %7 {offsets = [2, 0, 0], sizes = [1, 8, 8], strides = [1, 1, 1]} : vector<4x8x8xf32> to vector<1x8x8xf32>
    %75 = vector.shape_cast %74 : vector<1x8x8xf32> to vector<8x8xf32>
    %76 = vector.broadcast %73 : f32 to vector<8x8xf32>
    %77 = arith.mulf %76, %75 : vector<8x8xf32>
    %78 = arith.addf %72, %77 : vector<8x8xf32>
    %c1_28 = arith.constant 1 : index
    %c3_29 = arith.constant 3 : index
    %79 = memref.load %arg4[%c1_28, %c3_29] : memref<4x4xf32, #tpu.memory_space<smem>>
    %80 = vector.extract_strided_slice %7 {offsets = [3, 0, 0], sizes = [1, 8, 8], strides = [1, 1, 1]} : vector<4x8x8xf32> to vector<1x8x8xf32>
    %81 = vector.shape_cast %80 : vector<1x8x8xf32> to vector<8x8xf32>
    %82 = vector.broadcast %79 : f32 to vector<8x8xf32>
    %83 = arith.mulf %82, %81 : vector<8x8xf32>
    %84 = arith.addf %78, %83 : vector<8x8xf32>
    %85 = vector.extract_strided_slice %5 {offsets = [0, 1], sizes = [8, 1], strides = [1, 1]} : vector<8x8xf32> to vector<8x1xf32>
    %86 = vector.extract_strided_slice %5 {offsets = [0, 5], sizes = [8, 1], strides = [1, 1]} : vector<8x8xf32> to vector<8x1xf32>
    %87 = tpu.transpose %85, [1, 0] : vector<8x1xf32> -> vector<1x8xf32>
    %88 = vector.broadcast %86 : vector<8x1xf32> to vector<8x8xf32>
    %89 = vector.broadcast %87 : vector<1x8xf32> to vector<8x8xf32>
    %90 = arith.addf %88, %89 : vector<8x8xf32>
    %91 = arith.addf %90, %84 : vector<8x8xf32>
    %cst_30 = arith.constant 0.000000e+00 : f32
    %92 = vector.broadcast %cst_30 : f32 to vector<8x8xf32>
    %93 = arith.cmpf oge, %91, %92 : vector<8x8xf32>
    %cst_31 = arith.constant 0.00999999977 : f32
    %94 = vector.broadcast %cst_31 : f32 to vector<8x8xf32>
    %95 = arith.mulf %94, %91 : vector<8x8xf32>
    %96 = arith.select %93, %91, %95 : vector<8x8xi1>, vector<8x8xf32>
    %cst_32 = arith.constant dense<0xFF800000> : vector<8xf32>
    %97 = vector.multi_reduction <maximumf>, %96, %cst_32 [1] : vector<8x8xf32> to vector<8xf32>
    %98 = vector.shape_cast %97 : vector<8xf32> to vector<8x1xf32>
    %cst_33 = arith.constant dense<0xFF800000> : vector<1xf32>
    %99 = vector.multi_reduction <maximumf>, %98, %cst_33 [0] : vector<8x1xf32> to vector<1xf32>
    %100 = vector.shape_cast %99 : vector<1xf32> to vector<1x1xf32>
    %101 = vector.broadcast %100 : vector<1x1xf32> to vector<8x8xf32>
    %102 = arith.subf %96, %101 : vector<8x8xf32>
    %103 = math.exp %102 : vector<8x8xf32>
    %cst_34 = arith.constant dense<0.000000e+00> : vector<8xf32>
    %104 = vector.multi_reduction <add>, %103, %cst_34 [1] : vector<8x8xf32> to vector<8xf32>
    %105 = vector.shape_cast %104 : vector<8xf32> to vector<8x1xf32>
    %cst_35 = arith.constant dense<0.000000e+00> : vector<1xf32>
    %106 = vector.multi_reduction <add>, %105, %cst_35 [0] : vector<8x1xf32> to vector<1xf32>
    %107 = vector.shape_cast %106 : vector<1xf32> to vector<1x1xf32>
    %108 = tpu.reciprocal %107 {approx = true} : vector<1x1xf32> -> vector<1x1xf32>
    %109 = vector.broadcast %108 : vector<1x1xf32> to vector<8x1xf32>
    %110 = arith.mulf %105, %109 : vector<8x1xf32>
    %111 = vector.extract_strided_slice %4 {offsets = [0, 32], sizes = [8, 32], strides = [1, 1]} : vector<8x128xf32> to vector<8x32xf32>
    %112 = vector.broadcast %110 : vector<8x1xf32> to vector<8x32xf32>
    %113 = arith.mulf %111, %112 : vector<8x32xf32>
    %c2_36 = arith.constant 2 : index
    %c0_37 = arith.constant 0 : index
    %114 = memref.load %arg4[%c2_36, %c0_37] : memref<4x4xf32, #tpu.memory_space<smem>>
    %115 = vector.extract_strided_slice %7 {offsets = [0, 0, 0], sizes = [1, 8, 8], strides = [1, 1, 1]} : vector<4x8x8xf32> to vector<1x8x8xf32>
    %116 = vector.shape_cast %115 : vector<1x8x8xf32> to vector<8x8xf32>
    %117 = vector.broadcast %114 : f32 to vector<8x8xf32>
    %118 = arith.mulf %117, %116 : vector<8x8xf32>
    %c2_38 = arith.constant 2 : index
    %c1_39 = arith.constant 1 : index
    %119 = memref.load %arg4[%c2_38, %c1_39] : memref<4x4xf32, #tpu.memory_space<smem>>
    %120 = vector.extract_strided_slice %7 {offsets = [1, 0, 0], sizes = [1, 8, 8], strides = [1, 1, 1]} : vector<4x8x8xf32> to vector<1x8x8xf32>
    %121 = vector.shape_cast %120 : vector<1x8x8xf32> to vector<8x8xf32>
    %122 = vector.broadcast %119 : f32 to vector<8x8xf32>
    %123 = arith.mulf %122, %121 : vector<8x8xf32>
    %124 = arith.addf %118, %123 : vector<8x8xf32>
    %c2_40 = arith.constant 2 : index
    %c2_41 = arith.constant 2 : index
    %125 = memref.load %arg4[%c2_40, %c2_41] : memref<4x4xf32, #tpu.memory_space<smem>>
    %126 = vector.extract_strided_slice %7 {offsets = [2, 0, 0], sizes = [1, 8, 8], strides = [1, 1, 1]} : vector<4x8x8xf32> to vector<1x8x8xf32>
    %127 = vector.shape_cast %126 : vector<1x8x8xf32> to vector<8x8xf32>
    %128 = vector.broadcast %125 : f32 to vector<8x8xf32>
    %129 = arith.mulf %128, %127 : vector<8x8xf32>
    %130 = arith.addf %124, %129 : vector<8x8xf32>
    %c2_42 = arith.constant 2 : index
    %c3_43 = arith.constant 3 : index
    %131 = memref.load %arg4[%c2_42, %c3_43] : memref<4x4xf32, #tpu.memory_space<smem>>
    %132 = vector.extract_strided_slice %7 {offsets = [3, 0, 0], sizes = [1, 8, 8], strides = [1, 1, 1]} : vector<4x8x8xf32> to vector<1x8x8xf32>
    %133 = vector.shape_cast %132 : vector<1x8x8xf32> to vector<8x8xf32>
    %134 = vector.broadcast %131 : f32 to vector<8x8xf32>
    %135 = arith.mulf %134, %133 : vector<8x8xf32>
    %136 = arith.addf %130, %135 : vector<8x8xf32>
    %137 = vector.extract_strided_slice %5 {offsets = [0, 2], sizes = [8, 1], strides = [1, 1]} : vector<8x8xf32> to vector<8x1xf32>
    %138 = vector.extract_strided_slice %5 {offsets = [0, 6], sizes = [8, 1], strides = [1, 1]} : vector<8x8xf32> to vector<8x1xf32>
    %139 = tpu.transpose %137, [1, 0] : vector<8x1xf32> -> vector<1x8xf32>
    %140 = vector.broadcast %138 : vector<8x1xf32> to vector<8x8xf32>
    %141 = vector.broadcast %139 : vector<1x8xf32> to vector<8x8xf32>
    %142 = arith.addf %140, %141 : vector<8x8xf32>
    %143 = arith.addf %142, %136 : vector<8x8xf32>
    %cst_44 = arith.constant 0.000000e+00 : f32
    %144 = vector.broadcast %cst_44 : f32 to vector<8x8xf32>
    %145 = arith.cmpf oge, %143, %144 : vector<8x8xf32>
    %cst_45 = arith.constant 0.00999999977 : f32
    %146 = vector.broadcast %cst_45 : f32 to vector<8x8xf32>
    %147 = arith.mulf %146, %143 : vector<8x8xf32>
    %148 = arith.select %145, %143, %147 : vector<8x8xi1>, vector<8x8xf32>
    %cst_46 = arith.constant dense<0xFF800000> : vector<8xf32>
    %149 = vector.multi_reduction <maximumf>, %148, %cst_46 [1] : vector<8x8xf32> to vector<8xf32>
    %150 = vector.shape_cast %149 : vector<8xf32> to vector<8x1xf32>
    %cst_47 = arith.constant dense<0xFF800000> : vector<1xf32>
    %151 = vector.multi_reduction <maximumf>, %150, %cst_47 [0] : vector<8x1xf32> to vector<1xf32>
    %152 = vector.shape_cast %151 : vector<1xf32> to vector<1x1xf32>
    %153 = vector.broadcast %152 : vector<1x1xf32> to vector<8x8xf32>
    %154 = arith.subf %148, %153 : vector<8x8xf32>
    %155 = math.exp %154 : vector<8x8xf32>
    %cst_48 = arith.constant dense<0.000000e+00> : vector<8xf32>
    %156 = vector.multi_reduction <add>, %155, %cst_48 [1] : vector<8x8xf32> to vector<8xf32>
    %157 = vector.shape_cast %156 : vector<8xf32> to vector<8x1xf32>
    %cst_49 = arith.constant dense<0.000000e+00> : vector<1xf32>
    %158 = vector.multi_reduction <add>, %157, %cst_49 [0] : vector<8x1xf32> to vector<1xf32>
    %159 = vector.shape_cast %158 : vector<1xf32> to vector<1x1xf32>
    %160 = tpu.reciprocal %159 {approx = true} : vector<1x1xf32> -> vector<1x1xf32>
    %161 = vector.broadcast %160 : vector<1x1xf32> to vector<8x1xf32>
    %162 = arith.mulf %157, %161 : vector<8x1xf32>
    %163 = vector.extract_strided_slice %4 {offsets = [0, 64], sizes = [8, 32], strides = [1, 1]} : vector<8x128xf32> to vector<8x32xf32>
    %164 = vector.broadcast %162 : vector<8x1xf32> to vector<8x32xf32>
    %165 = arith.mulf %163, %164 : vector<8x32xf32>
    %c3_50 = arith.constant 3 : index
    %c0_51 = arith.constant 0 : index
    %166 = memref.load %arg4[%c3_50, %c0_51] : memref<4x4xf32, #tpu.memory_space<smem>>
    %167 = vector.extract_strided_slice %7 {offsets = [0, 0, 0], sizes = [1, 8, 8], strides = [1, 1, 1]} : vector<4x8x8xf32> to vector<1x8x8xf32>
    %168 = vector.shape_cast %167 : vector<1x8x8xf32> to vector<8x8xf32>
    %169 = vector.broadcast %166 : f32 to vector<8x8xf32>
    %170 = arith.mulf %169, %168 : vector<8x8xf32>
    %c3_52 = arith.constant 3 : index
    %c1_53 = arith.constant 1 : index
    %171 = memref.load %arg4[%c3_52, %c1_53] : memref<4x4xf32, #tpu.memory_space<smem>>
    %172 = vector.extract_strided_slice %7 {offsets = [1, 0, 0], sizes = [1, 8, 8], strides = [1, 1, 1]} : vector<4x8x8xf32> to vector<1x8x8xf32>
    %173 = vector.shape_cast %172 : vector<1x8x8xf32> to vector<8x8xf32>
    %174 = vector.broadcast %171 : f32 to vector<8x8xf32>
    %175 = arith.mulf %174, %173 : vector<8x8xf32>
    %176 = arith.addf %170, %175 : vector<8x8xf32>
    %c3_54 = arith.constant 3 : index
    %c2_55 = arith.constant 2 : index
    %177 = memref.load %arg4[%c3_54, %c2_55] : memref<4x4xf32, #tpu.memory_space<smem>>
    %178 = vector.extract_strided_slice %7 {offsets = [2, 0, 0], sizes = [1, 8, 8], strides = [1, 1, 1]} : vector<4x8x8xf32> to vector<1x8x8xf32>
    %179 = vector.shape_cast %178 : vector<1x8x8xf32> to vector<8x8xf32>
    %180 = vector.broadcast %177 : f32 to vector<8x8xf32>
    %181 = arith.mulf %180, %179 : vector<8x8xf32>
    %182 = arith.addf %176, %181 : vector<8x8xf32>
    %c3_56 = arith.constant 3 : index
    %c3_57 = arith.constant 3 : index
    %183 = memref.load %arg4[%c3_56, %c3_57] : memref<4x4xf32, #tpu.memory_space<smem>>
    %184 = vector.extract_strided_slice %7 {offsets = [3, 0, 0], sizes = [1, 8, 8], strides = [1, 1, 1]} : vector<4x8x8xf32> to vector<1x8x8xf32>
    %185 = vector.shape_cast %184 : vector<1x8x8xf32> to vector<8x8xf32>
    %186 = vector.broadcast %183 : f32 to vector<8x8xf32>
    %187 = arith.mulf %186, %185 : vector<8x8xf32>
    %188 = arith.addf %182, %187 : vector<8x8xf32>
    %189 = vector.extract_strided_slice %5 {offsets = [0, 3], sizes = [8, 1], strides = [1, 1]} : vector<8x8xf32> to vector<8x1xf32>
    %190 = vector.extract_strided_slice %5 {offsets = [0, 7], sizes = [8, 1], strides = [1, 1]} : vector<8x8xf32> to vector<8x1xf32>
    %191 = tpu.transpose %189, [1, 0] : vector<8x1xf32> -> vector<1x8xf32>
    %192 = vector.broadcast %190 : vector<8x1xf32> to vector<8x8xf32>
    %193 = vector.broadcast %191 : vector<1x8xf32> to vector<8x8xf32>
    %194 = arith.addf %192, %193 : vector<8x8xf32>
    %195 = arith.addf %194, %188 : vector<8x8xf32>
    %cst_58 = arith.constant 0.000000e+00 : f32
    %196 = vector.broadcast %cst_58 : f32 to vector<8x8xf32>
    %197 = arith.cmpf oge, %195, %196 : vector<8x8xf32>
    %cst_59 = arith.constant 0.00999999977 : f32
    %198 = vector.broadcast %cst_59 : f32 to vector<8x8xf32>
    %199 = arith.mulf %198, %195 : vector<8x8xf32>
    %200 = arith.select %197, %195, %199 : vector<8x8xi1>, vector<8x8xf32>
    %cst_60 = arith.constant dense<0xFF800000> : vector<8xf32>
    %201 = vector.multi_reduction <maximumf>, %200, %cst_60 [1] : vector<8x8xf32> to vector<8xf32>
    %202 = vector.shape_cast %201 : vector<8xf32> to vector<8x1xf32>
    %cst_61 = arith.constant dense<0xFF800000> : vector<1xf32>
    %203 = vector.multi_reduction <maximumf>, %202, %cst_61 [0] : vector<8x1xf32> to vector<1xf32>
    %204 = vector.shape_cast %203 : vector<1xf32> to vector<1x1xf32>
    %205 = vector.broadcast %204 : vector<1x1xf32> to vector<8x8xf32>
    %206 = arith.subf %200, %205 : vector<8x8xf32>
    %207 = math.exp %206 : vector<8x8xf32>
    %cst_62 = arith.constant dense<0.000000e+00> : vector<8xf32>
    %208 = vector.multi_reduction <add>, %207, %cst_62 [1] : vector<8x8xf32> to vector<8xf32>
    %209 = vector.shape_cast %208 : vector<8xf32> to vector<8x1xf32>
    %cst_63 = arith.constant dense<0.000000e+00> : vector<1xf32>
    %210 = vector.multi_reduction <add>, %209, %cst_63 [0] : vector<8x1xf32> to vector<1xf32>
    %211 = vector.shape_cast %210 : vector<1xf32> to vector<1x1xf32>
    %212 = tpu.reciprocal %211 {approx = true} : vector<1x1xf32> -> vector<1x1xf32>
    %213 = vector.broadcast %212 : vector<1x1xf32> to vector<8x1xf32>
    %214 = arith.mulf %209, %213 : vector<8x1xf32>
    %215 = vector.extract_strided_slice %4 {offsets = [0, 96], sizes = [8, 32], strides = [1, 1]} : vector<8x128xf32> to vector<8x32xf32>
    %216 = vector.broadcast %214 : vector<8x1xf32> to vector<8x32xf32>
    %217 = arith.mulf %215, %216 : vector<8x32xf32>
    %218 = arith.addf %61, %113 : vector<8x32xf32>
    %219 = arith.addf %218, %165 : vector<8x32xf32>
    %220 = arith.addf %219, %217 : vector<8x32xf32>
    %cst_64 = arith.constant 2.500000e-01 : f32
    %221 = vector.broadcast %cst_64 : f32 to vector<8x32xf32>
    %222 = arith.mulf %220, %221 : vector<8x32xf32>
    %223 = arith.negf %222 : vector<8x32xf32>
    %224 = math.exp %223 : vector<8x32xf32>
    %cst_65 = arith.constant 1.000000e+00 : f32
    %225 = vector.broadcast %cst_65 : f32 to vector<8x32xf32>
    %226 = arith.addf %225, %224 : vector<8x32xf32>
    %227 = arith.divf %225, %226 : vector<8x32xf32>
    %228 = vector.broadcast %9 : vector<8x1xf32> to vector<8x32xf32>
    %229 = arith.mulf %227, %228 : vector<8x32xf32>
    %c0_66 = arith.constant 0 : index
    %c0_67 = arith.constant 0 : index
    %c0_68 = arith.constant 0 : index
    %230 = vector.load %arg6[%c0_66, %c0_67, %c0_68] : memref<1x8x32xf32, #tpu.memory_space<vmem>>, vector<1x8x32xf32>
    %231 = vector.shape_cast %230 : vector<1x8x32xf32> to vector<8x32xf32>
    %232 = vector.shape_cast %229 : vector<8x32xf32> to vector<1x8x32xf32>
    tpu.vector_store %arg6[%c0_66, %c0_67, %c0_68], %232 {strides = array<i32>} : memref<1x8x32xf32, #tpu.memory_space<vmem>>, vector<1x8x32xf32>,
    return
  }
  func.func @transform_0(%arg0: i32) -> (i32, i32, i32) {
    %c0_i32 = arith.constant 0 : i32
    %c0_i32_0 = arith.constant 0 : i32
    %c0_i32_1 = arith.constant 0 : i32
    return %arg0, %c0_i32, %c0_i32_0 : i32, i32, i32
  }
  func.func @transform_1(%arg0: i32) -> (i32, i32, i32, i32) {
    %c0_i32 = arith.constant 0 : i32
    %c0_i32_0 = arith.constant 0 : i32
    %c0_i32_1 = arith.constant 0 : i32
    %c0_i32_2 = arith.constant 0 : i32
    return %arg0, %c0_i32, %c0_i32_0, %c0_i32_1 : i32, i32, i32, i32
  }
  func.func @transform_2(%arg0: i32) -> (i32, i32) {
    %c0_i32 = arith.constant 0 : i32
    %c0_i32_0 = arith.constant 0 : i32
    %c0_i32_1 = arith.constant 0 : i32
    return %c0_i32, %c0_i32_0 : i32, i32
  }
  func.func @transform_3(%arg0: i32) -> (i32, i32) {
    %c0_i32 = arith.constant 0 : i32
    %c0_i32_0 = arith.constant 0 : i32
    %c0_i32_1 = arith.constant 0 : i32
    return %c0_i32, %c0_i32_0 : i32, i32
  }
  func.func @transform_4(%arg0: i32) -> (i32, i32, i32) {
    %c0_i32 = arith.constant 0 : i32
    %c0_i32_0 = arith.constant 0 : i32
    %c0_i32_1 = arith.constant 0 : i32
    return %arg0, %c0_i32, %c0_i32_0 : i32, i32, i32
  }
  func.func @transform_5(%arg0: i32) -> (i32, i32, i32) {
    %c0_i32 = arith.constant 0 : i32
    %c0_i32_0 = arith.constant 0 : i32
    %c0_i32_1 = arith.constant 0 : i32
    return %arg0, %c0_i32, %c0_i32_0 : i32, i32, i32
  }
}

module attributes {stable_mosaic.version = 11 : i64} {
  func.func @_readout_kernel(%arg0: memref<16x32xf32, #tpu.memory_space<vmem>>, %arg1: memref<16x32xf32, #tpu.memory_space<vmem>>, %arg2: memref<16x1xf32, #tpu.memory_space<vmem>>, %arg3: memref<64x128xf32, #tpu.memory_space<vmem>>, %arg4: memref<1x128xf32, #tpu.memory_space<vmem>>, %arg5: memref<128x256xf32, #tpu.memory_space<vmem>>, %arg6: memref<1x256xf32, #tpu.memory_space<vmem>>, %arg7: memref<256x128xf32, #tpu.memory_space<vmem>>, %arg8: memref<1x128xf32, #tpu.memory_space<vmem>>, %arg9: memref<128x3xf32, #tpu.memory_space<vmem>>, %arg10: memref<1x3xf32, #tpu.memory_space<vmem>>, %arg11: memref<32x128xf32, #tpu.memory_space<vmem>>, %arg12: memref<1x128xf32, #tpu.memory_space<vmem>>, %arg13: memref<128x256xf32, #tpu.memory_space<vmem>>, %arg14: memref<1x256xf32, #tpu.memory_space<vmem>>, %arg15: memref<256x128xf32, #tpu.memory_space<vmem>>, %arg16: memref<1x128xf32, #tpu.memory_space<vmem>>, %arg17: memref<128x3xf32, #tpu.memory_space<vmem>>, %arg18: memref<1x3xf32, #tpu.memory_space<vmem>>, %arg19: memref<2x3xf32, #tpu.memory_space<vmem>>) attributes {dimension_semantics = [], scalar_prefetch = 0 : i64, scratch_operands = 0 : i64, tpu.core_type = #tpu.core_type<tc>} {
    %c0 = arith.constant 0 : index
    %c0_0 = arith.constant 0 : index
    %0 = vector.load %arg0[%c0, %c0_0] : memref<16x32xf32, #tpu.memory_space<vmem>>, vector<16x32xf32>
    %c0_1 = arith.constant 0 : index
    %c0_2 = arith.constant 0 : index
    %1 = vector.load %arg1[%c0_1, %c0_2] : memref<16x32xf32, #tpu.memory_space<vmem>>, vector<16x32xf32>
    %c0_3 = arith.constant 0 : index
    %c0_4 = arith.constant 0 : index
    %2 = vector.load %arg2[%c0_3, %c0_4] : memref<16x1xf32, #tpu.memory_space<vmem>>, vector<16x1xf32>
    %3 = tpu.concatenate %0, %1 in 1 : vector<16x32xf32>, vector<16x32xf32> -> vector<16x64xf32>
    %c0_5 = arith.constant 0 : index
    %c0_6 = arith.constant 0 : index
    %4 = vector.load %arg3[%c0_5, %c0_6] : memref<64x128xf32, #tpu.memory_space<vmem>>, vector<64x128xf32>
    %cst = arith.constant dense<0.000000e+00> : vector<16x128xf32>
    %5 = tpu.matmul %3, %4, %cst {dimension_numbers = #tpu.dot_dimension_numbers<[1], [0], [0], [1], [0, 0, 1, 1], [], []>} : vector<16x64xf32>, vector<64x128xf32>, vector<16x128xf32> -> vector<16x128xf32>
    %c0_7 = arith.constant 0 : index
    %c0_8 = arith.constant 0 : index
    %6 = vector.load %arg4[%c0_7, %c0_8] : memref<1x128xf32, #tpu.memory_space<vmem>>, vector<1x128xf32>
    %7 = vector.broadcast %6 : vector<1x128xf32> to vector<16x128xf32>
    %8 = arith.addf %5, %7 : vector<16x128xf32>
    %cst_9 = arith.constant 0.000000e+00 : f32
    %9 = vector.broadcast %cst_9 : f32 to vector<16x128xf32>
    %10 = arith.maximumf %8, %9 : vector<16x128xf32>
    %c0_10 = arith.constant 0 : index
    %c0_11 = arith.constant 0 : index
    %11 = vector.load %arg5[%c0_10, %c0_11] : memref<128x256xf32, #tpu.memory_space<vmem>>, vector<128x256xf32>
    %cst_12 = arith.constant dense<0.000000e+00> : vector<16x256xf32>
    %12 = tpu.matmul %10, %11, %cst_12 {dimension_numbers = #tpu.dot_dimension_numbers<[1], [0], [0], [1], [0, 0, 1, 1], [], []>} : vector<16x128xf32>, vector<128x256xf32>, vector<16x256xf32> -> vector<16x256xf32>
    %c0_13 = arith.constant 0 : index
    %c0_14 = arith.constant 0 : index
    %13 = vector.load %arg6[%c0_13, %c0_14] : memref<1x256xf32, #tpu.memory_space<vmem>>, vector<1x256xf32>
    %14 = vector.broadcast %13 : vector<1x256xf32> to vector<16x256xf32>
    %15 = arith.addf %12, %14 : vector<16x256xf32>
    %cst_15 = arith.constant 0.000000e+00 : f32
    %16 = vector.broadcast %cst_15 : f32 to vector<16x256xf32>
    %17 = arith.maximumf %15, %16 : vector<16x256xf32>
    %c0_16 = arith.constant 0 : index
    %c0_17 = arith.constant 0 : index
    %18 = vector.load %arg7[%c0_16, %c0_17] : memref<256x128xf32, #tpu.memory_space<vmem>>, vector<256x128xf32>
    %cst_18 = arith.constant dense<0.000000e+00> : vector<16x128xf32>
    %19 = tpu.matmul %17, %18, %cst_18 {dimension_numbers = #tpu.dot_dimension_numbers<[1], [0], [0], [1], [0, 0, 1, 1], [], []>} : vector<16x256xf32>, vector<256x128xf32>, vector<16x128xf32> -> vector<16x128xf32>
    %c0_19 = arith.constant 0 : index
    %c0_20 = arith.constant 0 : index
    %20 = vector.load %arg8[%c0_19, %c0_20] : memref<1x128xf32, #tpu.memory_space<vmem>>, vector<1x128xf32>
    %21 = vector.broadcast %20 : vector<1x128xf32> to vector<16x128xf32>
    %22 = arith.addf %19, %21 : vector<16x128xf32>
    %cst_21 = arith.constant 0.000000e+00 : f32
    %23 = vector.broadcast %cst_21 : f32 to vector<16x128xf32>
    %24 = arith.maximumf %22, %23 : vector<16x128xf32>
    %c0_22 = arith.constant 0 : index
    %c0_23 = arith.constant 0 : index
    %25 = vector.load %arg9[%c0_22, %c0_23] : memref<128x3xf32, #tpu.memory_space<vmem>>, vector<128x3xf32>
    %cst_24 = arith.constant dense<0.000000e+00> : vector<16x3xf32>
    %26 = tpu.matmul %24, %25, %cst_24 {dimension_numbers = #tpu.dot_dimension_numbers<[1], [0], [0], [1], [0, 0, 1, 1], [], []>} : vector<16x128xf32>, vector<128x3xf32>, vector<16x3xf32> -> vector<16x3xf32>
    %c0_25 = arith.constant 0 : index
    %c0_26 = arith.constant 0 : index
    %27 = vector.load %arg10[%c0_25, %c0_26] : memref<1x3xf32, #tpu.memory_space<vmem>>, vector<1x3xf32>
    %28 = vector.broadcast %27 : vector<1x3xf32> to vector<16x3xf32>
    %29 = arith.addf %26, %28 : vector<16x3xf32>
    %c0_27 = arith.constant 0 : index
    %c0_28 = arith.constant 0 : index
    %30 = vector.load %arg11[%c0_27, %c0_28] : memref<32x128xf32, #tpu.memory_space<vmem>>, vector<32x128xf32>
    %cst_29 = arith.constant dense<0.000000e+00> : vector<16x128xf32>
    %31 = tpu.matmul %1, %30, %cst_29 {dimension_numbers = #tpu.dot_dimension_numbers<[1], [0], [0], [1], [0, 0, 1, 1], [], []>} : vector<16x32xf32>, vector<32x128xf32>, vector<16x128xf32> -> vector<16x128xf32>
    %c0_30 = arith.constant 0 : index
    %c0_31 = arith.constant 0 : index
    %32 = vector.load %arg12[%c0_30, %c0_31] : memref<1x128xf32, #tpu.memory_space<vmem>>, vector<1x128xf32>
    %33 = vector.broadcast %32 : vector<1x128xf32> to vector<16x128xf32>
    %34 = arith.addf %31, %33 : vector<16x128xf32>
    %cst_32 = arith.constant 0.000000e+00 : f32
    %35 = vector.broadcast %cst_32 : f32 to vector<16x128xf32>
    %36 = arith.maximumf %34, %35 : vector<16x128xf32>
    %c0_33 = arith.constant 0 : index
    %c0_34 = arith.constant 0 : index
    %37 = vector.load %arg13[%c0_33, %c0_34] : memref<128x256xf32, #tpu.memory_space<vmem>>, vector<128x256xf32>
    %cst_35 = arith.constant dense<0.000000e+00> : vector<16x256xf32>
    %38 = tpu.matmul %36, %37, %cst_35 {dimension_numbers = #tpu.dot_dimension_numbers<[1], [0], [0], [1], [0, 0, 1, 1], [], []>} : vector<16x128xf32>, vector<128x256xf32>, vector<16x256xf32> -> vector<16x256xf32>
    %c0_36 = arith.constant 0 : index
    %c0_37 = arith.constant 0 : index
    %39 = vector.load %arg14[%c0_36, %c0_37] : memref<1x256xf32, #tpu.memory_space<vmem>>, vector<1x256xf32>
    %40 = vector.broadcast %39 : vector<1x256xf32> to vector<16x256xf32>
    %41 = arith.addf %38, %40 : vector<16x256xf32>
    %cst_38 = arith.constant 0.000000e+00 : f32
    %42 = vector.broadcast %cst_38 : f32 to vector<16x256xf32>
    %43 = arith.maximumf %41, %42 : vector<16x256xf32>
    %c0_39 = arith.constant 0 : index
    %c0_40 = arith.constant 0 : index
    %44 = vector.load %arg15[%c0_39, %c0_40] : memref<256x128xf32, #tpu.memory_space<vmem>>, vector<256x128xf32>
    %cst_41 = arith.constant dense<0.000000e+00> : vector<16x128xf32>
    %45 = tpu.matmul %43, %44, %cst_41 {dimension_numbers = #tpu.dot_dimension_numbers<[1], [0], [0], [1], [0, 0, 1, 1], [], []>} : vector<16x256xf32>, vector<256x128xf32>, vector<16x128xf32> -> vector<16x128xf32>
    %c0_42 = arith.constant 0 : index
    %c0_43 = arith.constant 0 : index
    %46 = vector.load %arg16[%c0_42, %c0_43] : memref<1x128xf32, #tpu.memory_space<vmem>>, vector<1x128xf32>
    %47 = vector.broadcast %46 : vector<1x128xf32> to vector<16x128xf32>
    %48 = arith.addf %45, %47 : vector<16x128xf32>
    %cst_44 = arith.constant 0.000000e+00 : f32
    %49 = vector.broadcast %cst_44 : f32 to vector<16x128xf32>
    %50 = arith.maximumf %48, %49 : vector<16x128xf32>
    %c0_45 = arith.constant 0 : index
    %c0_46 = arith.constant 0 : index
    %51 = vector.load %arg17[%c0_45, %c0_46] : memref<128x3xf32, #tpu.memory_space<vmem>>, vector<128x3xf32>
    %cst_47 = arith.constant dense<0.000000e+00> : vector<16x3xf32>
    %52 = tpu.matmul %50, %51, %cst_47 {dimension_numbers = #tpu.dot_dimension_numbers<[1], [0], [0], [1], [0, 0, 1, 1], [], []>} : vector<16x128xf32>, vector<128x3xf32>, vector<16x3xf32> -> vector<16x3xf32>
    %c0_48 = arith.constant 0 : index
    %c0_49 = arith.constant 0 : index
    %53 = vector.load %arg18[%c0_48, %c0_49] : memref<1x3xf32, #tpu.memory_space<vmem>>, vector<1x3xf32>
    %54 = vector.broadcast %53 : vector<1x3xf32> to vector<16x3xf32>
    %55 = arith.addf %52, %54 : vector<16x3xf32>
    %56 = arith.negf %29 : vector<16x3xf32>
    %57 = math.exp %56 : vector<16x3xf32>
    %cst_50 = arith.constant 1.000000e+00 : f32
    %58 = vector.broadcast %cst_50 : f32 to vector<16x3xf32>
    %59 = arith.addf %58, %57 : vector<16x3xf32>
    %60 = arith.divf %58, %59 : vector<16x3xf32>
    %61 = arith.mulf %60, %55 : vector<16x3xf32>
    %62 = vector.broadcast %2 : vector<16x1xf32> to vector<16x3xf32>
    %63 = arith.mulf %61, %62 : vector<16x3xf32>
    %64 = vector.extract_strided_slice %63 {offsets = [0, 0], sizes = [8, 3], strides = [1, 1]} : vector<16x3xf32> to vector<8x3xf32>
    %cst_51 = arith.constant dense<0.000000e+00> : vector<3xf32>
    %65 = vector.multi_reduction <add>, %64, %cst_51 [0] : vector<8x3xf32> to vector<3xf32>
    %66 = vector.shape_cast %65 : vector<3xf32> to vector<1x3xf32>
    %67 = vector.extract_strided_slice %63 {offsets = [8, 0], sizes = [8, 3], strides = [1, 1]} : vector<16x3xf32> to vector<8x3xf32>
    %cst_52 = arith.constant dense<0.000000e+00> : vector<3xf32>
    %68 = vector.multi_reduction <add>, %67, %cst_52 [0] : vector<8x3xf32> to vector<3xf32>
    %69 = vector.shape_cast %68 : vector<3xf32> to vector<1x3xf32>
    %70 = tpu.concatenate %66, %69 in 0 : vector<1x3xf32>, vector<1x3xf32> -> vector<2x3xf32>
    %c0_53 = arith.constant 0 : index
    %c0_54 = arith.constant 0 : index
    %71 = vector.load %arg19[%c0_53, %c0_54] : memref<2x3xf32, #tpu.memory_space<vmem>>, vector<2x3xf32>
    tpu.vector_store %arg19[%c0_53, %c0_54], %70 {strides = array<i32>} : memref<2x3xf32, #tpu.memory_space<vmem>>, vector<2x3xf32>,
    return
  }
}

</mosaic_0001>

<bundles_post_ra>
// kernel: mpnn_attn_forward.4
= control target key start
LH: loop header
LB: loop body
LE: loop exit
PB: predicated region body
PF: predicated region fallthrough
CT: control target
= control target key end

     0   :  { %10 = vsyncpa [#allocation3], 0  ;;  %s1035_s18 = smov 0   ;;  %s1254_s0 = inlined_call_operand.vmem [shape: f32[2,8,128], index: 0, kind: input, shape index: {}]   ;;  %s1255_s1 = inlined_call_operand.vmem [shape: f32[2,4,8,8], index: 1, kind: input, shape index: {}]   ;;  %s1256_s2 = inlined_call_operand.vmem [shape: f32[128,136], index: 2, kind: input, shape index: {}]   ;;  %s1257_s3 = inlined_call_operand.vmem [shape: f32[4,4], index: 3, kind: input, shape index: {}]   ;;  %s1258_s4 = inlined_call_operand.vmem [shape: f32[2,8,1], index: 4, kind: input, shape index: {}]   ;;  %s1259_s5 = inlined_call_operand.vmem [shape: f32[2,8,32], index: 5, kind: output, shape index: {}]  }
   0x1 LB: > { %s1041_s19 = sadd.s32 4294967295, %s990_s18   ;;  %p848_p0 = scmp.ge.s32.totalorder %s990_s18, 1  ;;  %s990_s18 = sphi %s1035_s18, %s16_s18  }
   0x2   : > { %p167_p1 = scmp.lt.s32.totalorder %s990_s18, 3  ;;  %s183_s22 = sshll.u32 %s1257_s3, 4  ;;  %s184_s22 = int_to_ptr.vmem [resolvable:$true] %s183_s22 }
   0x3   : > { %p917_p3 = scmp.eq.s32.totalorder %s1041_s19, 0  ;;  %s965_s24 = scalar_lea.vmem %s184_s22, 64 }
   0x4   : > { %p1048_p2 = pnand %p848_p0, %p167_p1  ;;  %p966_p6 = scmp.ne.s32.totalorder %s184_s22, %s965_s24 }
   0x5   : > { %p973_p10 = scmp.lt.s32.totalorder %s184_s22, %s184_s22  ;;  %p974_p11 = scmp.lt.s32.totalorder %s965_s24, %s965_s24 }
   0x6   : > { %p913_p4 = pneg %p1048_p2 }
   0x7   : > { %p975_p12 = por %p974_p11, %p973_p10 }
   0x8   : > { %p914_p5 = pnand %p917_p3, %p913_p4 }
   0xa   : > { %p967_p7 = pneg %p914_p5 }
   0xc   : > { %p968_p8 = pnand %p967_p7, %p966_p6 }
   0xe   : > { %p969_p9 = pneg %p968_p8 }
  0x10   : > { %p976_p13 = pnand %p975_p12, %p969_p9 }
  0x12   : > { %979 = shalt.err (!%p976_p13)
}
  0x13   : > { %s992_s25 = smov [#allocation2]   ;;  %218 = sbr.rel (%p1048_p2) target bundleno = 1105 (0x451), region = 40 }
  0x14   : > { %916 = dma.vmem_to_smem (!%p914_p5), %s184_s22, 64, %s992_s25, [#allocation3]  }
  0x1a   : > { %985 = dma.done.wait (%p917_p3), [#allocation3], 64  }
  0x1b   : > { %987 = vsyncadd (%p917_p3), [#allocation3], 4294967232 }
  0x1c   : > { %224 = sfence }
  0x1d   : > { %v273_v0 = vld [vmem:[%s1256_s2 + $0x8] sm:$0xff]  ;;  %v275_v1 = vld [vmem:[%s1256_s2 + $0x18] sm:$0xff]  ;;  %v272_v2 = vld [vmem:[%s1256_s2] sm:$0xff]  ;;  %v993_v7 = vmov 0.0   ;;  %p254_p0 = scmp.lt.s32.totalorder %s1041_s19, 1  ;;  %v994_v50 = vmov 5   ;;  %v432_v63 = vlaneseq }
  0x1e   : > { %v877_v3 = vpack.c.bf16 %v275_v1, %v273_v0  ;;  %v274_v4 = vld [vmem:[%s1256_s2 + $0x10] sm:$0xff]  ;;  %v277_v5 = vld [vmem:[%s1256_s2 + $0x28] sm:$0xff]  ;;  %v279_v6 = vld [vmem:[%s1256_s2 + $0x38] sm:$0xff]  ;;  %368 = vmatprep.mubr.f32.mxu0 %v993_v7  ;;  %940 = vset.pattern.permute.xlu1 %v994_v50  ;;  %v995_v51 = vmov 6   ;;  %s996_s25 = smov 125   ;;  %s997_s26 = smov 127  }
  0x1f   : > { %v879_v8 = vpack.c.bf16 %v274_v4, %v272_v2  ;;  %v881_v9 = vpack.c.bf16 %v279_v6, %v277_v5  ;;  %v276_v10 = vld [vmem:[%s1256_s2 + $0x20] sm:$0xff]  ;;  %v278_v11 = vld [vmem:[%s1256_s2 + $0x30] sm:$0xff]  ;;  %v281_v12 = vld [vmem:[%s1256_s2 + $0x48] sm:$0xff]  ;;  %s1262_s19 = smov (!%p254_p0, %s1041_s19), 1  ;;  %941 = vset.pattern.permute.xlu0 %v995_v51  ;;  %s998_s27 = smov 126   ;;  %v999_v54 = vmov 7  }
  0x20   : > { %878 = vmatprep.subr.bf16.mxu0 %v877_v3  ;;  %v283_v13 = vld [vmem:[%s1256_s2 + $0x58] sm:$0xff]  ;;  %v883_v14 = vpack.c.bf16 %v278_v11, %v276_v10  ;;  %v280_v16 = vld [vmem:[%s1256_s2 + $0x40] sm:$0xff]  ;;  %v282_v17 = vld [vmem:[%s1256_s2 + $0x50] sm:$0xff]  ;;  %s1164_s21 = sshll.u32 %s1262_s19, 3  ;;  %v1000_v55 = vmov 4   ;;  %s861_s28 = sld [smem:[#allocation2 + $0x80]] }
  0x21   : > { %880 = vmatpush1.bf16.msra.mxu0 %v879_v8  ;;  %v885_v15 = vpack.c.bf16 %v283_v13, %v281_v12  ;;  %v285_v18 = vld [vmem:[%s1256_s2 + $0x68] sm:$0xff]  ;;  %v287_v19 = vld [vmem:[%s1256_s2 + $0x78] sm:$0xff]  ;;  %v887_v20 = vpack.c.bf16 %v282_v17, %v280_v16  ;;  %v284_v22 = vld [vmem:[%s1256_s2 + $0x60] sm:$0xff]  ;;  %s257_s24 = scalar_lea.vmem %s1254_s0, %s1164_s21  ;;  %s862_s29 = sld [smem:[#allocation2 + $0x81]]  ;;  %v433_v7 = vshrl.u32 %v432_v63, 7  ;;  %vm441_vm0 = vcmask 64512  }
  0x22   : > { %882 = vmatprep.subr.bf16.mxu0 %v881_v9  ;;  %v889_v21 = vpack.c.bf16 %v287_v19, %v285_v18  ;;  %v286_v23 = vld [vmem:[%s1256_s2 + $0x70] sm:$0xff]  ;;  %v289_v24 = vld [vmem:[%s1256_s2 + $0x88] sm:$0xff]  ;;  %v291_v25 = vld [vmem:[%s1256_s2 + $0x98] sm:$0xff]  ;;  %s876_s30 = sshll.u32 %s1262_s19, 5  ;;  %s865_s6 = sld [smem:[#allocation2 + $0x100]]  ;;  %vm755_vm5 = vcmask 261120  }
  0x23   : > { %v891_v26 = vpack.c.bf16 %v286_v23, %v284_v22  ;;  %v893_v27 = vpack.c.bf16 %v291_v25, %v289_v24  ;;  %v288_v28 = vld [vmem:[%s1256_s2 + $0x80] sm:$0xff]  ;;  %v290_v29 = vld [vmem:[%s1256_s2 + $0x90] sm:$0xff]  ;;  %v293_v30 = vld [vmem:[%s1256_s2 + $0xa8] sm:$0xff]  ;;  %s866_s7 = sld [smem:[#allocation2 + $0x101]]  ;;  %s863_s8 = sld [smem:[#allocation2 + $0x82]]  ;;  %v1210_v19 = vsub.s32 0, %v433_v7 }
  0x24   : > { %v295_v31 = vld [vmem:[%s1256_s2 + $0xb8] sm:$0xff]  ;;  %v895_v32 = vpack.c.bf16 %v290_v29, %v288_v28  ;;  %v292_v34 = vld [vmem:[%s1256_s2 + $0xa0] sm:$0xff]  ;;  %v294_v35 = vld [vmem:[%s1256_s2 + $0xb0] sm:$0xff]  ;;  %s262_s11 = scalar_lea.vmem %s1255_s1, %s876_s30  ;;  %s1185_s12 = sld [smem:[#allocation2 + $0x83]] }
  0x25   : > { %884 = vmatpush1.bf16.msra.mxu0 %v883_v14  ;;  %v897_v33 = vpack.c.bf16 %v295_v31, %v293_v30  ;;  %v297_v36 = vld [vmem:[%s1256_s2 + $0xc8] sm:$0xff]  ;;  %v299_v37 = vld [vmem:[%s1256_s2 + $0xd8] sm:$0xff]  ;;  %v899_v38 = vpack.c.bf16 %v294_v35, %v292_v34  ;;  %v296_v40 = vld [vmem:[%s1256_s2 + $0xc0] sm:$0xff]  ;;  %s1187_s13 = sld [smem:[#allocation2 + $0x102]]  ;;  %s1193_s14 = sld [smem:[#allocation2 + $0x180]] }
  0x26   : > { %886 = vmatprep.subr.bf16.mxu0 %v885_v15  ;;  %v901_v39 = vpack.c.bf16 %v299_v37, %v297_v36  ;;  %v298_v41 = vld [vmem:[%s1256_s2 + $0xd0] sm:$0xff]  ;;  %v301_v42 = vld [vmem:[%s1256_s2 + $0xe8] sm:$0xff]  ;;  %v303_v43 = vld [vmem:[%s1256_s2 + $0xf8] sm:$0xff]  ;;  %v467_v61 = vstv %s861_s28  ;;  %s1195_s19 = sld [smem:[#allocation2 + $0x181]]  ;;  %s868_s15 = sld [smem:[#allocation2 + $0x103]] }
  0x27   : > { %v903_v44 = vpack.c.bf16 %v298_v41, %v296_v40  ;;  %v905_v45 = vpack.c.bf16 %v303_v43, %v301_v42  ;;  %v300_v46 = vld [vmem:[%s1256_s2 + $0xe0] sm:$0xff]  ;;  %v302_v47 = vld [vmem:[%s1256_s2 + $0xf0] sm:$0xff]  ;;  %v1191_v60 = vld [vmem:[%s262_s11 + $0x8] sm:$0xff]  ;;  %v470_v62 = vstv %s862_s29  ;;  %s871_s16 = sld [smem:[#allocation2 + $0x182]]  ;;  %s872_s17 = sld [smem:[#allocation2 + $0x183]] }
  0x28   : > { %v907_v48 = vpack.c.bf16 %v302_v47, %v300_v46  ;;  %v271_v49 = vld [vmem:[%s257_s24] sm:$0xff]  ;;  %v471_v1 = vmul.f32 %v470_v62, %v1191_v60  ;;  %v554_v2 = vstv %s865_s6  ;;  %v1199_v4 = vld [vmem:[%s262_s11 + $0x10] sm:$0xff]  ;;  %v1203_v10 = vld [vmem:[%s262_s11 + $0x18] sm:$0xff]  ;;  %s380_s20 = sld [smem:[#allocation2]]  ;;  %s858_s22 = sld [smem:[#allocation2 + $0x1]] }
  0x29   : > { %888 = vmatpush1.bf16.msra.mxu0 %v887_v20  ;;  %v1189_v59 = vld [vmem:[%s262_s11] sm:$0xff]  ;;  %v557_v3 = vstv %s866_s7  ;;  %v474_v6 = vstv %s863_s8  ;;  %s859_s23 = sld [smem:[#allocation2 + $0x2]]  ;;  %s860_s24 = sld [smem:[#allocation2 + $0x3]] }
  0x2a   : > { %890 = vmatprep.subr.bf16.mxu0 %v889_v21  ;;  %v468_v0 = vmul.f32 %v467_v61, %v1189_v59  ;;  %v555_v8 = vmul.f32 %v554_v2, %v1189_v59  ;;  %v558_v9 = vmul.f32 %v557_v3, %v1191_v60  ;;  %v475_v12 = vmul.f32 %v474_v6, %v1199_v4  ;;  %s266_s29 = scalar_lea.vmem %s1258_s4, %s1164_s21  ;;  %s1004_s30 = smov 32  }
  0x2b   : > { %v478_v13 = vstv %s1185_s12  ;;  %v561_v14 = vstv %s1187_s13  ;;  %v641_v16 = vstv %s1193_s14  ;;  %s270_s8 = scalar_lea.vmem %s1259_s5, %s1164_s21 }
  0x2c   : > { %v472_v11 = vadd.f32 %v471_v1, %v468_v0  ;;  %v644_v17 = vstv %s1195_s19  ;;  %v479_v20 = vmul.f32 %v478_v13, %v1203_v10  ;;  %v559_v21 = vadd.f32 %v558_v9, %v555_v8 }
  0x2d   : > { %892 = vmatpush1.bf16.msra.mxu0 %v891_v26  ;;  %v562_v22 = vmul.f32 %v561_v14, %v1199_v4  ;;  %v565_v24 = vstv %s868_s15  ;;  %v642_v25 = vmul.f32 %v641_v16, %v1189_v59  ;;  %v645_v26 = vmul.f32 %v644_v17, %v1191_v60 }
  0x2e   : > { %894 = vmatprep.subr.bf16.mxu0 %v893_v27  ;;  %v476_v23 = vadd.f32 %v475_v12, %v472_v11  ;;  %v648_v27 = vstv %s871_s16  ;;  %v566_v31 = vmul.f32 %v565_v24, %v1203_v10  ;;  %v652_v36 = vstv %s872_s17 }
  0x2f   : > { %v563_v30 = vadd.f32 %v562_v22, %v559_v21  ;;  %v646_v34 = vadd.f32 %v645_v26, %v642_v25  ;;  %v649_v35 = vmul.f32 %v648_v27, %v1199_v4  ;;  %v653_v43 = vmul.f32 %v652_v36, %v1203_v10 }
  0x30   : > { %v381_v14 = vstv %s380_s20  ;;  %v388_v24 = vstv %s859_s23 }
  0x31   : > { %896 = vmatpush1.bf16.msra.mxu0 %v895_v32  ;;  %v480_v32 = vadd.f32 %v479_v20, %v476_v23  ;;  %v650_v42 = vadd.f32 %v649_v35, %v646_v34  ;;  %v389_v26 = vmul.f32 %v388_v24, %v1199_v4 }
  0x32   : > { %898 = vmatprep.subr.bf16.mxu0 %v897_v33 }
  0x35   : > { %900 = vmatpush1.bf16.msra.mxu0 %v899_v38  ;;  %v567_v38 = vadd.f32 %v566_v31, %v563_v30  ;;  %v392_v31 = vstv %s860_s24 }
  0x36   : > { %902 = vmatprep.subr.bf16.mxu0 %v901_v39 }
  0x39   : > { %904 = vmatpush1.bf16.msra.mxu0 %v903_v44 }
  0x3a   : > { %906 = vmatprep.subr.bf16.mxu0 %v905_v45 }
  0x3d   : > { %908 = vmatpush1.bf16.msra.mxu0 %v907_v48  ;;  %v654_v48 = vadd.f32 %v653_v43, %v650_v42 }
  0x40   : > { %369 = vmatmul.mubr.f32.vlgmr.msra.gmra.mrb[0].mxu0 %v271_v49 }
 0x113   : > { %v1170_v52 = vpop.f32.mrb[0].mxu0 }
 0x114   : > { %v1172_v53 = vpop.f32.mrb[1].mxu0 }
 0x115   : > { %655 = vrot.lane.b32.xlu1 %v1172_v53, %s996_s25  ;;  %481 = vrot.lane.b32.xlu0 %v1172_v53, %s997_s26  ;;  %s1002_s25 = smov 64   ;;  %s1003_s26 = smov 96  }
 0x119   : > { %517 = vperm.xlu1 %940, %v1172_v53   ;;  %568 = vrot.lane.b32.xlu0 %v1172_v53, %s998_s27 }
 0x11d   : > { %942 = vset.pattern.permute.xlu1 %v999_v54  ;;  %604 = vperm.xlu0 %941, %v1172_v53  }
 0x11e   : > { %691 = vperm.xlu1 %942, %v1172_v53  }
 0x121   : > { %943 = vset.pattern.permute.xlu0 %v1000_v55 }
 0x122   : > { %429 = vperm.xlu0 %943, %v1172_v53  }
 0x187   : > { %v482_v56 = vpop.permute.xlu0 %481  ;;  %v656_v58 = vpop.permute.xlu1 %655 }
 0x188   : > { %484 = vxpose.xlu1.b32.start.end [1/1] (short) (narrow) %v482_v56, 8 }
 0x18b   : > { %v569_v57 = vpop.permute.xlu0 %568 }
 0x18c   : > { %571 = vxpose.xlu0.b32.start.end [1/1] (short) (narrow) %v569_v57, 8 }
 0x190   : > { %658 = vxpose.xlu0.b32.start.end [1/1] (short) (narrow) %v656_v58, 8 }
 0x198   : > { %v518_v5 = vpop.permute.xlu1 %517 }
 0x19c   : > { %v605_v15 = vpop.permute.xlu0 %604 }
 0x19d   : > { %v692_v18 = vpop.permute.xlu1 %691 }
 0x1a1   : > { %v1216_v28 = vpop.permute.xlu0 %429 }
 0x208   : > { %v500_v29 = vpop.trf.xlu1 }
 0x209   : > { %v523_v33 = vrot.slane %v500_v29, %v1210_v19 }
 0x20b   : > { %v524_v37 = vadd.f32 %v523_v33, %v518_v5  ;;  %v393_v33 = vmul.f32 %v392_v31, %v1203_v10 }
 0x20c   : > { %v587_v39 = vpop.trf.xlu0 }
 0x20d   : > { %v525_v40 = vadd.f32 %v524_v37, %v480_v32  ;;  %v610_v41 = vrot.slane %v587_v39, %v1210_v19 }
 0x20f   : > { %v611_v44 = vadd.f32 %v610_v41, %v605_v15  ;;  %vm526_vm1 = vcmp.ge.f32.partialorder %v525_v40, 0.0  ;;  %v527_v45 = vmul.f32 0.01, %v525_v40 }
 0x210   : > { %v674_v46 = vpop.trf.xlu0 }
 0x211   : > { %v612_v47 = vadd.f32 %v611_v44, %v567_v38  ;;  %v697_v49 = vrot.slane %v674_v46, %v1210_v19  ;;  %v528_v50 = vsel %vm526_vm1, %v525_v40, %v527_v45 }
 0x212   : > { %v529_v51 = vsel %vm441_vm0, %v528_v50, -inf }
 0x213   : > { %v698_v54 = vadd.f32 %v697_v49, %v692_v18  ;;  %530 = vmax.xlane.f32.xlu1 %v529_v51  ;;  %vm613_vm2 = vcmp.ge.f32.partialorder %v612_v47, 0.0  ;;  %v614_v55 = vmul.f32 0.01, %v612_v47  ;;  %v382_v18 = vmul.f32 %v381_v14, %v1189_v59 }
 0x215   : > { %v699_v56 = vadd.f32 %v698_v54, %v654_v48  ;;  %v615_v57 = vsel %vm613_vm2, %v612_v47, %v614_v55  ;;  %v1001_v48 = vmov 0  }
 0x216   : > { %v616_v58 = vsel %vm441_vm0, %v615_v57, -inf  ;;  %944 = vset.pattern.permute.xlu0 %v1001_v48 }
 0x217   : > { %617 = vmax.xlane.f32.xlu0 %v616_v58  ;;  %vm700_vm3 = vcmp.ge.f32.partialorder %v699_v56, 0.0  ;;  %v701_v61 = vmul.f32 0.01, %v699_v56 }
 0x219   : > { %v702_v62 = vsel %vm700_vm3, %v699_v56, %v701_v61 }
 0x21a   : > { %v703_v63 = vsel %vm441_vm0, %v702_v62, -inf }
 0x21b   : > { %704 = vmax.xlane.f32.xlu1 %v703_v63 }
 0x24e   : > { %395 = vxpose.xlu1.b32.start.end [1/1] (short) (narrow) %v1172_v53, 8  ;;  %v384_v53 = vstv %s858_s22 }
 0x24f   : > { %v385_v20 = vmul.f32 %v384_v53, %v1191_v60 }
 0x251   : > { %v386_v25 = vadd.f32 %v385_v20, %v382_v18 }
 0x253   : > { %v390_v32 = vadd.f32 %v389_v26, %v386_v25 }
 0x255   : > { %v394_v59 = vadd.f32 %v393_v33, %v390_v32  ;;  %v379_v33 = vld [vmem:[%s266_s29] sm:$0xff] }
 0x2a0   : > { %v531_v0 = vpop.xlane.xlu1 %530 }
 0x2a1   : > { %v532_v1 = vrot.slane %v531_v0, 4 }
 0x2a3   : > { %v533_v3 = vmax.f32 %v531_v0, %v532_v1 }
 0x2a4   : > { %v618_v2 = vpop.xlane.xlu0 %617 }
 0x2a5   : > { %v619_v5 = vrot.slane %v618_v2, 4  ;;  %v534_v7 = vrot.slane %v533_v3, 2 }
 0x2a7   : > { %v620_v8 = vmax.f32 %v618_v2, %v619_v5  ;;  %v535_v11 = vmax.f32 %v533_v3, %v534_v7 }
 0x2a8   : > { %v705_v6 = vpop.xlane.xlu1 %704 }
 0x2a9   : > { %v706_v9 = vrot.slane %v705_v6, 4  ;;  %v621_v12 = vrot.slane %v620_v8, 2  ;;  %v536_v15 = vrot.slane %v535_v11, 1 }
 0x2ab   : > { %v707_v13 = vmax.f32 %v705_v6, %v706_v9  ;;  %v622_v16 = vmax.f32 %v620_v8, %v621_v12  ;;  %v537_v21 = vmax.f32 %v535_v11, %v536_v15 }
 0x2ad   : > { %v708_v17 = vrot.slane %v707_v13, 2  ;;  %v623_v22 = vrot.slane %v622_v16, 1  ;;  %v538_v27 = vsub.f32 %v528_v50, %v537_v21 }
 0x2af   : > { %v709_v23 = vmax.f32 %v707_v13, %v708_v17  ;;  %v624_v29 = vmax.f32 %v622_v16, %v623_v22  ;;  %v539_v34 = vmul.f32 1.442695, %v538_v27 }
 0x2b1   : > { %v710_v30 = vrot.slane %v709_v23, 1  ;;  %v625_v35 = vsub.f32 %v615_v57, %v624_v29  ;;  %945 = vpow2.f32 %v539_v34 }
 0x2b3   : > { %v711_v36 = vmax.f32 %v709_v23, %v710_v30  ;;  %v626_v60 = vmul.f32 1.442695, %v625_v35 }
 0x2b5   : > { %v712_v38 = vsub.f32 %v702_v62, %v711_v36  ;;  %947 = vpow2.f32 %v626_v60 }
 0x2b7   : > { %v713_v4 = vmul.f32 1.442695, %v712_v38 }
 0x2b9   : > { %949 = vpow2.f32 %v713_v4 }
 0x2bb   : > { %v946_v44 = vpop.eup %945 }
 0x2bc   : > { %v541_v45 = vsel %vm441_vm0, %v946_v44, 0.0 }
 0x2bf   : > { %v948_v46 = vpop.eup %947 }
 0x2c0   : > { %v628_v47 = vsel %vm441_vm0, %v948_v46, 0.0 }
 0x2ce   : > { %v411_v37 = vpop.trf.xlu1 }
 0x2cf   : > { %v435_v39 = vrot.slane %v411_v37, %v1210_v19  ;;  %v950_v19 = vpop.eup %949 }
 0x2d1   : > { %v436_v40 = vadd.f32 %v435_v39, %v1216_v28  ;;  %v715_v28 = vsel %vm441_vm0, %v950_v19, 0.0 }
 0x2d3   : > { %v437_v41 = vadd.f32 %v436_v40, %v394_v59 }
 0x2d5   : > { %vm438_vm4 = vcmp.ge.f32.partialorder %v437_v41, 0.0  ;;  %v439_v42 = vmul.f32 0.01, %v437_v41 }
 0x2d7   : > { %v440_v43 = vsel %vm438_vm4, %v437_v41, %v439_v42 }
 0x2d8   : > { %v442_v10 = vsel %vm441_vm0, %v440_v43, -inf }
 0x2d9   : > { %443 = vmax.xlane.f32.xlu0 %v442_v10 }
 0x2dd   : > { %542 = vadd.xlane.f32.xlu0 %v541_v45 }
 0x2e1   : > { %629 = vadd.xlane.f32.xlu0 %v628_v47 }
 0x2e5   : > { %716 = vadd.xlane.f32.xlu0 %v715_v28 }
 0x366   : > { %v444_v49 = vpop.xlane.xlu0 %443 }
 0x367   : > { %v445_v50 = vrot.slane %v444_v49, 4 }
 0x369   : > { %v446_v51 = vmax.f32 %v444_v49, %v445_v50 }
 0x36a   : > { %v543_v54 = vpop.xlane.xlu0 %542 }
 0x36b   : > { %v447_v55 = vrot.slane %v446_v51, 2  ;;  %v544_v57 = vrot.slane %v543_v54, 4 }
 0x36d   : > { %v448_v56 = vmax.f32 %v446_v51, %v447_v55  ;;  %v545_v1 = vadd.f32 %v544_v57, %v543_v54 }
 0x36e   : > { %v630_v58 = vpop.xlane.xlu0 %629 }
 0x36f   : > { %v449_v61 = vrot.slane %v448_v56, 1  ;;  %v631_v62 = vrot.slane %v630_v58, 4  ;;  %v546_v9 = vrot.slane %v545_v1, 2 }
 0x371   : > { %v450_v63 = vmax.f32 %v448_v56, %v449_v61  ;;  %v632_v0 = vadd.f32 %v631_v62, %v630_v58  ;;  %v547_v14 = vadd.f32 %v546_v9, %v545_v1 }
 0x372   : > { %v717_v2 = vpop.xlane.xlu0 %716 }
 0x373   : > { %v451_v3 = vsub.f32 %v440_v43, %v450_v63  ;;  %v633_v5 = vrot.slane %v632_v0, 2  ;;  %v718_v6 = vrot.slane %v717_v2, 4  ;;  %v548_v16 = vrot.slane %v547_v14, 1 }
 0x375   : > { %v452_v7 = vmul.f32 1.442695, %v451_v3  ;;  %v634_v8 = vadd.f32 %v633_v5, %v632_v0  ;;  %v719_v11 = vadd.f32 %v718_v6, %v717_v2  ;;  %v549_v18 = vadd.f32 %v548_v16, %v547_v14 }
 0x377   : > { %951 = vpow2.f32 %v452_v7  ;;  %v635_v12 = vrot.slane %v634_v8, 1  ;;  %v720_v15 = vrot.slane %v719_v11, 2 }
 0x379   : > { %v636_v13 = vadd.f32 %v635_v12, %v634_v8  ;;  %v721_v17 = vadd.f32 %v720_v15, %v719_v11 }
 0x37b   : > { %953 = vrcp.f32 %v636_v13  ;;  %v722_v20 = vrot.slane %v721_v17, 1 }
 0x37c   : > { %955 = vrcp.f32 %v549_v18 }
 0x37d   : > { %v723_v24 = vadd.f32 %v722_v20, %v721_v17 }
 0x37f   : > { %957 = vrcp.f32 %v723_v24 }
 0x381   : > { %v952_v53 = vpop.eup %951 }
 0x382   : > { %v454_v21 = vsel %vm441_vm0, %v952_v53, 0.0 }
 0x383   : > { %455 = vadd.xlane.f32.xlu0 %v454_v21 }
 0x385   : > { %v954_v22 = vpop.eup %953 }
 0x386   : > { %v638_v23 = vmul.f32 %v954_v22, %v630_v58  ;;  %v956_v26 = vpop.eup %955 }
 0x387   : > { %v551_v27 = vmul.f32 %v956_v26, %v543_v54 }
 0x388   : > { %v639_v25 = vmul.f32 %v638_v23, %v1170_v52 }
 0x389   : > { %v958_v29 = vpop.eup %957  ;;  %v552_v31 = vmul.f32 %v551_v27, %v1170_v52 }
 0x38a   : > { %733 = vrot.lane.b32.xlu1 %v639_v25, %s1002_s25  ;;  %v725_v30 = vmul.f32 %v958_v29, %v717_v2 }
 0x38c   : > { %v726_v32 = vmul.f32 %v725_v30, %v1170_v52 }
 0x399   : > { %728 = vrot.lane.b32.xlu0 %v552_v31, %s1003_s26 }
 0x39d   : > { %738 = vrot.lane.b32.xlu0 %v726_v32, %s1004_s30 }
 0x3a1   : > { %751 = vperm.xlu0 %944, %v379_v33  }
 0x3fc   : > { %v734_v43 = vpop.permute.xlu1 %733 }
 0x410   : > { %v456_v34 = vpop.xlane.xlu0 %455 }
 0x411   : > { %v457_v35 = vrot.slane %v456_v34, 4 }
 0x413   : > { %v458_v36 = vadd.f32 %v457_v35, %v456_v34 }
 0x414   : > { %v729_v4 = vpop.permute.xlu0 %728 }
 0x415   : > { %v459_v59 = vrot.slane %v458_v36, 2 }
 0x417   : > { %v460_v37 = vadd.f32 %v459_v59, %v458_v36 }
 0x418   : > { %v739_v44 = vpop.permute.xlu0 %738 }
 0x419   : > { %v461_v60 = vrot.slane %v460_v37, 1 }
 0x41b   : > { %v462_v38 = vadd.f32 %v461_v60, %v460_v37 }
 0x41d   : > { %959 = vrcp.f32 %v462_v38 }
 0x420   : > { %v752_v48 = vpop.permute.xlu0 %751 }
 0x427   : > { %v960_v39 = vpop.eup %959 }
 0x428   : > { %v464_v40 = vmul.f32 %v960_v39, %v456_v34 }
 0x42a   : > { %v465_v41 = vmul.f32 %v464_v40, %v1170_v52 }
 0x42c   : > { %v731_v42 = vadd.f32 %v729_v4, %v465_v41 }
 0x42e   : > { %v736_v10 = vadd.f32 %v734_v43, %v731_v42 }
 0x430   : > { %v741_v45 = vadd.f32 %v739_v44, %v736_v10 }
 0x432   : > { %v873_v46 = vmul.f32 -0.25, %v741_v45 }
 0x434   : > { %v744_v47 = vmul.f32 1.442695, %v873_v46 }
 0x436   : > { %961 = vpow2.f32 %v744_v47 }
 0x440   : > { %v962_v19 = vpop.eup %961 }
 0x441   : > { %v746_v28 = vadd.f32 1.0, %v962_v19 }
 0x443   : > { %963 = vrcp.f32 %v746_v28 }
 0x44d   : > { %v964_v49 = vpop.eup %963 }
 0x44e   : > { %v754_v50 = vmul.f32 %v964_v49, %v752_v48 }
 0x450   : > { %756 = vst.msk [vmem:[%s270_s8] sm:$0xff] %vm755_vm5, %v754_v50 }
 0x451 PF: > { %s16_s18 = sadd.s32 1, %s990_s18  }
 0x452   : > { %p13_p1 = scmp.ge.s32.totalorder %s16_s18, 4  }
 0x454   :  { %15 = sbr.rel (!%p13_p1) target bundleno = 1 (0x1), region = 81 }
 0x45b   :  { %776 = vsyncpa [#allocation3], 1 }
 0x45c   :  { %778 = vsyncpa [#allocation3 + $0x1], 1 }

// kernel: mpnn_attn_forward.3
= control target key start
LH: loop header
LB: loop body
LE: loop exit
PB: predicated region body
PF: predicated region fallthrough
CT: control target
= control target key end

     0   :  { %10 = vsyncpa [#allocation3], 0  ;;  %s975_s18 = smov 0   ;;  %s1103_s0 = inlined_call_operand.vmem [shape: f32[2,8,32], index: 0, kind: input, shape index: {}]   ;;  %s1104_s1 = inlined_call_operand.vmem [shape: f32[2,4,8,8], index: 1, kind: input, shape index: {}]   ;;  %s1105_s2 = inlined_call_operand.vmem [shape: f32[32,136], index: 2, kind: input, shape index: {}]   ;;  %s1106_s3 = inlined_call_operand.vmem [shape: f32[4,4], index: 3, kind: input, shape index: {}]   ;;  %s1107_s4 = inlined_call_operand.vmem [shape: f32[2,8,1], index: 4, kind: input, shape index: {}]   ;;  %s1108_s5 = inlined_call_operand.vmem [shape: f32[2,8,128], index: 5, kind: output, shape index: {}]  }
   0x1 LB: > { %s981_s19 = sadd.s32 4294967295, %s933_s18   ;;  %p816_p0 = scmp.ge.s32.totalorder %s933_s18, 1  ;;  %s933_s18 = sphi %s975_s18, %s16_s18  }
   0x2   : > { %p167_p1 = scmp.lt.s32.totalorder %s933_s18, 3  ;;  %s183_s22 = sshll.u32 %s1106_s3, 4  ;;  %s184_s22 = int_to_ptr.vmem [resolvable:$true] %s183_s22 }
   0x3   : > { %p862_p3 = scmp.eq.s32.totalorder %s981_s19, 0  ;;  %s908_s24 = scalar_lea.vmem %s184_s22, 64 }
   0x4   : > { %p988_p2 = pnand %p816_p0, %p167_p1  ;;  %p909_p6 = scmp.ne.s32.totalorder %s184_s22, %s908_s24 }
   0x5   : > { %p916_p10 = scmp.lt.s32.totalorder %s184_s22, %s184_s22  ;;  %p917_p11 = scmp.lt.s32.totalorder %s908_s24, %s908_s24 }
   0x6   : > { %p858_p4 = pneg %p988_p2 }
   0x7   : > { %p918_p12 = por %p917_p11, %p916_p10 }
   0x8   : > { %p859_p5 = pnand %p862_p3, %p858_p4 }
   0xa   : > { %p910_p7 = pneg %p859_p5 }
   0xc   : > { %p911_p8 = pnand %p910_p7, %p909_p6 }
   0xe   : > { %p912_p9 = pneg %p911_p8 }
  0x10   : > { %p919_p13 = pnand %p918_p12, %p912_p9 }
  0x12   : > { %922 = shalt.err (!%p919_p13)
}
  0x13   : > { %s935_s25 = smov [#allocation2]   ;;  %218 = sbr.rel (%p988_p2) target bundleno = 884 (0x374), region = 40 }
  0x14   : > { %861 = dma.vmem_to_smem (!%p859_p5), %s184_s22, 64, %s935_s25, [#allocation3]  }
  0x1a   : > { %928 = dma.done.wait (%p862_p3), [#allocation3], 64  }
  0x1b   : > { %930 = vsyncadd (%p862_p3), [#allocation3], 4294967232 }
  0x1c   : > { %224 = sfence }
  0x1d   : > { %v273_v0 = vld [vmem:[%s1105_s2 + $0x8] sm:$0xff]  ;;  %v275_v1 = vld [vmem:[%s1105_s2 + $0x18] sm:$0xff]  ;;  %v272_v2 = vld [vmem:[%s1105_s2] sm:$0xff]  ;;  %p254_p0 = scmp.lt.s32.totalorder %s981_s19, 1  ;;  %v936_v7 = vmov 0.0   ;;  %vm280_vm0 = vcmask 261120   ;;  %v412_v29 = vlaneseq }
  0x1e   : > { %v846_v3 = vpack.c.bf16 %v275_v1, %v273_v0  ;;  %v274_v4 = vld [vmem:[%s1105_s2 + $0x10] sm:$0xff]  ;;  %v277_v5 = vld [vmem:[%s1105_s2 + $0x28] sm:$0xff]  ;;  %v279_v6 = vld [vmem:[%s1105_s2 + $0x38] sm:$0xff]  ;;  %348 = vmatprep.mubr.f32.mxu0 %v936_v7  ;;  %v937_v14 = vmov 4   ;;  %v938_v15 = vmov 5   ;;  %s939_s23 = smov 125  }
  0x1f   : > { %v848_v8 = vpack.c.bf16 %v274_v4, %v272_v2  ;;  %v850_v9 = vpack.c.bf16 %v279_v6, %v277_v5  ;;  %v276_v10 = vld [vmem:[%s1105_s2 + $0x20] sm:$0xff]  ;;  %v278_v11 = vld [vmem:[%s1105_s2 + $0x30] sm:$0xff]  ;;  %s1111_s19 = smov (!%p254_p0, %s981_s19), 1  ;;  %882 = vset.pattern.permute.xlu1 %v937_v14  ;;  %883 = vset.pattern.permute.xlu0 %v938_v15  ;;  %s940_s24 = smov 127   ;;  %v942_v18 = vmov 6   ;;  %v943_v19 = vmov 7  }
  0x20   : > { %847 = vmatprep.subr.bf16.mxu0 %v846_v3  ;;  %v852_v12 = vpack.c.bf16 %v278_v11, %v276_v10  ;;  %s1032_s17 = sshll.u32 %s1111_s19, 3  ;;  %s941_s25 = smov 126   ;;  %v413_v34 = vshrl.u32 %v412_v29, 7  ;;  %vm421_vm2 = vcmask 64512   ;;  %vm708_vm6 = vcmask 523264  }
  0x21   : > { %849 = vmatpush1.bf16.msra.mxu0 %v848_v8  ;;  %s257_s22 = scalar_lea.vmem %s1103_s0, %s1032_s17  ;;  %s360_s26 = sld [smem:[#allocation2]]  ;;  %vm710_vm7 = vcmask 785408  }
  0x22   : > { %851 = vmatprep.subr.bf16.mxu0 %v850_v9  ;;  %v271_v13 = vld [vmem:[%s257_s22] sm:$0xff]  ;;  %s827_s27 = sld [smem:[#allocation2 + $0x1]]  ;;  %s845_s28 = sshll.u32 %s1111_s19, 5  ;;  %v1057_v40 = vsub.s32 0, %v413_v34 }
  0x23   : > { %s828_s29 = sld [smem:[#allocation2 + $0x2]]  ;;  %s262_s7 = scalar_lea.vmem %s1104_s1, %s845_s28 }
  0x24   : > { %v1045_v23 = vld [vmem:[%s262_s7] sm:$0xff]  ;;  %v1047_v24 = vld [vmem:[%s262_s7 + $0x8] sm:$0xff]  ;;  %s829_s8 = sld [smem:[#allocation2 + $0x3]]  ;;  %v1051_v30 = vld [vmem:[%s262_s7 + $0x10] sm:$0xff]  ;;  %s830_s19 = sld [smem:[#allocation2 + $0x80]] }
  0x25   : > { %853 = vmatpush1.bf16.msra.mxu0 %v852_v12  ;;  %v1054_v35 = vld [vmem:[%s262_s7 + $0x18] sm:$0xff]  ;;  %s831_s9 = sld [smem:[#allocation2 + $0x81]]  ;;  %s834_s10 = sld [smem:[#allocation2 + $0x100]] }
  0x26   : > { %s835_s11 = sld [smem:[#allocation2 + $0x101]]  ;;  %s832_s12 = sld [smem:[#allocation2 + $0x82]] }
  0x27   : > { %v361_v25 = vstv %s360_s26  ;;  %s833_s13 = sld [smem:[#allocation2 + $0x83]]  ;;  %s836_s14 = sld [smem:[#allocation2 + $0x102]] }
  0x28   : > { %826 = vmatmul.mubr.msk.f32.vlgmr.msra.gmra.mrb[0].mxu0 %vm280_vm0, %v271_v13  ;;  %v364_v26 = vstv %s827_s27  ;;  %v362_v27 = vmul.f32 %v361_v25, %v1045_v23  ;;  %s838_s15 = sld [smem:[#allocation2 + $0x180]]  ;;  %s839_s16 = sld [smem:[#allocation2 + $0x181]] }
  0x29   : > { %v365_v28 = vmul.f32 %v364_v26, %v1047_v24  ;;  %v368_v31 = vstv %s828_s29  ;;  %s837_s20 = sld [smem:[#allocation2 + $0x103]]  ;;  %s840_s21 = sld [smem:[#allocation2 + $0x182]] }
  0x2a   : > { %v369_v33 = vmul.f32 %v368_v31, %v1051_v30  ;;  %v372_v36 = vstv %s829_s8  ;;  %v447_v50 = vstv %s830_s19  ;;  %s841_s22 = sld [smem:[#allocation2 + $0x183]]  ;;  %s270_s28 = scalar_lea.vmem %s1108_s5, %s1032_s17 }
  0x2b   : > { %v366_v32 = vadd.f32 %v365_v28, %v362_v27  ;;  %v373_v39 = vmul.f32 %v372_v36, %v1054_v35  ;;  %v450_v51 = vstv %s831_s9  ;;  %v448_v52 = vmul.f32 %v447_v50, %v1045_v23 }
  0x2c   : > { %v451_v53 = vmul.f32 %v450_v51, %v1047_v24  ;;  %v534_v54 = vstv %s834_s10  ;;  %v537_v55 = vstv %s835_s11  ;;  %v454_v57 = vstv %s832_s12 }
  0x2d   : > { %v370_v38 = vadd.f32 %v369_v33, %v366_v32  ;;  %v535_v58 = vmul.f32 %v534_v54, %v1045_v23  ;;  %v538_v59 = vmul.f32 %v537_v55, %v1047_v24  ;;  %v455_v61 = vmul.f32 %v454_v57, %v1051_v30 }
  0x2e   : > { %v452_v60 = vadd.f32 %v451_v53, %v448_v52  ;;  %v458_v62 = vstv %s833_s13  ;;  %v541_v63 = vstv %s836_s14  ;;  %v621_v0 = vstv %s838_s15 }
  0x2f   : > { %v374_v42 = vadd.f32 %v373_v39, %v370_v38  ;;  %v624_v1 = vstv %s839_s16  ;;  %v459_v3 = vmul.f32 %v458_v62, %v1054_v35  ;;  %v539_v4 = vadd.f32 %v538_v59, %v535_v58 }
  0x30   : > { %v542_v5 = vmul.f32 %v541_v63, %v1051_v30  ;;  %v456_v6 = vadd.f32 %v455_v61, %v452_v60  ;;  %v545_v7 = vstv %s837_s20  ;;  %v622_v8 = vmul.f32 %v621_v0, %v1045_v23 }
  0x31   : > { %v625_v9 = vmul.f32 %v624_v1, %v1047_v24  ;;  %v628_v10 = vstv %s840_s21  ;;  %v546_v13 = vmul.f32 %v545_v7, %v1054_v35  ;;  %v944_v55 = vmov 0  }
  0x32   : > { %v543_v12 = vadd.f32 %v542_v5, %v539_v4  ;;  %v460_v14 = vadd.f32 %v459_v3, %v456_v6 }
  0xfb   : > { %v1039_v16 = vpop.f32.mrb[0].mxu0 }
  0xfc   : > { %v352_v17 = vpop.f32.mrb[1].mxu0 }
  0xfd   : > { %635 = vrot.lane.b32.xlu1 %v352_v17, %s939_s23  ;;  %461 = vrot.lane.b32.xlu0 %v352_v17, %s940_s24 }
 0x101   : > { %409 = vperm.xlu1 %882, %v352_v17   ;;  %548 = vrot.lane.b32.xlu0 %v352_v17, %s941_s25  ;;  %s266_s25 = scalar_lea.vmem %s1107_s4, %s1032_s17 }
 0x105   : > { %884 = vset.pattern.permute.xlu1 %v942_v18  ;;  %497 = vperm.xlu0 %883, %v352_v17   ;;  %v629_v18 = vmul.f32 %v628_v10, %v1051_v30 }
 0x106   : > { %584 = vperm.xlu1 %884, %v352_v17  }
 0x10a   : > { %885 = vset.pattern.permute.xlu1 %v943_v19  ;;  %v632_v19 = vstv %s841_s22 }
 0x10b   : > { %671 = vperm.xlu1 %885, %v352_v17   ;;  %v633_v24 = vmul.f32 %v632_v19, %v1054_v35 }
 0x123   : > { %375 = vxpose.xlu0.b32.start.end [1/1] (short) (narrow) %v352_v17, 8  ;;  %v626_v17 = vadd.f32 %v625_v9, %v622_v8 }
 0x125   : > { %v630_v26 = vadd.f32 %v629_v18, %v626_v17 }
 0x127   : > { %v634_v32 = vadd.f32 %v633_v24, %v630_v26  ;;  %v359_v26 = vld [vmem:[%s266_s25] sm:$0xff] }
 0x16f   : > { %v462_v20 = vpop.permute.xlu0 %461  ;;  %v636_v22 = vpop.permute.xlu1 %635 }
 0x170   : > { %464 = vxpose.xlu1.b32.start.end [1/1] (short) (narrow) %v462_v20, 8 }
 0x173   : > { %v549_v21 = vpop.permute.xlu0 %548 }
 0x174   : > { %551 = vxpose.xlu0.b32.start.end [1/1] (short) (narrow) %v549_v21, 8  ;;  %v547_v21 = vadd.f32 %v546_v13, %v543_v12 }
 0x178   : > { %638 = vxpose.xlu0.b32.start.end [1/1] (short) (narrow) %v636_v22, 8 }
 0x180   : > { %v410_v44 = vpop.permute.xlu1 %409 }
 0x184   : > { %v498_v37 = vpop.permute.xlu0 %497 }
 0x185   : > { %v585_v56 = vpop.permute.xlu1 %584 }
 0x18a   : > { %v672_v2 = vpop.permute.xlu1 %671 }
 0x18e   : > { %886 = vset.pattern.permute.xlu1 %v944_v55 }
 0x1a1   : > { %887 = vset.pattern.permute.xlu0 %v944_v55 }
 0x1a3   : > { %v391_v41 = vpop.trf.xlu0 }
 0x1a4   : > { %v415_v43 = vrot.slane %v391_v41, %v1057_v40 }
 0x1a6   : > { %v416_v45 = vadd.f32 %v415_v43, %v410_v44 }
 0x1a8   : > { %v417_v46 = vadd.f32 %v416_v45, %v374_v42 }
 0x1aa   : > { %vm418_vm1 = vcmp.ge.f32.partialorder %v417_v46, 0.0  ;;  %v419_v47 = vmul.f32 0.01, %v417_v46 }
 0x1ac   : > { %v1060_v48 = vsel %vm418_vm1, %v417_v46, %v419_v47 }
 0x1ad   : > { %v422_v49 = vsel %vm421_vm2, %v1060_v48, -inf }
 0x1ae   : > { %423 = vmax.xlane.f32.xlu0 %v422_v49 }
 0x1f0   : > { %v480_v11 = vpop.trf.xlu1 }
 0x1f1   : > { %v503_v15 = vrot.slane %v480_v11, %v1057_v40 }
 0x1f3   : > { %v504_v20 = vadd.f32 %v503_v15, %v498_v37 }
 0x1f4   : > { %v567_v22 = vpop.trf.xlu0 }
 0x1f5   : > { %v505_v25 = vadd.f32 %v504_v20, %v460_v14  ;;  %v590_v23 = vrot.slane %v567_v22, %v1057_v40 }
 0x1f7   : > { %v591_v27 = vadd.f32 %v590_v23, %v585_v56  ;;  %vm506_vm3 = vcmp.ge.f32.partialorder %v505_v25, 0.0  ;;  %v507_v28 = vmul.f32 0.01, %v505_v25 }
 0x1f8   : > { %v654_v29 = vpop.trf.xlu0 }
 0x1f9   : > { %v592_v31 = vadd.f32 %v591_v27, %v547_v21  ;;  %v677_v33 = vrot.slane %v654_v29, %v1057_v40  ;;  %v508_v34 = vsel %vm506_vm3, %v505_v25, %v507_v28 }
 0x1fa   : > { %v509_v30 = vsel %vm421_vm2, %v508_v34, -inf }
 0x1fb   : > { %v678_v36 = vadd.f32 %v677_v33, %v672_v2  ;;  %510 = vmax.xlane.f32.xlu1 %v509_v30  ;;  %vm593_vm4 = vcmp.ge.f32.partialorder %v592_v31, 0.0  ;;  %v594_v37 = vmul.f32 0.01, %v592_v31 }
 0x1fd   : > { %v679_v38 = vadd.f32 %v678_v36, %v634_v32  ;;  %v595_v39 = vsel %vm593_vm4, %v592_v31, %v594_v37 }
 0x1fe   : > { %v596_v41 = vsel %vm421_vm2, %v595_v39, -inf }
 0x1ff   : > { %597 = vmax.xlane.f32.xlu1 %v596_v41  ;;  %vm680_vm5 = vcmp.ge.f32.partialorder %v679_v38, 0.0  ;;  %v681_v35 = vmul.f32 0.01, %v679_v38 }
 0x201   : > { %v682_v42 = vsel %vm680_vm5, %v679_v38, %v681_v35 }
 0x202   : > { %v683_v43 = vsel %vm421_vm2, %v682_v42, -inf }
 0x203   : > { %684 = vmax.xlane.f32.xlu0 %v683_v43 }
 0x23b   : > { %v424_v44 = vpop.xlane.xlu0 %423 }
 0x23c   : > { %v425_v40 = vrot.slane %v424_v44, 4 }
 0x23e   : > { %v426_v45 = vmax.f32 %v424_v44, %v425_v40 }
 0x240   : > { %v427_v46 = vrot.slane %v426_v45, 2 }
 0x242   : > { %v428_v47 = vmax.f32 %v426_v45, %v427_v46 }
 0x244   : > { %v429_v49 = vrot.slane %v428_v47, 1 }
 0x246   : > { %v430_v50 = vmax.f32 %v428_v47, %v429_v49 }
 0x248   : > { %v431_v51 = vsub.f32 %v1060_v48, %v430_v50 }
 0x24a   : > { %v432_v52 = vmul.f32 1.442695, %v431_v51 }
 0x24c   : > { %888 = vpow2.f32 %v432_v52 }
 0x256   : > { %v889_v53 = vpop.eup %888 }
 0x257   : > { %v434_v54 = vsel %vm421_vm2, %v889_v53, 0.0 }
 0x258   : > { %435 = vadd.xlane.f32.xlu1 %v434_v54 }
 0x288   : > { %v511_v56 = vpop.xlane.xlu1 %510 }
 0x289   : > { %v512_v57 = vrot.slane %v511_v56, 4 }
 0x28b   : > { %v513_v58 = vmax.f32 %v511_v56, %v512_v57 }
 0x28c   : > { %v598_v59 = vpop.xlane.xlu1 %597 }
 0x28d   : > { %v514_v60 = vrot.slane %v513_v58, 2  ;;  %v599_v61 = vrot.slane %v598_v59, 4 }
 0x28f   : > { %v515_v62 = vmax.f32 %v513_v58, %v514_v60  ;;  %v600_v63 = vmax.f32 %v598_v59, %v599_v61 }
 0x290   : > { %v685_v0 = vpop.xlane.xlu0 %684 }
 0x291   : > { %v516_v1 = vrot.slane %v515_v62, 1  ;;  %v601_v48 = vrot.slane %v600_v63, 2  ;;  %v686_v2 = vrot.slane %v685_v0, 4 }
 0x293   : > { %v517_v3 = vmax.f32 %v515_v62, %v516_v1  ;;  %v602_v4 = vmax.f32 %v600_v63, %v601_v48  ;;  %v687_v5 = vmax.f32 %v685_v0, %v686_v2 }
 0x295   : > { %v518_v6 = vsub.f32 %v508_v34, %v517_v3  ;;  %v603_v7 = vrot.slane %v602_v4, 1  ;;  %v688_v8 = vrot.slane %v687_v5, 2 }
 0x297   : > { %v519_v9 = vmul.f32 1.442695, %v518_v6  ;;  %v604_v10 = vmax.f32 %v602_v4, %v603_v7  ;;  %v689_v11 = vmax.f32 %v687_v5, %v688_v8 }
 0x299   : > { %890 = vpow2.f32 %v519_v9  ;;  %v605_v12 = vsub.f32 %v595_v39, %v604_v10  ;;  %v690_v13 = vrot.slane %v689_v11, 1 }
 0x29b   : > { %v606_v14 = vmul.f32 1.442695, %v605_v12  ;;  %v691_v15 = vmax.f32 %v689_v11, %v690_v13 }
 0x29d   : > { %892 = vpow2.f32 %v606_v14  ;;  %v692_v17 = vsub.f32 %v682_v42, %v691_v15 }
 0x29f   : > { %v693_v18 = vmul.f32 1.442695, %v692_v17 }
 0x2a1   : > { %894 = vpow2.f32 %v693_v18 }
 0x2a3   : > { %v891_v19 = vpop.eup %890 }
 0x2a4   : > { %v521_v20 = vsel %vm421_vm2, %v891_v19, 0.0 }
 0x2a5   : > { %522 = vadd.xlane.f32.xlu0 %v521_v20 }
 0x2a7   : > { %v893_v21 = vpop.eup %892 }
 0x2a8   : > { %v608_v22 = vsel %vm421_vm2, %v893_v21, 0.0 }
 0x2a9   : > { %609 = vadd.xlane.f32.xlu1 %v608_v22 }
 0x2ab   : > { %v895_v25 = vpop.eup %894 }
 0x2ac   : > { %v695_v23 = vsel %vm421_vm2, %v895_v25, 0.0 }
 0x2ad   : > { %696 = vadd.xlane.f32.xlu0 %v695_v23 }
 0x2ba   : > { %720 = vperm.xlu1 %886, %v359_v26  }
 0x2e5   : > { %v436_v24 = vpop.xlane.xlu1 %435 }
 0x2e6   : > { %v437_v27 = vrot.slane %v436_v24, 4 }
 0x2e8   : > { %v438_v28 = vadd.f32 %v437_v27, %v436_v24 }
 0x2ea   : > { %v439_v29 = vrot.slane %v438_v28, 2 }
 0x2ec   : > { %v440_v33 = vadd.f32 %v439_v29, %v438_v28 }
 0x2ee   : > { %v441_v38 = vrot.slane %v440_v33, 1 }
 0x2f0   : > { %v442_v40 = vadd.f32 %v441_v38, %v440_v33 }
 0x332   : > { %v523_v31 = vpop.xlane.xlu0 %522 }
 0x333   : > { %v524_v32 = vrot.slane %v523_v31, 4 }
 0x335   : > { %v525_v34 = vadd.f32 %v524_v32, %v523_v31 }
 0x336   : > { %v610_v30 = vpop.xlane.xlu1 %609 }
 0x337   : > { %v526_v36 = vrot.slane %v525_v34, 2  ;;  %v611_v37 = vrot.slane %v610_v30, 4 }
 0x339   : > { %v527_v39 = vadd.f32 %v526_v36, %v525_v34  ;;  %v612_v41 = vadd.f32 %v611_v37, %v610_v30 }
 0x33a   : > { %v697_v35 = vpop.xlane.xlu0 %696  ;;  %v721_v8 = vpop.permute.xlu1 %720 }
 0x33b   : > { %v528_v42 = vrot.slane %v527_v39, 1  ;;  %v613_v43 = vrot.slane %v612_v41, 2  ;;  %v698_v44 = vrot.slane %v697_v35, 4 }
 0x33d   : > { %v529_v45 = vadd.f32 %v528_v42, %v527_v39  ;;  %v614_v46 = vadd.f32 %v613_v43, %v612_v41  ;;  %v699_v47 = vadd.f32 %v698_v44, %v697_v35 }
 0x33f   : > { %896 = vrcp.f32 %v529_v45  ;;  %v615_v49 = vrot.slane %v614_v46, 1  ;;  %v700_v50 = vrot.slane %v699_v47, 2 }
 0x340   : > { %898 = vrcp.f32 %v442_v40 }
 0x341   : > { %v616_v51 = vadd.f32 %v615_v49, %v614_v46  ;;  %v701_v52 = vadd.f32 %v700_v50, %v699_v47 }
 0x343   : > { %900 = vrcp.f32 %v616_v51  ;;  %v702_v53 = vrot.slane %v701_v52, 1 }
 0x345   : > { %v703_v54 = vadd.f32 %v702_v53, %v701_v52 }
 0x347   : > { %902 = vrcp.f32 %v703_v54 }
 0x349   : > { %v897_v55 = vpop.eup %896 }
 0x34a   : > { %v899_v56 = vpop.eup %898  ;;  %v531_v57 = vmul.f32 %v897_v55, %v523_v31 }
 0x34b   : > { %v444_v59 = vmul.f32 %v899_v56, %v436_v24 }
 0x34c   : > { %v532_v61 = vmul.f32 %v531_v57, %v1039_v16 }
 0x34d   : > { %v901_v58 = vpop.eup %900  ;;  %v445_v0 = vmul.f32 %v444_v59, %v1039_v16 }
 0x34e   : > { %v618_v60 = vmul.f32 %v901_v58, %v610_v30 }
 0x34f   : > { %v707_v48 = vsel %vm280_vm0, %v445_v0, %v532_v61 }
 0x350   : > { %v619_v63 = vmul.f32 %v618_v60, %v1039_v16 }
 0x351   : > { %v903_v62 = vpop.eup %902 }
 0x352   : > { %v705_v1 = vmul.f32 %v903_v62, %v697_v35  ;;  %v709_v3 = vsel %vm708_vm6, %v707_v48, %v619_v63 }
 0x354   : > { %v706_v2 = vmul.f32 %v705_v1, %v1039_v16 }
 0x356   : > { %v711_v4 = vsel %vm710_vm7, %v709_v3, %v706_v2 }
 0x357   : > { %v842_v5 = vmul.f32 -1.442695, %v711_v4 }
 0x359   : > { %904 = vpow2.f32 %v842_v5 }
 0x363   : > { %v905_v6 = vpop.eup %904 }
 0x364   : > { %v715_v7 = vadd.f32 1.0, %v905_v6 }
 0x366   : > { %906 = vrcp.f32 %v715_v7 }
 0x370   : > { %v907_v9 = vpop.eup %906 }
 0x371   : > { %v723_v10 = vmul.f32 %v907_v9, %v721_v8 }
 0x373   : > { %724 = vst [vmem:[%s270_s28] sm:$0xff] %v723_v10 }
 0x374 PF: > { %s16_s18 = sadd.s32 1, %s933_s18  }
 0x375   : > { %p13_p1 = scmp.ge.s32.totalorder %s16_s18, 4  }
 0x377   :  { %15 = sbr.rel (!%p13_p1) target bundleno = 1 (0x1), region = 81 }
 0x37e   :  { %744 = vsyncpa [#allocation3], 1 }
 0x37f   :  { %746 = vsyncpa [#allocation3 + $0x1], 1 }

// kernel: mpnn_attn_forward.5
= control target key start
LH: loop header
LB: loop body
LE: loop exit
PB: predicated region body
PF: predicated region fallthrough
CT: control target
= control target key end

     0   :  { %s2210_s0 = inlined_call_operand.vmem [shape: f32[16,32], index: 0, kind: input, shape index: {}]   ;;  %s2211_s1 = inlined_call_operand.vmem [shape: f32[16,32], index: 1, kind: input, shape index: {}]   ;;  %s2212_s2 = inlined_call_operand.vmem [shape: f32[16,1], index: 2, kind: input, shape index: {}]   ;;  %s2213_s3 = inlined_call_operand.vmem [shape: f32[64,128], index: 3, kind: input, shape index: {}]   ;;  %s2214_s4 = inlined_call_operand.vmem [shape: f32[1,128], index: 4, kind: input, shape index: {}]   ;;  %s2215_s5 = inlined_call_operand.vmem [shape: f32[128,256], index: 5, kind: input, shape index: {}]   ;;  %s2216_s6 = inlined_call_operand.vmem [shape: f32[1,256], index: 6, kind: input, shape index: {}]   ;;  %s2217_s7 = inlined_call_operand.vmem [shape: f32[256,128], index: 7, kind: input, shape index: {}]   ;;  %s2218_s8 = inlined_call_operand.vmem [shape: f32[1,128], index: 8, kind: input, shape index: {}]   ;;  %s2219_s9 = inlined_call_operand.vmem [shape: f32[128,3], index: 9, kind: input, shape index: {}]   ;;  %s2220_s10 = inlined_call_operand.vmem [shape: f32[1,3], index: 10, kind: input, shape index: {}]   ;;  %s2221_s11 = inlined_call_operand.vmem [shape: f32[32,128], index: 11, kind: input, shape index: {}]   ;;  %s2222_s12 = inlined_call_operand.vmem [shape: f32[1,128], index: 12, kind: input, shape index: {}]   ;;  %s2223_s13 = inlined_call_operand.vmem [shape: f32[128,256], index: 13, kind: input, shape index: {}]   ;;  %s2224_s14 = inlined_call_operand.vmem [shape: f32[1,256], index: 14, kind: input, shape index: {}]   ;;  %s2225_s15 = inlined_call_operand.vmem [shape: f32[256,128], index: 15, kind: input, shape index: {}]   ;;  %s2226_s16 = inlined_call_operand.vmem [shape: f32[1,128], index: 16, kind: input, shape index: {}]   ;;  %s2227_s17 = inlined_call_operand.vmem [shape: f32[128,3], index: 17, kind: input, shape index: {}]   ;;  %s2228_s18 = inlined_call_operand.vmem [shape: f32[1,3], index: 18, kind: input, shape index: {}]   ;;  %s2229_s19 = inlined_call_operand.hbm [shape: f32[2,3], index: 19, kind: output, shape index: {}]  }
   0x1   :  { %2234 = sst [smem:[#allocation5_spill]] %s2210_s0 }
   0x2   :  { %2235 = sst [smem:[#allocation6_spill]] %s2211_s1 }
   0x3   :  { %2236 = sst [smem:[#allocation7_spill]] %s2212_s2 }
   0x4   :  { %2237 = sst [smem:[#allocation8_spill]] %s2213_s3 }
   0x5   :  { %s2238_s20 = sld [smem:[#allocation6_spill]]  ;;  %s2239_s22 = sld [smem:[#allocation8_spill]]  ;;  %v180_v10 = vld [vmem:[%s2215_s5 + $0x8] sm:$0xff]  ;;  %v182_v11 = vld [vmem:[%s2215_s5 + $0x18] sm:$0xff]  ;;  %v179_v12 = vld [vmem:[%s2215_s5] sm:$0xff] }
   0x6   :  { %s1502_s2 = smov 32   ;;  %v1264_v13 = vpack.c.bf16 %v182_v11, %v180_v10  ;;  %v181_v14 = vld [vmem:[%s2215_s5 + $0x10] sm:$0xff]  ;;  %v184_v15 = vld [vmem:[%s2215_s5 + $0x28] sm:$0xff]  ;;  %v186_v16 = vld [vmem:[%s2215_s5 + $0x38] sm:$0xff] }
   0x7   :  { %v1266_v18 = vpack.c.bf16 %v181_v14, %v179_v12  ;;  %v1268_v19 = vpack.c.bf16 %v186_v16, %v184_v15  ;;  %v183_v20 = vld [vmem:[%s2215_s5 + $0x20] sm:$0xff]  ;;  %v185_v21 = vld [vmem:[%s2215_s5 + $0x30] sm:$0xff]  ;;  %v188_v22 = vld [vmem:[%s2215_s5 + $0x48] sm:$0xff] }
   0x8   :  { %1265 = vmatprep.subr.bf16.mxu1 %v1264_v13  ;;  %v190_v25 = vld [vmem:[%s2215_s5 + $0x58] sm:$0xff]  ;;  %v1270_v26 = vpack.c.bf16 %v185_v21, %v183_v20  ;;  %v187_v28 = vld [vmem:[%s2215_s5 + $0x40] sm:$0xff]  ;;  %v189_v29 = vld [vmem:[%s2215_s5 + $0x50] sm:$0xff] }
   0x9   :  { %1267 = vmatpush1.bf16.msra.mxu1 %v1266_v18  ;;  %v1272_v27 = vpack.c.bf16 %v190_v25, %v188_v22  ;;  %v192_v31 = vld [vmem:[%s2215_s5 + $0x68] sm:$0xff]  ;;  %v194_v32 = vld [vmem:[%s2215_s5 + $0x78] sm:$0xff]  ;;  %v1274_v33 = vpack.c.bf16 %v189_v29, %v187_v28  ;;  %v191_v35 = vld [vmem:[%s2215_s5 + $0x60] sm:$0xff] }
   0xa   :  { %1269 = vmatprep.subr.bf16.mxu1 %v1268_v19  ;;  %v1276_v34 = vpack.c.bf16 %v194_v32, %v192_v31  ;;  %v193_v36 = vld [vmem:[%s2215_s5 + $0x70] sm:$0xff] }
   0xb   :  { %v1609_v0 = vld [vmem:[%s2238_s20] sm:$0xff]  ;;  %v81_v2 = vld [vmem:[%s2239_s22 + $0x8] sm:$0xff]  ;;  %v82_v3 = vld [vmem:[%s2239_s22 + $0x10] sm:$0xff] }
   0xc   :  { %v80_v1 = vld [vmem:[%s2239_s22] sm:$0xff]  ;;  %71 = vrot.lane.b32.xlu0 %v1609_v0, %s1502_s2  ;;  %v83_v4 = vld [vmem:[%s2239_s22 + $0x18] sm:$0xff]  ;;  %v1627_v5 = vld [vmem:[%s2238_s20 + $0x8] sm:$0xff] }
   0xd   :  { %v1248_v6 = vpack.c.bf16 %v81_v2, %v80_v1  ;;  %v1252_v7 = vpack.c.bf16 %v83_v4, %v82_v3  ;;  %v84_v8 = vld [vmem:[%s2239_s22 + $0x20] sm:$0xff]  ;;  %v85_v9 = vld [vmem:[%s2239_s22 + $0x28] sm:$0xff]  ;;  %v86_v23 = vld [vmem:[%s2239_s22 + $0x30] sm:$0xff]  ;;  %1271 = vmatpush1.bf16.msra.mxu1 %v1270_v26 }
   0xe   :  { %v1256_v17 = vpack.c.bf16 %v85_v9, %v84_v8  ;;  %v87_v24 = vld [vmem:[%s2239_s22 + $0x38] sm:$0xff]  ;;  %1273 = vmatprep.subr.bf16.mxu1 %v1272_v27 }
   0xf   :  { %1249 = vmatprep.subr.bf16.mxu0 %v1248_v6  ;;  %v1260_v30 = vpack.c.bf16 %v87_v24, %v86_v23 }
  0x10   :  { %73 = vrot.lane.b32.xlu0 %v1627_v5, %s1502_s2  ;;  %1251 = vmatpush3.bf16.msra.mxu0 %v1248_v6 }
  0x11   :  { %1253 = vmatprep.subr.bf16.mxu0 %v1252_v7 }
  0x14   :  { %1255 = vmatpush3.bf16.msra.mxu0 %v1252_v7 }
  0x15   :  { %1257 = vmatprep.subr.bf16.mxu0 %v1256_v17 }
  0x18   :  { %1259 = vmatpush3.bf16.msra.mxu0 %v1256_v17 }
  0x19   :  { %24 = vsyncpa [#allocation3], 0  ;;  %1261 = vmatprep.subr.bf16.mxu0 %v1260_v30  ;;  %v196_v37 = vld [vmem:[%s2215_s5 + $0x88] sm:$0xff]  ;;  %v198_v38 = vld [vmem:[%s2215_s5 + $0x98] sm:$0xff]  ;;  %1275 = vmatpush1.bf16.msra.mxu1 %v1274_v33  ;;  %v1278_v39 = vpack.c.bf16 %v193_v36, %v191_v35  ;;  %s2240_s3 = sld [smem:[#allocation5_spill]]  ;;  %vm77_vm0 = vcmask 261120  }
  0x1a   :  { %1277 = vmatprep.subr.bf16.mxu1 %v1276_v34  ;;  %v1280_v40 = vpack.c.bf16 %v198_v38, %v196_v37  ;;  %v195_v41 = vld [vmem:[%s2215_s5 + $0x80] sm:$0xff]  ;;  %v197_v42 = vld [vmem:[%s2215_s5 + $0x90] sm:$0xff]  ;;  %v200_v43 = vld [vmem:[%s2215_s5 + $0xa8] sm:$0xff]  ;;  %vm95_vm1 = vcmask 523264   ;;  %v1503_v6 = vmov 0.0   ;;  %vm975_vm2 = vcmask 23552  }
  0x1b   :  { %v202_v44 = vld [vmem:[%s2215_s5 + $0xb8] sm:$0xff]  ;;  %v1282_v45 = vpack.c.bf16 %v197_v42, %v195_v41  ;;  %v199_v47 = vld [vmem:[%s2215_s5 + $0xa0] sm:$0xff]  ;;  %v201_v48 = vld [vmem:[%s2215_s5 + $0xb0] sm:$0xff]  ;;  %287 = vmatprep.mubr.f32.mxu1 %v1503_v6  ;;  %vm990_vm3 = vcmask 1040384   ;;  %vm992_vm4 = vcmask 17408  }
  0x1c   :  { %1263 = vmatpush3.bf16.msra.mxu0 %v1260_v30  ;;  %v1284_v46 = vpack.c.bf16 %v202_v44, %v200_v43  ;;  %v204_v49 = vld [vmem:[%s2215_s5 + $0xc8] sm:$0xff]  ;;  %v206_v50 = vld [vmem:[%s2215_s5 + $0xd8] sm:$0xff]  ;;  %v1286_v51 = vpack.c.bf16 %v201_v48, %v199_v47  ;;  %v203_v53 = vld [vmem:[%s2215_s5 + $0xc0] sm:$0xff] }
  0x1d   :  { %1279 = vmatpush1.bf16.msra.mxu1 %v1278_v39  ;;  %v1288_v52 = vpack.c.bf16 %v206_v50, %v204_v49  ;;  %v205_v54 = vld [vmem:[%s2215_s5 + $0xd0] sm:$0xff]  ;;  %v208_v62 = vld [vmem:[%s2215_s5 + $0xe8] sm:$0xff]  ;;  %v210_v63 = vld [vmem:[%s2215_s5 + $0xf8] sm:$0xff] }
  0x1e   :  { %1281 = vmatprep.subr.bf16.mxu1 %v1280_v40  ;;  %v1290_v55 = vpack.c.bf16 %v205_v54, %v203_v53  ;;  %v1292_v1 = vpack.c.bf16 %v210_v63, %v208_v62  ;;  %v207_v2 = vld [vmem:[%s2215_s5 + $0xe0] sm:$0xff]  ;;  %v209_v3 = vld [vmem:[%s2215_s5 + $0xf0] sm:$0xff]  ;;  %v321_v8 = vld [vmem:[%s2217_s7 + $0x88] sm:$0xff] }
  0x1f   :  { %v63_v56 = vld [vmem:[%s2240_s3] sm:$0xff]  ;;  %v64_v59 = vld [vmem:[%s2240_s3 + $0x8] sm:$0xff]  ;;  %v1294_v4 = vpack.c.bf16 %v209_v3, %v207_v2  ;;  %v322_v12 = vld [vmem:[%s2217_s7 + $0x90] sm:$0xff] }
  0x20   :  { %v320_v7 = vld [vmem:[%s2217_s7 + $0x80] sm:$0xff]  ;;  %v305_v11 = vld [vmem:[%s2217_s7 + $0x8] sm:$0xff]  ;;  %v323_v13 = vld [vmem:[%s2217_s7 + $0x98] sm:$0xff] }
  0x21   :  { %1283 = vmatpush1.bf16.msra.mxu1 %v1282_v45  ;;  %v304_v9 = vld [vmem:[%s2217_s7] sm:$0xff]  ;;  %v1296_v10 = vpack.c.bf16 %v321_v8, %v320_v7  ;;  %v1300_v15 = vpack.c.bf16 %v323_v13, %v322_v12  ;;  %v306_v16 = vld [vmem:[%s2217_s7 + $0x10] sm:$0xff]  ;;  %v307_v17 = vld [vmem:[%s2217_s7 + $0x18] sm:$0xff] }
  0x22   :  { %1285 = vmatprep.subr.bf16.mxu1 %v1284_v46  ;;  %v1298_v14 = vpack.c.bf16 %v305_v11, %v304_v9  ;;  %v324_v18 = vld [vmem:[%s2217_s7 + $0xa0] sm:$0xff]  ;;  %v325_v19 = vld [vmem:[%s2217_s7 + $0xa8] sm:$0xff]  ;;  %v1302_v20 = vpack.c.bf16 %v307_v17, %v306_v16  ;;  %v326_v24 = vld [vmem:[%s2217_s7 + $0xb0] sm:$0xff] }
  0x23   :  { %1297 = vmatprep.subr.bf16.mxu0 %v1296_v10  ;;  %v1304_v21 = vpack.c.bf16 %v325_v19, %v324_v18  ;;  %v308_v22 = vld [vmem:[%s2217_s7 + $0x20] sm:$0xff]  ;;  %v309_v23 = vld [vmem:[%s2217_s7 + $0x28] sm:$0xff]  ;;  %v327_v25 = vld [vmem:[%s2217_s7 + $0xb8] sm:$0xff]  ;;  %v213_v19 = vlaneseq }
  0x24   :  { %v1306_v26 = vpack.c.bf16 %v309_v23, %v308_v22  ;;  %v1308_v27 = vpack.c.bf16 %v327_v25, %v326_v24  ;;  %v310_v28 = vld [vmem:[%s2217_s7 + $0x30] sm:$0xff]  ;;  %v311_v29 = vld [vmem:[%s2217_s7 + $0x38] sm:$0xff]  ;;  %v328_v30 = vld [vmem:[%s2217_s7 + $0xc0] sm:$0xff] }
  0x25   :  { %1287 = vmatpush1.bf16.msra.mxu1 %v1286_v51  ;;  %v329_v31 = vld [vmem:[%s2217_s7 + $0xc8] sm:$0xff]  ;;  %v1310_v32 = vpack.c.bf16 %v311_v29, %v310_v28  ;;  %v312_v34 = vld [vmem:[%s2217_s7 + $0x40] sm:$0xff]  ;;  %v330_v36 = vld [vmem:[%s2217_s7 + $0xd0] sm:$0xff] }
  0x26   :  { %1289 = vmatprep.subr.bf16.mxu1 %v1288_v52  ;;  %v1312_v33 = vpack.c.bf16 %v329_v31, %v328_v30  ;;  %v313_v35 = vld [vmem:[%s2217_s7 + $0x48] sm:$0xff]  ;;  %v331_v37 = vld [vmem:[%s2217_s7 + $0xd8] sm:$0xff]  ;;  %v314_v40 = vld [vmem:[%s2217_s7 + $0x50] sm:$0xff] }
  0x27   :  { %v1314_v38 = vpack.c.bf16 %v313_v35, %v312_v34  ;;  %v1316_v39 = vpack.c.bf16 %v331_v37, %v330_v36  ;;  %v315_v41 = vld [vmem:[%s2217_s7 + $0x58] sm:$0xff]  ;;  %v332_v42 = vld [vmem:[%s2217_s7 + $0xe0] sm:$0xff]  ;;  %v333_v43 = vld [vmem:[%s2217_s7 + $0xe8] sm:$0xff] }
  0x28   :  { %v1318_v44 = vpack.c.bf16 %v315_v41, %v314_v40  ;;  %v1320_v45 = vpack.c.bf16 %v333_v43, %v332_v42  ;;  %v1008_v46 = vld [vmem:[%s2214_s4] ss:$0 sm:$0xff]  ;;  %v317_v54 = vld [vmem:[%s2217_s7 + $0x68] sm:$0xff]  ;;  %v423_v3 = vld [vmem:[%s2219_s9 + $0x18] sm:$0xff]  ;;  %s2241_s4 = sld [smem:[#allocation7_spill]] }
  0x29   :  { %1291 = vmatpush1.bf16.msra.mxu1 %v1290_v55  ;;  %v316_v53 = vld [vmem:[%s2217_s7 + $0x60] sm:$0xff]  ;;  %v421_v63 = vld [vmem:[%s2219_s9 + $0x8] sm:$0xff]  ;;  %v426_v10 = vld [vmem:[%s2219_s9 + $0x30] sm:$0xff] }
  0x2a   :  { %1293 = vmatprep.subr.bf16.mxu1 %v1292_v1  ;;  %v1322_v55 = vpack.c.bf16 %v317_v54, %v316_v53  ;;  %v420_v62 = vld [vmem:[%s2219_s9] sm:$0xff]  ;;  %v422_v1 = vld [vmem:[%s2219_s9 + $0x10] sm:$0xff]  ;;  %v425_v8 = vld [vmem:[%s2219_s9 + $0x28] sm:$0xff] }
  0x2b   :  { %v1328_v2 = vpack.c.bf16 %v421_v63, %v420_v62  ;;  %v424_v7 = vld [vmem:[%s2219_s9 + $0x20] sm:$0xff]  ;;  %v427_v11 = vld [vmem:[%s2219_s9 + $0x38] sm:$0xff]  ;;  %v430_v16 = vld [vmem:[%s2219_s9 + $0x50] sm:$0xff] }
  0x2c   :  { %v1336_v9 = vpack.c.bf16 %v425_v8, %v424_v7  ;;  %v1340_v12 = vpack.c.bf16 %v427_v11, %v426_v10  ;;  %v428_v13 = vld [vmem:[%s2219_s9 + $0x40] sm:$0xff]  ;;  %v431_v17 = vld [vmem:[%s2219_s9 + $0x58] sm:$0xff]  ;;  %v434_v41 = vld [vmem:[%s2219_s9 + $0x70] sm:$0xff] }
  0x2d   :  { %1295 = vmatpush1.bf16.msra.mxu1 %v1294_v4  ;;  %v1332_v4 = vpack.c.bf16 %v423_v3, %v422_v1  ;;  %v1348_v18 = vpack.c.bf16 %v431_v17, %v430_v16  ;;  %v211_v22 = vld [vmem:[%s2216_s6] sm:$0x3]  ;;  %v435_v42 = vld [vmem:[%s2219_s9 + $0x78] sm:$0xff]  ;;  %v620_v63 = vld [vmem:[%s2223_s13 + $0x50] sm:$0xff] }
  0x2e   :  { %1329 = vmatprep.subr.bf16.mxu1 %v1328_v2  ;;  %v1356_v43 = vpack.c.bf16 %v435_v42, %v434_v41  ;;  %v617_v53 = vld [vmem:[%s2223_s13 + $0x38] sm:$0xff]  ;;  %v618_v62 = vld [vmem:[%s2223_s13 + $0x40] sm:$0xff]  ;;  %v623_v1 = vld [vmem:[%s2223_s13 + $0x68] sm:$0xff] }
  0x2f   :  { %v1378_v3 = vpack.c.bf16 %v620_v63, %v618_v62  ;;  %v622_v7 = vld [vmem:[%s2223_s13 + $0x60] sm:$0xff]  ;;  %v624_v8 = vld [vmem:[%s2223_s13 + $0x70] sm:$0xff]  ;;  %v629_v10 = vld [vmem:[%s2223_s13 + $0x98] sm:$0xff] }
  0x30   :  { %v1382_v11 = vpack.c.bf16 %v624_v8, %v622_v7  ;;  %v1011_v17 = vld [vmem:[%s2218_s8] ss:$0 sm:$0xff]  ;;  %v636_v41 = vld [vmem:[%s2223_s13 + $0xd0] sm:$0xff] }
  0x7e   :  { %v72_v57 = vpop.permute.xlu0 %71 }
  0x7f   :  { %v78_v58 = vsel %vm77_vm0, %v63_v56, %v72_v57  ;;  %v334_v56 = vld [vmem:[%s2217_s7 + $0xf0] sm:$0xff]  ;;  %v335_v57 = vld [vmem:[%s2217_s7 + $0xf8] sm:$0xff] }
  0x80   :  { %1164 = vmatprep.mubr.msk.f32.mxu0 %vm95_vm1, %v78_v58  ;;  %v1324_v58 = vpack.c.bf16 %v335_v57, %v334_v56  ;;  %v614_v56 = vld [vmem:[%s2223_s13 + $0x20] sm:$0xff]  ;;  %v616_v57 = vld [vmem:[%s2223_s13 + $0x30] sm:$0xff] }
  0x82   :  { %v74_v60 = vpop.permute.xlu0 %73 }
  0x83   :  { %v79_v61 = vsel %vm77_vm0, %v64_v59, %v74_v60  ;;  %v318_v59 = vld [vmem:[%s2217_s7 + $0x70] sm:$0xff]  ;;  %v319_v60 = vld [vmem:[%s2217_s7 + $0x78] sm:$0xff] }
  0x84   :  { %1165 = vmatmul.mubr.msk.f32.vlgmr.msra.gmra.mrb[0].mxu0 %vm95_vm1, %v79_v61  ;;  %v1326_v61 = vpack.c.bf16 %v319_v60, %v318_v59  ;;  %v621_v59 = vld [vmem:[%s2223_s13 + $0x58] sm:$0xff]  ;;  %v1374_v60 = vpack.c.bf16 %v616_v57, %v614_v56 }
  0x85   :  { %1299 = vmatpush3.bf16.msra.mxu0 %v1298_v14  ;;  %v429_v14 = vld [vmem:[%s2219_s9 + $0x48] sm:$0xff] }
  0x86   :  { %1301 = vmatprep.subr.bf16.mxu0 %v1300_v15  ;;  %v1344_v15 = vpack.c.bf16 %v429_v14, %v428_v13  ;;  %v626_v13 = vld [vmem:[%s2223_s13 + $0x80] sm:$0xff]  ;;  %v628_v14 = vld [vmem:[%s2223_s13 + $0x90] sm:$0xff] }
  0x89   :  { %1303 = vmatpush3.bf16.msra.mxu0 %v1302_v20  ;;  %v1883_v20 = vshrl.u32 %v213_v19, 7 }
  0x8a   :  { %1305 = vmatprep.subr.bf16.mxu0 %v1304_v21 }
  0x8b   :  { %v215_v21 = vsub.s32 0, %v1883_v20  ;;  %v219_v23 = vsub.s32 1, %v1883_v20  ;;  %v861_v20 = vld [vmem:[%s2227_s17 + $0x50] sm:$0xff] }
  0x8d   :  { %1307 = vmatpush3.bf16.msra.mxu0 %v1306_v26  ;;  %v216_v24 = vrot.slane %v211_v22, %v215_v21  ;;  %v220_v25 = vrot.slane %v211_v22, %v219_v23 }
  0x8e   :  { %1309 = vmatprep.subr.bf16.mxu0 %v1308_v27 }
  0x91   :  { %1311 = vmatpush3.bf16.msra.mxu0 %v1310_v32 }
  0x92   :  { %1313 = vmatprep.subr.bf16.mxu0 %v1312_v33 }
  0x95   :  { %1315 = vmatpush3.bf16.msra.mxu0 %v1314_v38  ;;  %v432_v38 = vld [vmem:[%s2219_s9 + $0x60] sm:$0xff] }
  0x96   :  { %1317 = vmatprep.subr.bf16.mxu0 %v1316_v39  ;;  %v433_v39 = vld [vmem:[%s2219_s9 + $0x68] sm:$0xff] }
  0x97   :  { %v1352_v40 = vpack.c.bf16 %v433_v39, %v432_v38  ;;  %v637_v38 = vld [vmem:[%s2223_s13 + $0xd8] sm:$0xff] }
  0x99   :  { %1319 = vmatpush3.bf16.msra.mxu0 %v1318_v44  ;;  %v518_v44 = vld [vmem:[%s2221_s11] sm:$0xff] }
  0x9a   :  { %1321 = vmatprep.subr.bf16.mxu0 %v1320_v45  ;;  %v519_v45 = vld [vmem:[%s2221_s11 + $0x8] sm:$0xff] }
  0x9d   :  { %1323 = vmatpush3.bf16.msra.mxu0 %v1322_v55 }
  0x9e   :  { %1325 = vmatprep.subr.bf16.mxu0 %v1324_v58  ;;  %v619_v58 = vld [vmem:[%s2223_s13 + $0x48] sm:$0xff] }
  0xa1   :  { %1327 = vmatpush3.bf16.msra.mxu0 %v1326_v61  ;;  %v1376_v61 = vpack.c.bf16 %v621_v59, %v619_v58  ;;  %v737_v58 = vld [vmem:[%s2225_s15 + $0x10] sm:$0xff]  ;;  %v738_v59 = vld [vmem:[%s2225_s15 + $0x18] sm:$0xff] }
  0xa2   :  { %v1406_v62 = vpack.c.bf16 %v738_v59, %v737_v58  ;;  %v860_v58 = vld [vmem:[%s2227_s17 + $0x48] sm:$0xff] }
 0x157   :  { %v1166_v47 = vpop.f32.mrb[0].mxu0 }
 0x158   :  { %v168_v48 = vpop.f32.mrb[1].mxu0  ;;  %v174_v50 = vadd.f32 %v1166_v47, %v1008_v46  ;;  %v611_v47 = vld [vmem:[%s2223_s13 + $0x8] sm:$0xff] }
 0x159   :  { %v169_v49 = vadd.f32 %v1008_v46, %v168_v48  ;;  %v1360_v46 = vpack.c.bf16 %v519_v45, %v518_v44  ;;  %v613_v48 = vld [vmem:[%s2223_s13 + $0x18] sm:$0xff] }
 0x15a   :  { %v178_v52 = vmax.f32 %v174_v50, 0.0  ;;  %v1368_v50 = vpack.c.bf16 %v613_v48, %v611_v47  ;;  %v641_v44 = vld [vmem:[%s2223_s13 + $0xf8] sm:$0xff]  ;;  %v640_v47 = vld [vmem:[%s2223_s13 + $0xf0] sm:$0xff] }
 0x15b   :  { %v177_v51 = vmax.f32 %v169_v49, 0.0  ;;  %v610_v49 = vld [vmem:[%s2223_s13] sm:$0xff] }
 0x15c   :  { %1369 = vmatprep.subr.bf16.mxu0 %v1368_v50  ;;  %v752_v50 = vld [vmem:[%s2225_s15 + $0x88] sm:$0xff] }
 0x15d   :  { %288 = vmatmul.mubr.f32.vlgmr.msra.gmra.mrb[0].mxu1 %v177_v51  ;;  %v612_v51 = vld [vmem:[%s2223_s13 + $0x10] sm:$0xff] }
 0x15e   :  { %293 = vmatprep.mubr.f32.mxu1 %v1503_v6  ;;  %1331 = vmatpush3.bf16.msra.mxu1 %v1328_v2  ;;  %v1370_v54 = vpack.c.bf16 %v612_v51, %v610_v49  ;;  %v625_v2 = vld [vmem:[%s2223_s13 + $0x78] sm:$0xff]  ;;  %v751_v49 = vld [vmem:[%s2225_s15 + $0x80] sm:$0xff] }
 0x15f   :  { %1333 = vmatprep.subr.bf16.mxu1 %v1332_v4  ;;  %v735_v51 = vld [vmem:[%s2225_s15] sm:$0xff] }
 0x161   :  { %294 = vmatmul.mubr.f32.gmra.mrb[2].mxu1 %v178_v52  ;;  %v615_v52 = vld [vmem:[%s2223_s13 + $0x28] sm:$0xff] }
 0x162   :  { %1335 = vmatpush3.bf16.msra.mxu1 %v1332_v4  ;;  %v1372_v55 = vpack.c.bf16 %v617_v53, %v615_v52  ;;  %v1380_v4 = vpack.c.bf16 %v625_v2, %v623_v1  ;;  %v1400_v52 = vpack.c.bf16 %v752_v50, %v751_v49  ;;  %v736_v53 = vld [vmem:[%s2225_s15 + $0x8] sm:$0xff]  ;;  %v739_v1 = vld [vmem:[%s2225_s15 + $0x20] sm:$0xff]  ;;  %v854_v49 = vld [vmem:[%s2227_s17 + $0x18] sm:$0xff] }
 0x163   :  { %1337 = vmatprep.subr.bf16.mxu1 %v1336_v9  ;;  %v1402_v56 = vpack.c.bf16 %v736_v53, %v735_v51  ;;  %v740_v2 = vld [vmem:[%s2225_s15 + $0x28] sm:$0xff]  ;;  %v855_v51 = vld [vmem:[%s2227_s17 + $0x20] sm:$0xff] }
 0x164   :  { %v1410_v7 = vpack.c.bf16 %v740_v2, %v739_v1 }
 0x166   :  { %1339 = vmatpush3.bf16.msra.mxu1 %v1336_v9  ;;  %v627_v9 = vld [vmem:[%s2223_s13 + $0x88] sm:$0xff] }
 0x167   :  { %1341 = vmatprep.subr.bf16.mxu1 %v1340_v12 }
 0x16a   :  { %1343 = vmatpush3.bf16.msra.mxu1 %v1340_v12  ;;  %v1384_v12 = vpack.c.bf16 %v629_v10, %v627_v9  ;;  %v741_v9 = vld [vmem:[%s2225_s15 + $0x30] sm:$0xff]  ;;  %v742_v10 = vld [vmem:[%s2225_s15 + $0x38] sm:$0xff] }
 0x16b   :  { %1345 = vmatprep.subr.bf16.mxu1 %v1344_v15 }
 0x16e   :  { %1347 = vmatpush3.bf16.msra.mxu1 %v1344_v15  ;;  %v1386_v15 = vpack.c.bf16 %v628_v14, %v626_v13  ;;  %v1414_v13 = vpack.c.bf16 %v742_v10, %v741_v9 }
 0x16f   :  { %1349 = vmatprep.subr.bf16.mxu1 %v1348_v18 }
 0x172   :  { %1351 = vmatpush3.bf16.msra.mxu1 %v1348_v18 }
 0x173   :  { %1353 = vmatprep.subr.bf16.mxu1 %v1352_v40 }
 0x176   :  { %1355 = vmatpush3.bf16.msra.mxu1 %v1352_v40  ;;  %v634_v40 = vld [vmem:[%s2223_s13 + $0xc0] sm:$0xff] }
 0x177   :  { %1357 = vmatprep.subr.bf16.mxu1 %v1356_v43  ;;  %v1394_v42 = vpack.c.bf16 %v636_v41, %v634_v40  ;;  %v765_v40 = vld [vmem:[%s2225_s15 + $0xf0] sm:$0xff] }
 0x17a   :  { %1359 = vmatpush3.bf16.msra.mxu1 %v1356_v43  ;;  %v639_v43 = vld [vmem:[%s2223_s13 + $0xe8] sm:$0xff] }
 0x17b   :  { %1361 = vmatprep.subr.bf16.mxu1 %v1360_v46  ;;  %v1396_v45 = vpack.c.bf16 %v641_v44, %v639_v43  ;;  %v750_v43 = vld [vmem:[%s2225_s15 + $0x78] sm:$0xff] }
 0x230   :  { %v289_v26 = vpop.f32.mrb[0].mxu1 }
 0x231   :  { %v290_v27 = vadd.f32 %v289_v26, %v216_v24  ;;  %v291_v28 = vpop.f32.mrb[1].mxu1 }
 0x232   :  { %v292_v29 = vadd.f32 %v291_v28, %v220_v25  ;;  %v520_v28 = vld [vmem:[%s2221_s11 + $0x10] sm:$0xff] }
 0x233   :  { %v300_v32 = vmax.f32 %v290_v27, 0.0 }
 0x234   :  { %v301_v30 = vmax.f32 %v292_v29, 0.0  ;;  %v295_v31 = vpop.f32.mrb[2].mxu1  ;;  %v521_v29 = vld [vmem:[%s2221_s11 + $0x18] sm:$0xff] }
 0x235   :  { %v296_v33 = vadd.f32 %v295_v31, %v216_v24  ;;  %v297_v34 = vpop.f32.mrb[3].mxu1 }
 0x236   :  { %v298_v35 = vadd.f32 %v297_v34, %v220_v25  ;;  %407 = vmatprep.mubr.f32.mxu0 %v301_v30  ;;  %v633_v34 = vld [vmem:[%s2223_s13 + $0xb8] sm:$0xff] }
 0x237   :  { %408 = vmatmul.mubr.f32.vlgmr.msra.gmra.mrb[2].mxu0 %v300_v32  ;;  %v302_v37 = vmax.f32 %v296_v33, 0.0  ;;  %v1364_v32 = vpack.c.bf16 %v521_v29, %v520_v28  ;;  %v631_v33 = vld [vmem:[%s2223_s13 + $0xa8] sm:$0xff] }
 0x238   :  { %v303_v36 = vmax.f32 %v298_v35, 0.0  ;;  %1371 = vmatpush1.bf16.msra.mxu0 %v1370_v54  ;;  %v1388_v35 = vpack.c.bf16 %v633_v34, %v631_v33  ;;  %v753_v54 = vld [vmem:[%s2225_s15 + $0x90] sm:$0xff] }
 0x239   :  { %1373 = vmatprep.subr.bf16.mxu0 %v1372_v55  ;;  %v754_v55 = vld [vmem:[%s2225_s15 + $0x98] sm:$0xff] }
 0x23a   :  { %412 = vmatprep.mubr.f32.mxu0 %v303_v36  ;;  %v630_v36 = vld [vmem:[%s2223_s13 + $0xa0] sm:$0xff]  ;;  %v1404_v57 = vpack.c.bf16 %v754_v55, %v753_v54  ;;  %v857_v54 = vld [vmem:[%s2227_s17 + $0x30] sm:$0xff]  ;;  %v858_v55 = vld [vmem:[%s2227_s17 + $0x38] sm:$0xff] }
 0x23b   :  { %413 = vmatmul.mubr.f32.gmra.mrb[4].mxu0 %v302_v37 }
 0x23c   :  { %718 = vmatprep.mubr.f32.mxu0 %v1503_v6  ;;  %1375 = vmatpush1.bf16.msra.mxu0 %v1374_v60  ;;  %v755_v60 = vld [vmem:[%s2225_s15 + $0xa0] sm:$0xff] }
 0x23d   :  { %1377 = vmatprep.subr.bf16.mxu0 %v1376_v61  ;;  %v756_v61 = vld [vmem:[%s2225_s15 + $0xa8] sm:$0xff] }
 0x23e   :  { %v1408_v63 = vpack.c.bf16 %v756_v61, %v755_v60  ;;  %v642_v60 = vld [vmem:[%s2224_s14] sm:$0x3] }
 0x23f   :  { %v647_v61 = vrot.slane %v642_v60, %v215_v21  ;;  %v862_v21 = vld [vmem:[%s2227_s17 + $0x58] sm:$0xff] }
 0x240   :  { %1379 = vmatpush1.bf16.msra.mxu0 %v1378_v3  ;;  %v757_v3 = vld [vmem:[%s2225_s15 + $0xb0] sm:$0xff] }
 0x241   :  { %1381 = vmatprep.subr.bf16.mxu0 %v1380_v4  ;;  %v758_v4 = vld [vmem:[%s2225_s15 + $0xb8] sm:$0xff] }
 0x242   :  { %v1412_v8 = vpack.c.bf16 %v758_v4, %v757_v3 }
 0x244   :  { %1383 = vmatpush1.bf16.msra.mxu0 %v1382_v11  ;;  %v759_v11 = vld [vmem:[%s2225_s15 + $0xc0] sm:$0xff] }
 0x245   :  { %1385 = vmatprep.subr.bf16.mxu0 %v1384_v12  ;;  %v760_v12 = vld [vmem:[%s2225_s15 + $0xc8] sm:$0xff] }
 0x246   :  { %v1416_v14 = vpack.c.bf16 %v760_v12, %v759_v11 }
 0x248   :  { %1387 = vmatpush1.bf16.msra.mxu0 %v1386_v15  ;;  %v743_v15 = vld [vmem:[%s2225_s15 + $0x40] sm:$0xff] }
 0x249   :  { %1389 = vmatprep.subr.bf16.mxu0 %v1388_v35 }
 0x30a   :  { %v1062_v16 = vpop.f32.mrb[2].mxu0 }
 0x30b   :  { %v1063_v18 = vpop.f32.mrb[3].mxu0 }
 0x30c   :  { %v1064_v19 = vadd.f32 %v1063_v18, %v1062_v16  ;;  %v744_v16 = vld [vmem:[%s2225_s15 + $0x48] sm:$0xff]  ;;  %v762_v18 = vld [vmem:[%s2225_s15 + $0xd8] sm:$0xff] }
 0x30e   :  { %v410_v22 = vadd.f32 %v1064_v19, %v1011_v17  ;;  %v1065_v24 = vpop.f32.mrb[4].mxu0  ;;  %v1418_v19 = vpack.c.bf16 %v744_v16, %v743_v15  ;;  %v864_v15 = vld [vmem:[%s2227_s17 + $0x68] sm:$0xff] }
 0x30f   :  { %v1066_v25 = vpop.f32.mrb[5].mxu0 }
 0x310   :  { %v418_v26 = vmax.f32 %v410_v22, 0.0  ;;  %v1067_v27 = vadd.f32 %v1066_v25, %v1065_v24  ;;  %v745_v24 = vld [vmem:[%s2225_s15 + $0x50] sm:$0xff]  ;;  %v746_v25 = vld [vmem:[%s2225_s15 + $0x58] sm:$0xff] }
 0x311   :  { %v1422_v28 = vpack.c.bf16 %v746_v25, %v745_v24  ;;  %v1504_v24 = vmov 0   ;;  %v68_v25 = vld [vmem:[%s2241_s4 + $0x8] sm:$0xff] }
 0x312   :  { %v415_v30 = vadd.f32 %v1067_v27, %v1011_v17  ;;  %1199 = vmatprep.mubr.f32.mxu1 %v418_v26  ;;  %v761_v17 = vld [vmem:[%s2225_s15 + $0xd0] sm:$0xff]  ;;  %v763_v26 = vld [vmem:[%s2225_s15 + $0xe0] sm:$0xff]  ;;  %v764_v27 = vld [vmem:[%s2225_s15 + $0xe8] sm:$0xff]  ;;  %1468 = vset.pattern.permute.xlu1 %v1504_v24 }
 0x313   :  { %v1420_v22 = vpack.c.bf16 %v762_v18, %v761_v17  ;;  %v1424_v29 = vpack.c.bf16 %v764_v27, %v763_v26  ;;  %v865_v17 = vld [vmem:[%s2227_s17 + $0x70] sm:$0xff]  ;;  %v866_v18 = vld [vmem:[%s2227_s17 + $0x78] sm:$0xff]  ;;  %1469 = vset.pattern.permute.xlu0 %v1504_v24  ;;  %v1016_v27 = vld [vmem:[%s2226_s16] ss:$0 sm:$0xff] }
 0x314   :  { %v419_v31 = vmax.f32 %v415_v30, 0.0 }
 0x316   :  { %1200 = vmatmul.mubr.f32.vlgmr.msra.gmra.mrb[4].mxu1 %v419_v31 }
 0x317   :  { %1363 = vmatpush3.bf16.msra.mxu1 %v1360_v46  ;;  %1210 = vmatprep.mubr.msk.f32.mxu1 %vm77_vm0, %v1609_v0  ;;  %v632_v0 = vld [vmem:[%s2223_s13 + $0xb0] sm:$0xff]  ;;  %v638_v46 = vld [vmem:[%s2223_s13 + $0xe0] sm:$0xff] }
 0x318   :  { %1365 = vmatprep.subr.bf16.mxu1 %v1364_v32  ;;  %v1390_v37 = vpack.c.bf16 %v632_v0, %v630_v36  ;;  %v1398_v48 = vpack.c.bf16 %v640_v47, %v638_v46  ;;  %v852_v46 = vld [vmem:[%s2227_s17 + $0x8] sm:$0xff]  ;;  %v853_v47 = vld [vmem:[%s2227_s17 + $0x10] sm:$0xff] }
 0x319   :  { %v1436_v50 = vpack.c.bf16 %v854_v49, %v853_v47 }
 0x31a   :  { %1391 = vmatpush1.bf16.msra.mxu0 %v1390_v37 }
 0x31b   :  { %1367 = vmatpush3.bf16.msra.mxu1 %v1364_v32  ;;  %v1013_v32 = vld [vmem:[%s2222_s12] ss:$0 sm:$0xff] }
 0x31c   :  { %1401 = vmatprep.subr.bf16.mxu1 %v1400_v52  ;;  %v856_v52 = vld [vmem:[%s2227_s17 + $0x28] sm:$0xff] }
 0x31d   :  { %v1440_v53 = vpack.c.bf16 %v856_v52, %v855_v51 }
 0x31e   :  { %1211 = vmatmul.mubr.msk.f32.vlgmr.msra.gmra.mrb[6].mxu1 %vm77_vm0, %v1627_v5  ;;  %v635_v5 = vld [vmem:[%s2223_s13 + $0xc8] sm:$0xff] }
 0x31f   :  { %v1392_v39 = vpack.c.bf16 %v637_v38, %v635_v5  ;;  %1403 = vmatpush3.bf16.msra.mxu1 %v1402_v56  ;;  %v747_v5 = vld [vmem:[%s2225_s15 + $0x60] sm:$0xff]  ;;  %v748_v38 = vld [vmem:[%s2225_s15 + $0x68] sm:$0xff]  ;;  %v1444_v56 = vpack.c.bf16 %v858_v55, %v857_v54 }
 0x320   :  { %1405 = vmatprep.subr.bf16.mxu1 %v1404_v57  ;;  %v859_v57 = vld [vmem:[%s2227_s17 + $0x40] sm:$0xff] }
 0x321   :  { %1393 = vmatprep.subr.bf16.mxu0 %v1392_v39  ;;  %v1426_v39 = vpack.c.bf16 %v748_v38, %v747_v5  ;;  %v1448_v59 = vpack.c.bf16 %v860_v58, %v859_v57  ;;  %v1012_v5 = vld [vmem:[%s2220_s10] ss:$0 sm:$0xff]  ;;  %s1505_s10 = smov [#allocation2]  }
 0x322   :  { %1395 = vmatpush1.bf16.msra.mxu0 %v1394_v42  ;;  %v749_v42 = vld [vmem:[%s2225_s15 + $0x70] sm:$0xff] }
 0x323   :  { %1397 = vmatprep.subr.bf16.mxu0 %v1396_v45  ;;  %1407 = vmatpush3.bf16.msra.mxu1 %v1406_v62  ;;  %v1430_v44 = vpack.c.bf16 %v750_v43, %v749_v42  ;;  %v851_v45 = vld [vmem:[%s2227_s17] sm:$0xff]  ;;  %v651_v62 = vrot.slane %v642_v60, %v219_v23  ;;  %v1452_v23 = vpack.c.bf16 %v862_v21, %v861_v20 }
 0x324   :  { %1409 = vmatprep.subr.bf16.mxu1 %v1408_v63 }
 0x326   :  { %1399 = vmatpush1.bf16.msra.mxu0 %v1398_v48  ;;  %v1432_v48 = vpack.c.bf16 %v852_v46, %v851_v45  ;;  %v1017_v46 = vld [vmem:[%s2228_s18] ss:$0 sm:$0xff]  ;;  %s1000_s18 = sshll.u32 %s1505_s10, 4  ;;  %s1001_s18 = int_to_ptr.vmem [resolvable:$true] %s1000_s18 }
 0x327   :  { %1411 = vmatpush3.bf16.msra.mxu1 %v1410_v7  ;;  %s1478_s12 = scalar_lea.vmem %s1001_s18, 32  ;;  %p1483_p1 = scmp.lt.s32.totalorder %s1001_s18, %s1001_s18 }
 0x328   :  { %1413 = vmatprep.subr.bf16.mxu1 %v1412_v8  ;;  %1433 = vmatprep.subr.bf16.mxu0 %v1432_v48  ;;  %p1479_p0 = scmp.ne.s32.totalorder %s1001_s18, %s1478_s12  ;;  %p1484_p2 = scmp.lt.s32.totalorder %s1478_s12, %s1478_s12 }
 0x32a   :  { %p1485_p3 = por %p1484_p2, %p1483_p1 }
 0x32b   :  { %1415 = vmatpush3.bf16.msra.mxu1 %v1414_v13 }
 0x32c   :  { %1417 = vmatprep.subr.bf16.mxu1 %v1416_v14  ;;  %v863_v14 = vld [vmem:[%s2227_s17 + $0x60] sm:$0xff]  ;;  %p1486_p4 = pnand %p1485_p3, %p1479_p0 }
 0x32d   :  { %v1456_v16 = vpack.c.bf16 %v864_v15, %v863_v14 }
 0x32f   :  { %1419 = vmatpush3.bf16.msra.mxu1 %v1418_v19  ;;  %v1460_v19 = vpack.c.bf16 %v866_v18, %v865_v17 }
 0x330   :  { %1421 = vmatprep.subr.bf16.mxu1 %v1420_v22  ;;  %v67_v22 = vld [vmem:[%s2241_s4] sm:$0xff] }
 0x331   :  { %965 = vperm.xlu1 %1468, %v67_v22  }
 0x333   :  { %1423 = vmatpush3.bf16.msra.mxu1 %v1422_v28 }
 0x334   :  { %1425 = vmatprep.subr.bf16.mxu1 %v1424_v29 }
 0x335   :  { %970 = vperm.xlu1 %1468, %v68_v25  }
 0x337   :  { %1427 = vmatpush3.bf16.msra.mxu1 %v1426_v39 }
 0x3b0   :  { %v966_v45 = vpop.permute.xlu1 %965 }
 0x3b4   :  { %v971_v52 = vpop.permute.xlu1 %970 }
 0x3e9   :  { %v2100_v30 = vpop.f32.mrb[4].mxu1 }
 0x3ea   :  { %v2102_v31 = vpop.f32.mrb[5].mxu1  ;;  %v515_v38 = vadd.f32 %v2100_v30, %v1012_v5 }
 0x3eb   :  { %v510_v39 = vadd.f32 %v1012_v5, %v2102_v31 }
 0x3f1   :  { %v1212_v33 = vpop.f32.mrb[6].mxu1 }
 0x3f2   :  { %v599_v34 = vpop.f32.mrb[7].mxu1  ;;  %v605_v36 = vadd.f32 %v1212_v33, %v1013_v32 }
 0x3f3   :  { %v600_v35 = vadd.f32 %v1013_v32, %v599_v34 }
 0x3f4   :  { %v609_v37 = vmax.f32 %v605_v36, 0.0 }
 0x3f5   :  { %v608_v0 = vmax.f32 %v600_v35, 0.0 }
 0x3f7   :  { %719 = vmatmul.mubr.f32.vlgmr.msra.gmra.mrb[6].mxu0 %v608_v0 }
 0x3f8   :  { %724 = vmatprep.mubr.f32.mxu0 %v1503_v6  ;;  %v766_v6 = vld [vmem:[%s2225_s15 + $0xf8] sm:$0xff]  ;;  %1435 = vmatpush3.bf16.msra.mxu0 %v1432_v48 }
 0x3f9   :  { %v1428_v41 = vpack.c.bf16 %v766_v6, %v765_v40  ;;  %1437 = vmatprep.subr.bf16.mxu0 %v1436_v50  ;;  %v1019_v40 = vmul.f32 -1.442695, %v515_v38  ;;  %v1018_v6 = vmul.f32 -1.442695, %v510_v39 }
 0x3fb   :  { %725 = vmatmul.mubr.f32.gmra.mrb[8].mxu0 %v609_v37  ;;  %1429 = vmatprep.subr.bf16.mxu1 %v1428_v41  ;;  %1470 = vpow2.f32 %v1019_v40 }
 0x3fc   :  { %1431 = vmatpush3.bf16.msra.mxu1 %v1430_v44  ;;  %1439 = vmatpush3.bf16.msra.mxu0 %v1436_v50  ;;  %1472 = vpow2.f32 %v1018_v6 }
 0x3fd   :  { %1441 = vmatprep.subr.bf16.mxu0 %v1440_v53 }
 0x400   :  { %1443 = vmatpush3.bf16.msra.mxu0 %v1440_v53 }
 0x401   :  { %1445 = vmatprep.subr.bf16.mxu0 %v1444_v56 }
 0x404   :  { %1447 = vmatpush3.bf16.msra.mxu0 %v1444_v56 }
 0x405   :  { %1449 = vmatprep.subr.bf16.mxu0 %v1448_v59  ;;  %v1471_v41 = vpop.eup %1470 }
 0x406   :  { %v1473_v42 = vpop.eup %1472  ;;  %v956_v43 = vadd.f32 1.0, %v1471_v41 }
 0x407   :  { %v955_v44 = vadd.f32 1.0, %v1473_v42 }
 0x408   :  { %1451 = vmatpush3.bf16.msra.mxu0 %v1448_v59  ;;  %1474 = vrcp.f32 %v956_v43 }
 0x409   :  { %1453 = vmatprep.subr.bf16.mxu0 %v1452_v23  ;;  %1476 = vrcp.f32 %v955_v44 }
 0x40c   :  { %1455 = vmatpush3.bf16.msra.mxu0 %v1452_v23 }
 0x40d   :  { %1457 = vmatprep.subr.bf16.mxu0 %v1456_v16 }
 0x410   :  { %1459 = vmatpush3.bf16.msra.mxu0 %v1456_v16 }
 0x411   :  { %1461 = vmatprep.subr.bf16.mxu0 %v1460_v19 }
 0x412   :  { %v1475_v49 = vpop.eup %1474 }
 0x413   :  { %v1477_v50 = vpop.eup %1476 }
 0x414   :  { %1463 = vmatpush3.bf16.msra.mxu0 %v1460_v19 }
 0x4ca   :  { %v720_v63 = vpop.f32.mrb[6].mxu0 }
 0x4cb   :  { %v721_v1 = vadd.f32 %v720_v63, %v647_v61  ;;  %v722_v2 = vpop.f32.mrb[7].mxu0 }
 0x4cc   :  { %v723_v3 = vadd.f32 %v722_v2, %v651_v62 }
 0x4cd   :  { %v731_v8 = vmax.f32 %v721_v1, 0.0 }
 0x4ce   :  { %v732_v4 = vmax.f32 %v723_v3, 0.0  ;;  %v726_v7 = vpop.f32.mrb[8].mxu0 }
 0x4cf   :  { %v727_v9 = vadd.f32 %v726_v7, %v647_v61  ;;  %v728_v10 = vpop.f32.mrb[9].mxu0 }
 0x4d0   :  { %v729_v11 = vadd.f32 %v728_v10, %v651_v62  ;;  %838 = vmatprep.mubr.f32.mxu1 %v732_v4 }
 0x4d1   :  { %839 = vmatmul.mubr.f32.vlgmr.msra.gmra.mrb[8].mxu1 %v731_v8  ;;  %v733_v13 = vmax.f32 %v727_v9, 0.0 }
 0x4d2   :  { %v734_v12 = vmax.f32 %v729_v11, 0.0 }
 0x4d4   :  { %843 = vmatprep.mubr.f32.mxu1 %v734_v12 }
 0x4d5   :  { %844 = vmatmul.mubr.f32.gmra.mrb[10].mxu1 %v733_v13 }
 0x5a4   :  { %v1124_v26 = vpop.f32.mrb[8].mxu1 }
 0x5a5   :  { %v1125_v28 = vpop.f32.mrb[9].mxu1 }
 0x5a6   :  { %v1126_v29 = vadd.f32 %v1125_v28, %v1124_v26 }
 0x5a8   :  { %v841_v32 = vadd.f32 %v1126_v29, %v1016_v27  ;;  %v1127_v33 = vpop.f32.mrb[10].mxu1 }
 0x5a9   :  { %v1128_v34 = vpop.f32.mrb[11].mxu1 }
 0x5aa   :  { %v849_v35 = vmax.f32 %v841_v32, 0.0  ;;  %v1129_v36 = vadd.f32 %v1128_v34, %v1127_v33 }
 0x5ac   :  { %v846_v0 = vadd.f32 %v1129_v36, %v1016_v27  ;;  %1245 = vmatprep.mubr.f32.mxu0 %v849_v35 }
 0x5ae   :  { %v850_v37 = vmax.f32 %v846_v0, 0.0 }
 0x5b0   :  { %1246 = vmatmul.mubr.f32.vlgmr.msra.gmra.mrb[10].mxu0 %v850_v37 }
 0x683   :  { %v1247_v47 = vpop.f32.mrb[10].mxu0 }
 0x684   :  { %v946_v48 = vadd.f32 %v1247_v47, %v1017_v46  ;;  %v940_v30 = vpop.f32.mrb[11].mxu0 }
 0x685   :  { %v941_v31 = vadd.f32 %v1017_v46, %v940_v30 }
 0x686   :  { %v962_v51 = vmul.f32 %v1475_v49, %v946_v48 }
 0x687   :  { %v961_v53 = vmul.f32 %v1477_v50, %v941_v31 }
 0x688   :  { %v974_v54 = vmul.f32 %v971_v52, %v962_v51 }
 0x689   :  { %v973_v55 = vmul.f32 %v966_v45, %v961_v53 }
 0x68a   :  { %v983_v56 = vsel %vm975_vm2, %v974_v54, 0.0 }
 0x68b   :  { %v984_v57 = vrot.slane %v983_v56, 4  ;;  %v976_v58 = vsel %vm975_vm2, %v973_v55, 0.0 }
 0x68c   :  { %v977_v59 = vrot.slane %v976_v58, 4 }
 0x68d   :  { %v985_v60 = vadd.f32 %v984_v57, %v983_v56 }
 0x68e   :  { %v978_v61 = vadd.f32 %v977_v59, %v976_v58 }
 0x68f   :  { %v986_v62 = vrot.slane %v985_v60, 2 }
 0x690   :  { %v979_v63 = vrot.slane %v978_v61, 2 }
 0x691   :  { %v987_v1 = vadd.f32 %v986_v62, %v985_v60 }
 0x692   :  { %v980_v2 = vadd.f32 %v979_v63, %v978_v61 }
 0x693   :  { %v988_v3 = vrot.slane %v987_v1, 1 }
 0x694   :  { %v981_v4 = vrot.slane %v980_v2, 1 }
 0x695   :  { %v989_v7 = vadd.f32 %v988_v3, %v987_v1 }
 0x696   :  { %v982_v8 = vadd.f32 %v981_v4, %v980_v2 }
 0x698   :  { %v991_v9 = vsel %vm990_vm3, %v982_v8, %v989_v7 }
 0x699   :  { %993 = vst.msk [vmem:[#allocation2] sm:$0x3] %vm992_vm4, %v991_v9 }
 0x69a   :  { %1489 = shalt.err (!%p1486_p4)
}
 0x69b   :  { %s1490_s23 = scalar_lea.hbm %s2229_s19, 32 }
 0x69c   :  { %p1491_p5 = scmp.ne.s32.totalorder %s2229_s19, %s1490_s23  ;;  %p1494_p6 = scmp.lt.u32.totalorder %s1490_s23, %s2229_s19 }
 0x69e   :  { %p1496_p7 = pnand %p1494_p6, %p1491_p5 }
 0x6a0   :  { %1499 = shalt.err (!%p1496_p7)
}
 0x6a1   :  { %1003 = dma.vmem_to_hbm [thread:$0]  %s1001_s18, 32, %s2229_s19, [#allocation3]  }
 0x6a2   :  { %1500 = dma.done.wait [#allocation3], 32  }
 0x6a3   :  { %1501 = vsyncadd [#allocation3], 4294967264 }
 0x6a4   :  { %1007 = vsyncpa [#allocation3], 1 }

</bundles_post_ra>
